<compile_context>
chip_gen: v6e
topology: v6e:2x2x1
jax: 0.10.0
libtpu: 0.0.40
codegen_flags: <defaults>
</compile_context>

<pallas_src>
import functools
import math

import jax
import jax.numpy as jnp
from jax import lax
from jax.experimental import pallas as pl
from jax.experimental.pallas import tpu as pltpu


# ---------------------------------------------------------------------------
# entmax15 (alpha=1.5 entmax) over the last axis, batched over leading dims.
# `x` must already include the 0.5 factor (folded into the Q projection scale
# by the wrapper).  Bisection pins the support set; the closed-form refit from
# the exact sorted algorithm then gives tau to float precision.  All f32.
# ---------------------------------------------------------------------------
def _entmax15_last(x, n_iter=14):
    x = x - jnp.max(x, axis=-1, keepdims=True)
    lo = jnp.full(x.shape[:-1] + (1,), -1.0, dtype=x.dtype)   # f(lo) >= 0
    hi = jnp.zeros(x.shape[:-1] + (1,), dtype=x.dtype)        # f(hi) <  0

    def body(_, carry):
        lo, hi = carry
        tau = 0.5 * (lo + hi)
        f = jnp.sum(jnp.square(jnp.maximum(x - tau, 0.0)), axis=-1, keepdims=True) - 1.0
        ge = f >= 0.0
        return jnp.where(ge, tau, lo), jnp.where(ge, hi, tau)

    lo, hi = lax.fori_loop(0, n_iter, body, (lo, hi), unroll=True)
    tau_b = 0.5 * (lo + hi)

    # closed-form tau for the support identified by bisection
    supp = (x > tau_b).astype(x.dtype)
    cnt = jnp.sum(supp, axis=-1, keepdims=True)
    mean = jnp.sum(x * supp, axis=-1, keepdims=True) / cnt
    meansq = jnp.sum(x * x * supp, axis=-1, keepdims=True) / cnt
    ss = cnt * (meansq - mean * mean)
    delta = jnp.maximum((1.0 - ss) / cnt, 0.0)
    tau = mean - jnp.sqrt(delta)
    return jnp.square(jnp.maximum(x - tau, 0.0))


# ---------------------------------------------------------------------------
# Pallas kernel: one (batch element, query tile) per grid step.
# ---------------------------------------------------------------------------
def mha_kernel(q_ref, k_ref, v_ref,
               wq_ref, bq_ref, wk_ref, bk_ref, wv_ref, bv_ref,
               wo_ref, bo_ref, o_ref,
               kh_ref, vh_ref, qh_ref, ctxf_ref,
               *, heads, hidden, n_iter):
    cdt = jnp.bfloat16  # MXU operand dtype; accumulation stays f32

    # ---- K/V projection: once per batch element, reused across query tiles.
    @pl.when(pl.program_id(1) == 0)
    def _():
        k = k_ref[0].astype(cdt)                                        # (S, D)
        v = v_ref[0].astype(cdt)
        kp = jnp.dot(k, wk_ref[...], preferred_element_type=jnp.float32) + bk_ref[...]
        vp = jnp.dot(v, wv_ref[...], preferred_element_type=jnp.float32) + bv_ref[...]
        for h in range(heads):                                          # head split:
            sl = slice(h * hidden, (h + 1) * hidden)                    # static lane slices
            kh_ref[h] = kp[:, sl].astype(cdt)                           # (S, hidden)
            vh_ref[h] = vp[:, sl].astype(cdt)

    # ---- Q projection for this tile (0.5/sqrt(hidden) already folded in Wq/bq).
    q = q_ref[0].astype(cdt)                                            # (tq, D)
    qp = jnp.dot(q, wq_ref[...], preferred_element_type=jnp.float32) + bq_ref[...]
    for h in range(heads):
        qh_ref[h] = qp[:, h * hidden:(h + 1) * hidden].astype(cdt)      # (tq, hidden)

    # ---- attention: batched over heads (leading batch dim), bf16 x bf16 -> f32.
    scores = jnp.einsum('hqe,hke->hqk', qh_ref[...], kh_ref[...],
                        preferred_element_type=jnp.float32)             # (h, tq, S)
    attn = _entmax15_last(scores, n_iter=n_iter)                        # f32
    ctx = jnp.einsum('hqk,hke->hqe', attn.astype(cdt), vh_ref[...],
                     preferred_element_type=jnp.float32)                # (h, tq, hidden)

    # ---- fold heads back into the lane dim, single fused output projection.
    for h in range(heads):
        ctxf_ref[:, h * hidden:(h + 1) * hidden] = ctx[h].astype(cdt)   # (tq, D) bf16
    out = jnp.dot(ctxf_ref[...], wo_ref[...],
                  preferred_element_type=jnp.float32) + bo_ref[...]     # (tq, D) f32
    o_ref[0] = out.astype(o_ref.dtype)


# ---------------------------------------------------------------------------
# Wrapper
# ---------------------------------------------------------------------------
def multi_head_attention(q, k, v, params, heads, *, q_tile=None, n_iter=14):
    bs, S, D = q.shape
    assert D % heads == 0
    hidden = D // heads
    # attention 1/sqrt(hidden) and entmax15's internal *0.5 folded into Wq/bq
    scale = 0.5 / math.sqrt(hidden)

    f32, bf16 = jnp.float32, jnp.bfloat16

    # PyTorch Linear stores W as (out, in); y = x @ W.T + b.  Matmul operands
    # go to bf16 (MXU-native, halves weight VMEM); biases stay f32 (added to
    # the f32 accumulator).
    wq = (params["wq"].astype(f32).T * scale).astype(bf16)
    bq = (params["bq"].astype(f32) * scale).reshape(1, D)
    wk = params["wk"].astype(f32).T.astype(bf16)
    bk = params["bk"].astype(f32).reshape(1, D)
    wv = params["wv"].astype(f32).T.astype(bf16)
    bv = params["bv"].astype(f32).reshape(1, D)
    wo = params["wo"].astype(f32).T.astype(bf16)
    bo = params["bo"].astype(f32).reshape(1, D)

    # ---- generation-aware VMEM budget & query-tile selection ----
    try:
        vmem_cap = pltpu.get_tpu_info().vmem_capacity_bytes
    except Exception:
        vmem_cap = 64 * 1024 * 1024           # conservative (v7x-sized) fallback
    budget = int(0.75 * vmem_cap)             # headroom for compiler scratch

    in_itm = jnp.dtype(q.dtype).itemsize

    def vmem_estimate(tq):
        est = 2 * (tq * D + 2 * S * D) * in_itm       # double-buffered q/k/v blocks
        est += 2 * tq * D * in_itm                    # double-buffered output block
        est += 4 * D * D * 2 + 4 * D * 4              # bf16 weights + f32 biases
        est += 2 * heads * S * hidden * 2             # kh/vh scratch (bf16)
        est += heads * tq * hidden * 2 + tq * D * 2   # qh / ctx_flat scratch (bf16)
        est += 6 * heads * tq * S * 4                 # scores + entmax f32 temporaries
        est += 3 * tq * D * 4                         # qp / ctx / out f32
        return est

    if q_tile is None:
        cands = [S] + [c for c in (2048, 1024, 512, 256, 128, 64, 32, 16, 8)
                       if c < S and S % c == 0]
        q_tile = cands[-1]
        for c in cands:                        # biggest tile that fits the budget
            if vmem_estimate(c) <= budget:
                q_tile = c
                break
    assert S % q_tile == 0 and (q_tile == S or q_tile % 8 == 0)
    n_qt = S // q_tile
    vmem_limit = int(min(budget, max(32 * 1024 * 1024, 2 * vmem_estimate(q_tile))))

    kernel = functools.partial(mha_kernel, heads=heads, hidden=hidden, n_iter=n_iter)

    # NOTE: for production shapes D is a multiple of 128, so the (1, q_tile, D)
    # output blocks give lane-dense, unmasked stores.
    q_spec = pl.BlockSpec((1, q_tile, D), lambda b, t: (b, t, 0))
    kv_spec = pl.BlockSpec((1, S, D), lambda b, t: (b, 0, 0))   # resident per batch elem

    def const(shape):
        return pl.BlockSpec(shape, lambda b, t, _n=len(shape): (0,) * _n)

    return pl.pallas_call(
        kernel,
        out_shape=jax.ShapeDtypeStruct((bs, S, D), q.dtype),
        grid=(bs, n_qt),
        in_specs=[q_spec, kv_spec, kv_spec,
                  const((D, D)), const((1, D)),     # Wq (scaled, bf16), bq (scaled, f32)
                  const((D, D)), const((1, D)),     # Wk, bk
                  const((D, D)), const((1, D)),     # Wv, bv
                  const((D, D)), const((1, D))],    # Wo, bo
        out_specs=q_spec,
        scratch_shapes=[
            pltpu.VMEM((heads, S, hidden), bf16),        # kh (persists across query tiles)
            pltpu.VMEM((heads, S, hidden), bf16),        # vh
            pltpu.VMEM((heads, q_tile, hidden), bf16),   # qh (head-major staging)
            pltpu.VMEM((q_tile, D), bf16),               # ctx with heads folded to lanes
        ],
        compiler_params=pltpu.CompilerParams(
            # batch axis parallel (megacore); the query-tile axis must stay in
            # order so the K/V projections hoisted into scratch at t==0 are reused.
            dimension_semantics=("parallel", "arbitrary"),
            vmem_limit_bytes=vmem_limit,
        ),
    )(q, k, v, wq, bq, wk, bk, wv, bv, wo, bo)


# ---------------------------------------------------------------------------
# Pure-JAX reference (exact sorted entmax15) for verification.
# ---------------------------------------------------------------------------
def entmax15_ref(x):
    x = x - jnp.max(x, axis=-1, keepdims=True)
    x = x / 2.0
    xs = jnp.sort(x, axis=-1)[..., ::-1]
    rho = jnp.arange(1, x.shape[-1] + 1, dtype=x.dtype)
    mean = jnp.cumsum(xs, axis=-1) / rho
    meansq = jnp.cumsum(xs * xs, axis=-1) / rho
    ss = rho * (meansq - mean * mean)
    delta = (1.0 - ss) / rho
    tau = mean - jnp.sqrt(jnp.clip(delta, 0.0, None))
    support = jnp.sum((tau <= xs).astype(jnp.int32), axis=-1, keepdims=True)
    tau_star = jnp.take_along_axis(tau, support - 1, axis=-1)
    return jnp.square(jnp.clip(x - tau_star, 0.0, None))


def mha_ref(q, k, v, params, heads):
    bs, S, D = q.shape
    hid = D // heads
    lin = lambda x, w, b: x @ w.T + b
    qp = lin(q, params["wq"], params["bq"]).reshape(bs, S, heads, hid).transpose(0, 2, 1, 3)
    kp = lin(k, params["wk"], params["bk"]).reshape(bs, S, heads, hid).transpose(0, 2, 1, 3)
    vp = lin(v, params["wv"], params["bv"]).reshape(bs, S, heads, hid).transpose(0, 2, 1, 3)
    scores = jnp.einsum("bhqd,bhkd->bhqk", qp, kp) / math.sqrt(hid)
    attn = entmax15_ref(scores)
    y = jnp.einsum("bhqk,bhkd->bhqd", attn, vp).transpose(0, 2, 1, 3).reshape(bs, S, D)
    return lin(y, params["wo"], params["bo"])


if __name__ == "__main__":
    bs, S, D, heads = 2, 8, 32, 4
    key = jax.random.PRNGKey(0)
    ks = jax.random.split(key, 11)

    q = jax.random.normal(ks[0], (bs, S, D), jnp.float32)
    k = jax.random.normal(ks[1], (bs, S, D), jnp.float32)
    v = jax.random.normal(ks[2], (bs, S, D), jnp.float32)

    bound = 1.0 / math.sqrt(D)  # PyTorch nn.Linear default init range
    u = lambda kk, shape: jax.random.uniform(kk, shape, jnp.float32, -bound, bound)
    params = dict(
        wq=u(ks[3], (D, D)), bq=u(ks[4], (1, D)),
        wk=u(ks[5], (D, D)), bk=u(ks[6], (1, D)),
        wv=u(ks[7], (D, D)), bv=u(ks[8], (1, D)),
        wo=u(ks[9], (D, D)), bo=u(ks[10], (1, D)),
    )

    out = jax.block_until_ready(multi_head_attention(q, k, v, params, heads))
    ref = mha_ref(q, k, v, params, heads)
    assert out.shape == (bs, S, D)
    err = float(jnp.max(jnp.abs(out - ref)))
    # bf16 matmul operands with f32 accumulation: allow low-precision tolerance.
    assert err < 5e-2, err
    print("KERNEL_OK")
</pallas_src>

<mosaic_0001>
module attributes {stable_mosaic.version = 11 : i64} {
  func.func @mha_kernel(%arg0: i32, %arg1: i32, %arg2: memref<1x8x32xf32, #tpu.memory_space<vmem>>, %arg3: memref<1x8x32xf32, #tpu.memory_space<vmem>>, %arg4: memref<1x8x32xf32, #tpu.memory_space<vmem>>, %arg5: memref<32x32xbf16, #tpu.memory_space<vmem>>, %arg6: memref<1x32xf32, #tpu.memory_space<vmem>>, %arg7: memref<32x32xbf16, #tpu.memory_space<vmem>>, %arg8: memref<1x32xf32, #tpu.memory_space<vmem>>, %arg9: memref<32x32xbf16, #tpu.memory_space<vmem>>, %arg10: memref<1x32xf32, #tpu.memory_space<vmem>>, %arg11: memref<32x32xbf16, #tpu.memory_space<vmem>>, %arg12: memref<1x32xf32, #tpu.memory_space<vmem>>, %arg13: memref<1x8x32xf32, #tpu.memory_space<vmem>>, %arg14: memref<4x8x8xbf16, #tpu.memory_space<vmem>>, %arg15: memref<4x8x8xbf16, #tpu.memory_space<vmem>>, %arg16: memref<4x8x8xbf16, #tpu.memory_space<vmem>>, %arg17: memref<8x32xbf16, #tpu.memory_space<vmem>>) attributes {dimension_semantics = [#tpu.dimension_semantics<parallel>, #tpu.dimension_semantics<arbitrary>], iteration_bounds = array<i64: 2, 1>, scalar_prefetch = 0 : i64, scratch_operands = 4 : i64, tpu.core_type = #tpu.core_type<tc>, window_params = [{transform_indices = @transform_0, window_bounds = array<i64: 1, 8, 32>}, {transform_indices = @transform_1, window_bounds = array<i64: 1, 8, 32>}, {transform_indices = @transform_2, window_bounds = array<i64: 1, 8, 32>}, {pipeline_mode = #tpu.pipeline_mode<synchronous>, transform_indices = @transform_3, window_bounds = array<i64: 32, 32>}, {pipeline_mode = #tpu.pipeline_mode<synchronous>, transform_indices = @transform_4, window_bounds = array<i64: 1, 32>}, {pipeline_mode = #tpu.pipeline_mode<synchronous>, transform_indices = @transform_5, window_bounds = array<i64: 32, 32>}, {pipeline_mode = #tpu.pipeline_mode<synchronous>, transform_indices = @transform_6, window_bounds = array<i64: 1, 32>}, {pipeline_mode = #tpu.pipeline_mode<synchronous>, transform_indices = @transform_7, window_bounds = array<i64: 32, 32>}, {pipeline_mode = #tpu.pipeline_mode<synchronous>, transform_indices = @transform_8, window_bounds = array<i64: 1, 32>}, {pipeline_mode = #tpu.pipeline_mode<synchronous>, transform_indices = @transform_9, window_bounds = array<i64: 32, 32>}, {pipeline_mode = #tpu.pipeline_mode<synchronous>, transform_indices = @transform_10, window_bounds = array<i64: 1, 32>}, {transform_indices = @transform_11, window_bounds = array<i64: 1, 8, 32>}]} {
    %c0_i32 = arith.constant 0 : i32
    %0 = arith.cmpi eq, %arg1, %c0_i32 : i32
    %1 = arith.extui %0 : i1 to i32
    %c0_i32_0 = arith.constant 0 : i32
    %2 = arith.cmpi ne, %1, %c0_i32_0 : i32
    scf.if %2 {
      %c0_123 = arith.constant 0 : index
      %c0_124 = arith.constant 0 : index
      %c0_125 = arith.constant 0 : index
      %325 = vector.load %arg3[%c0_123, %c0_124, %c0_125] : memref<1x8x32xf32, #tpu.memory_space<vmem>>, vector<1x8x32xf32>
      %326 = vector.shape_cast %325 : vector<1x8x32xf32> to vector<8x32xf32>
      %327 = arith.truncf %326 : vector<8x32xf32> to vector<8x32xbf16>
      %c0_126 = arith.constant 0 : index
      %c0_127 = arith.constant 0 : index
      %c0_128 = arith.constant 0 : index
      %328 = vector.load %arg4[%c0_126, %c0_127, %c0_128] : memref<1x8x32xf32, #tpu.memory_space<vmem>>, vector<1x8x32xf32>
      %329 = vector.shape_cast %328 : vector<1x8x32xf32> to vector<8x32xf32>
      %330 = arith.truncf %329 : vector<8x32xf32> to vector<8x32xbf16>
      %c0_129 = arith.constant 0 : index
      %c0_130 = arith.constant 0 : index
      %331 = vector.load %arg7[%c0_129, %c0_130] : memref<32x32xbf16, #tpu.memory_space<vmem>>, vector<32x32xbf16>
      %cst_131 = arith.constant dense<0.000000e+00> : vector<8x32xf32>
      %332 = tpu.matmul %327, %331, %cst_131 {dimension_numbers = #tpu.dot_dimension_numbers<[1], [0], [0], [1], [0, 0, 1, 1], [], []>} : vector<8x32xbf16>, vector<32x32xbf16>, vector<8x32xf32> -> vector<8x32xf32>
      %c0_132 = arith.constant 0 : index
      %c0_133 = arith.constant 0 : index
      %333 = vector.load %arg8[%c0_132, %c0_133] : memref<1x32xf32, #tpu.memory_space<vmem>>, vector<1x32xf32>
      %334 = vector.broadcast %333 : vector<1x32xf32> to vector<8x32xf32>
      %335 = arith.addf %332, %334 : vector<8x32xf32>
      %c0_134 = arith.constant 0 : index
      %c0_135 = arith.constant 0 : index
      %336 = vector.load %arg9[%c0_134, %c0_135] : memref<32x32xbf16, #tpu.memory_space<vmem>>, vector<32x32xbf16>
      %cst_136 = arith.constant dense<0.000000e+00> : vector<8x32xf32>
      %337 = tpu.matmul %330, %336, %cst_136 {dimension_numbers = #tpu.dot_dimension_numbers<[1], [0], [0], [1], [0, 0, 1, 1], [], []>} : vector<8x32xbf16>, vector<32x32xbf16>, vector<8x32xf32> -> vector<8x32xf32>
      %c0_137 = arith.constant 0 : index
      %c0_138 = arith.constant 0 : index
      %338 = vector.load %arg10[%c0_137, %c0_138] : memref<1x32xf32, #tpu.memory_space<vmem>>, vector<1x32xf32>
      %339 = vector.broadcast %338 : vector<1x32xf32> to vector<8x32xf32>
      %340 = arith.addf %337, %339 : vector<8x32xf32>
      %341 = vector.extract_strided_slice %335 {offsets = [0, 0], sizes = [8, 8], strides = [1, 1]} : vector<8x32xf32> to vector<8x8xf32>
      %342 = arith.truncf %341 : vector<8x8xf32> to vector<8x8xbf16>
      %c0_139 = arith.constant 0 : index
      %c0_140 = arith.constant 0 : index
      %c0_141 = arith.constant 0 : index
      %343 = vector.load %arg14[%c0_139, %c0_140, %c0_141] : memref<4x8x8xbf16, #tpu.memory_space<vmem>>, vector<1x8x8xbf16>
      %344 = vector.shape_cast %343 : vector<1x8x8xbf16> to vector<8x8xbf16>
      %345 = vector.shape_cast %342 : vector<8x8xbf16> to vector<1x8x8xbf16>
      tpu.vector_store %arg14[%c0_139, %c0_140, %c0_141], %345 {strides = array<i32>} : memref<4x8x8xbf16, #tpu.memory_space<vmem>>, vector<1x8x8xbf16>,
      %346 = vector.extract_strided_slice %340 {offsets = [0, 0], sizes = [8, 8], strides = [1, 1]} : vector<8x32xf32> to vector<8x8xf32>
      %347 = arith.truncf %346 : vector<8x8xf32> to vector<8x8xbf16>
      %c0_142 = arith.constant 0 : index
      %c0_143 = arith.constant 0 : index
      %c0_144 = arith.constant 0 : index
      %348 = vector.load %arg15[%c0_142, %c0_143, %c0_144] : memref<4x8x8xbf16, #tpu.memory_space<vmem>>, vector<1x8x8xbf16>
      %349 = vector.shape_cast %348 : vector<1x8x8xbf16> to vector<8x8xbf16>
      %350 = vector.shape_cast %347 : vector<8x8xbf16> to vector<1x8x8xbf16>
      tpu.vector_store %arg15[%c0_142, %c0_143, %c0_144], %350 {strides = array<i32>} : memref<4x8x8xbf16, #tpu.memory_space<vmem>>, vector<1x8x8xbf16>,
      %351 = vector.extract_strided_slice %335 {offsets = [0, 8], sizes = [8, 8], strides = [1, 1]} : vector<8x32xf32> to vector<8x8xf32>
      %352 = arith.truncf %351 : vector<8x8xf32> to vector<8x8xbf16>
      %c1_145 = arith.constant 1 : index
      %c0_146 = arith.constant 0 : index
      %c0_147 = arith.constant 0 : index
      %353 = vector.load %arg14[%c1_145, %c0_146, %c0_147] : memref<4x8x8xbf16, #tpu.memory_space<vmem>>, vector<1x8x8xbf16>
      %354 = vector.shape_cast %353 : vector<1x8x8xbf16> to vector<8x8xbf16>
      %355 = vector.shape_cast %352 : vector<8x8xbf16> to vector<1x8x8xbf16>
      tpu.vector_store %arg14[%c1_145, %c0_146, %c0_147], %355 {strides = array<i32>} : memref<4x8x8xbf16, #tpu.memory_space<vmem>>, vector<1x8x8xbf16>,
      %356 = vector.extract_strided_slice %340 {offsets = [0, 8], sizes = [8, 8], strides = [1, 1]} : vector<8x32xf32> to vector<8x8xf32>
      %357 = arith.truncf %356 : vector<8x8xf32> to vector<8x8xbf16>
      %c1_148 = arith.constant 1 : index
      %c0_149 = arith.constant 0 : index
      %c0_150 = arith.constant 0 : index
      %358 = vector.load %arg15[%c1_148, %c0_149, %c0_150] : memref<4x8x8xbf16, #tpu.memory_space<vmem>>, vector<1x8x8xbf16>
      %359 = vector.shape_cast %358 : vector<1x8x8xbf16> to vector<8x8xbf16>
      %360 = vector.shape_cast %357 : vector<8x8xbf16> to vector<1x8x8xbf16>
      tpu.vector_store %arg15[%c1_148, %c0_149, %c0_150], %360 {strides = array<i32>} : memref<4x8x8xbf16, #tpu.memory_space<vmem>>, vector<1x8x8xbf16>,
      %361 = vector.extract_strided_slice %335 {offsets = [0, 16], sizes = [8, 8], strides = [1, 1]} : vector<8x32xf32> to vector<8x8xf32>
      %362 = arith.truncf %361 : vector<8x8xf32> to vector<8x8xbf16>
      %c2_151 = arith.constant 2 : index
      %c0_152 = arith.constant 0 : index
      %c0_153 = arith.constant 0 : index
      %363 = vector.load %arg14[%c2_151, %c0_152, %c0_153] : memref<4x8x8xbf16, #tpu.memory_space<vmem>>, vector<1x8x8xbf16>
      %364 = vector.shape_cast %363 : vector<1x8x8xbf16> to vector<8x8xbf16>
      %365 = vector.shape_cast %362 : vector<8x8xbf16> to vector<1x8x8xbf16>
      tpu.vector_store %arg14[%c2_151, %c0_152, %c0_153], %365 {strides = array<i32>} : memref<4x8x8xbf16, #tpu.memory_space<vmem>>, vector<1x8x8xbf16>,
      %366 = vector.extract_strided_slice %340 {offsets = [0, 16], sizes = [8, 8], strides = [1, 1]} : vector<8x32xf32> to vector<8x8xf32>
      %367 = arith.truncf %366 : vector<8x8xf32> to vector<8x8xbf16>
      %c2_154 = arith.constant 2 : index
      %c0_155 = arith.constant 0 : index
      %c0_156 = arith.constant 0 : index
      %368 = vector.load %arg15[%c2_154, %c0_155, %c0_156] : memref<4x8x8xbf16, #tpu.memory_space<vmem>>, vector<1x8x8xbf16>
      %369 = vector.shape_cast %368 : vector<1x8x8xbf16> to vector<8x8xbf16>
      %370 = vector.shape_cast %367 : vector<8x8xbf16> to vector<1x8x8xbf16>
      tpu.vector_store %arg15[%c2_154, %c0_155, %c0_156], %370 {strides = array<i32>} : memref<4x8x8xbf16, #tpu.memory_space<vmem>>, vector<1x8x8xbf16>,
      %371 = vector.extract_strided_slice %335 {offsets = [0, 24], sizes = [8, 8], strides = [1, 1]} : vector<8x32xf32> to vector<8x8xf32>
      %372 = arith.truncf %371 : vector<8x8xf32> to vector<8x8xbf16>
      %c3_157 = arith.constant 3 : index
      %c0_158 = arith.constant 0 : index
      %c0_159 = arith.constant 0 : index
      %373 = vector.load %arg14[%c3_157, %c0_158, %c0_159] : memref<4x8x8xbf16, #tpu.memory_space<vmem>>, vector<1x8x8xbf16>
      %374 = vector.shape_cast %373 : vector<1x8x8xbf16> to vector<8x8xbf16>
      %375 = vector.shape_cast %372 : vector<8x8xbf16> to vector<1x8x8xbf16>
      tpu.vector_store %arg14[%c3_157, %c0_158, %c0_159], %375 {strides = array<i32>} : memref<4x8x8xbf16, #tpu.memory_space<vmem>>, vector<1x8x8xbf16>,
      %376 = vector.extract_strided_slice %340 {offsets = [0, 24], sizes = [8, 8], strides = [1, 1]} : vector<8x32xf32> to vector<8x8xf32>
      %377 = arith.truncf %376 : vector<8x8xf32> to vector<8x8xbf16>
      %c3_160 = arith.constant 3 : index
      %c0_161 = arith.constant 0 : index
      %c0_162 = arith.constant 0 : index
      %378 = vector.load %arg15[%c3_160, %c0_161, %c0_162] : memref<4x8x8xbf16, #tpu.memory_space<vmem>>, vector<1x8x8xbf16>
      %379 = vector.shape_cast %378 : vector<1x8x8xbf16> to vector<8x8xbf16>
      %380 = vector.shape_cast %377 : vector<8x8xbf16> to vector<1x8x8xbf16>
      tpu.vector_store %arg15[%c3_160, %c0_161, %c0_162], %380 {strides = array<i32>} : memref<4x8x8xbf16, #tpu.memory_space<vmem>>, vector<1x8x8xbf16>,
    } else {
    }
    %c0 = arith.constant 0 : index
    %c0_1 = arith.constant 0 : index
    %c0_2 = arith.constant 0 : index
    %3 = vector.load %arg2[%c0, %c0_1, %c0_2] : memref<1x8x32xf32, #tpu.memory_space<vmem>>, vector<1x8x32xf32>
    %4 = vector.shape_cast %3 : vector<1x8x32xf32> to vector<8x32xf32>
    %5 = arith.truncf %4 : vector<8x32xf32> to vector<8x32xbf16>
    %c0_3 = arith.constant 0 : index
    %c0_4 = arith.constant 0 : index
    %6 = vector.load %arg5[%c0_3, %c0_4] : memref<32x32xbf16, #tpu.memory_space<vmem>>, vector<32x32xbf16>
    %cst = arith.constant dense<0.000000e+00> : vector<8x32xf32>
    %7 = tpu.matmul %5, %6, %cst {dimension_numbers = #tpu.dot_dimension_numbers<[1], [0], [0], [1], [0, 0, 1, 1], [], []>} : vector<8x32xbf16>, vector<32x32xbf16>, vector<8x32xf32> -> vector<8x32xf32>
    %c0_5 = arith.constant 0 : index
    %c0_6 = arith.constant 0 : index
    %8 = vector.load %arg6[%c0_5, %c0_6] : memref<1x32xf32, #tpu.memory_space<vmem>>, vector<1x32xf32>
    %9 = vector.broadcast %8 : vector<1x32xf32> to vector<8x32xf32>
    %10 = arith.addf %7, %9 : vector<8x32xf32>
    %11 = vector.extract_strided_slice %10 {offsets = [0, 0], sizes = [8, 8], strides = [1, 1]} : vector<8x32xf32> to vector<8x8xf32>
    %12 = arith.truncf %11 : vector<8x8xf32> to vector<8x8xbf16>
    %c0_7 = arith.constant 0 : index
    %c0_8 = arith.constant 0 : index
    %c0_9 = arith.constant 0 : index
    %13 = vector.load %arg16[%c0_7, %c0_8, %c0_9] : memref<4x8x8xbf16, #tpu.memory_space<vmem>>, vector<1x8x8xbf16>
    %14 = vector.shape_cast %13 : vector<1x8x8xbf16> to vector<8x8xbf16>
    %15 = vector.shape_cast %12 : vector<8x8xbf16> to vector<1x8x8xbf16>
    tpu.vector_store %arg16[%c0_7, %c0_8, %c0_9], %15 {strides = array<i32>} : memref<4x8x8xbf16, #tpu.memory_space<vmem>>, vector<1x8x8xbf16>,
    %16 = vector.extract_strided_slice %10 {offsets = [0, 8], sizes = [8, 8], strides = [1, 1]} : vector<8x32xf32> to vector<8x8xf32>
    %17 = arith.truncf %16 : vector<8x8xf32> to vector<8x8xbf16>
    %c1 = arith.constant 1 : index
    %c0_10 = arith.constant 0 : index
    %c0_11 = arith.constant 0 : index
    %18 = vector.load %arg16[%c1, %c0_10, %c0_11] : memref<4x8x8xbf16, #tpu.memory_space<vmem>>, vector<1x8x8xbf16>
    %19 = vector.shape_cast %18 : vector<1x8x8xbf16> to vector<8x8xbf16>
    %20 = vector.shape_cast %17 : vector<8x8xbf16> to vector<1x8x8xbf16>
    tpu.vector_store %arg16[%c1, %c0_10, %c0_11], %20 {strides = array<i32>} : memref<4x8x8xbf16, #tpu.memory_space<vmem>>, vector<1x8x8xbf16>,
    %21 = vector.extract_strided_slice %10 {offsets = [0, 16], sizes = [8, 8], strides = [1, 1]} : vector<8x32xf32> to vector<8x8xf32>
    %22 = arith.truncf %21 : vector<8x8xf32> to vector<8x8xbf16>
    %c2 = arith.constant 2 : index
    %c0_12 = arith.constant 0 : index
    %c0_13 = arith.constant 0 : index
    %23 = vector.load %arg16[%c2, %c0_12, %c0_13] : memref<4x8x8xbf16, #tpu.memory_space<vmem>>, vector<1x8x8xbf16>
    %24 = vector.shape_cast %23 : vector<1x8x8xbf16> to vector<8x8xbf16>
    %25 = vector.shape_cast %22 : vector<8x8xbf16> to vector<1x8x8xbf16>
    tpu.vector_store %arg16[%c2, %c0_12, %c0_13], %25 {strides = array<i32>} : memref<4x8x8xbf16, #tpu.memory_space<vmem>>, vector<1x8x8xbf16>,
    %26 = vector.extract_strided_slice %10 {offsets = [0, 24], sizes = [8, 8], strides = [1, 1]} : vector<8x32xf32> to vector<8x8xf32>
    %27 = arith.truncf %26 : vector<8x8xf32> to vector<8x8xbf16>
    %c3 = arith.constant 3 : index
    %c0_14 = arith.constant 0 : index
    %c0_15 = arith.constant 0 : index
    %28 = vector.load %arg16[%c3, %c0_14, %c0_15] : memref<4x8x8xbf16, #tpu.memory_space<vmem>>, vector<1x8x8xbf16>
    %29 = vector.shape_cast %28 : vector<1x8x8xbf16> to vector<8x8xbf16>
    %30 = vector.shape_cast %27 : vector<8x8xbf16> to vector<1x8x8xbf16>
    tpu.vector_store %arg16[%c3, %c0_14, %c0_15], %30 {strides = array<i32>} : memref<4x8x8xbf16, #tpu.memory_space<vmem>>, vector<1x8x8xbf16>,
    %c0_16 = arith.constant 0 : index
    %c0_17 = arith.constant 0 : index
    %c0_18 = arith.constant 0 : index
    %31 = vector.load %arg16[%c0_16, %c0_17, %c0_18] : memref<4x8x8xbf16, #tpu.memory_space<vmem>>, vector<4x8x8xbf16>
    %c0_19 = arith.constant 0 : index
    %c0_20 = arith.constant 0 : index
    %c0_21 = arith.constant 0 : index
    %32 = vector.load %arg14[%c0_19, %c0_20, %c0_21] : memref<4x8x8xbf16, #tpu.memory_space<vmem>>, vector<4x8x8xbf16>
    "tpu.trace_start"() <{level = 10 : i32, message = "hqe,hke->hqk"}> : () -> ()
    %cst_22 = arith.constant dense<0.000000e+00> : vector<4x8x8xf32>
    %33 = tpu.matmul %31, %32, %cst_22 {dimension_numbers = #tpu.dot_dimension_numbers<[2], [2], [1], [1], [0, 0, 0, 1, 1, 1], [0], [0]>} : vector<4x8x8xbf16>, vector<4x8x8xbf16>, vector<4x8x8xf32> -> vector<4x8x8xf32>
    "tpu.trace_stop"() : () -> ()
    %cst_23 = arith.constant dense<0xFF800000> : vector<4x8xf32>
    %34 = vector.multi_reduction <maximumf>, %33, %cst_23 [2] : vector<4x8x8xf32> to vector<4x8xf32>
    %35 = vector.shape_cast %34 : vector<4x8xf32> to vector<4x8x1xf32>
    %36 = vector.broadcast %35 : vector<4x8x1xf32> to vector<4x8x8xf32>
    %37 = arith.subf %33, %36 : vector<4x8x8xf32>
    %cst_24 = arith.constant -1.000000e+00 : f32
    %38 = vector.broadcast %cst_24 : f32 to vector<4x8x1xf32>
    %cst_25 = arith.constant 0.000000e+00 : f32
    %39 = vector.broadcast %cst_25 : f32 to vector<4x8x1xf32>
    %c0_i32_26 = arith.constant 0 : i32
    %40 = arith.addf %38, %39 : vector<4x8x1xf32>
    %cst_27 = arith.constant 5.000000e-01 : f32
    %41 = vector.broadcast %cst_27 : f32 to vector<4x8x1xf32>
    %42 = arith.mulf %41, %40 : vector<4x8x1xf32>
    %43 = vector.broadcast %42 : vector<4x8x1xf32> to vector<4x8x8xf32>
    %44 = arith.subf %37, %43 : vector<4x8x8xf32>
    %cst_28 = arith.constant 0.000000e+00 : f32
    %45 = vector.broadcast %cst_28 : f32 to vector<4x8x8xf32>
    %46 = arith.maximumf %44, %45 : vector<4x8x8xf32>
    %47 = arith.mulf %46, %46 : vector<4x8x8xf32>
    %cst_29 = arith.constant dense<0.000000e+00> : vector<4x8xf32>
    %48 = vector.multi_reduction <add>, %47, %cst_29 [2] : vector<4x8x8xf32> to vector<4x8xf32>
    %49 = vector.shape_cast %48 : vector<4x8xf32> to vector<4x8x1xf32>
    %cst_30 = arith.constant 1.000000e+00 : f32
    %50 = vector.broadcast %cst_30 : f32 to vector<4x8x1xf32>
    %51 = arith.subf %49, %50 : vector<4x8x1xf32>
    %cst_31 = arith.constant 0.000000e+00 : f32
    %52 = vector.broadcast %cst_31 : f32 to vector<4x8x1xf32>
    %53 = arith.cmpf oge, %51, %52 : vector<4x8x1xf32>
    %54 = arith.select %53, %42, %38 : vector<4x8x1xi1>, vector<4x8x1xf32>
    %55 = arith.select %53, %39, %42 : vector<4x8x1xi1>, vector<4x8x1xf32>
    %c1_i32 = arith.constant 1 : i32
    %56 = arith.addf %54, %55 : vector<4x8x1xf32>
    %cst_32 = arith.constant 5.000000e-01 : f32
    %57 = vector.broadcast %cst_32 : f32 to vector<4x8x1xf32>
    %58 = arith.mulf %57, %56 : vector<4x8x1xf32>
    %59 = vector.broadcast %58 : vector<4x8x1xf32> to vector<4x8x8xf32>
    %60 = arith.subf %37, %59 : vector<4x8x8xf32>
    %cst_33 = arith.constant 0.000000e+00 : f32
    %61 = vector.broadcast %cst_33 : f32 to vector<4x8x8xf32>
    %62 = arith.maximumf %60, %61 : vector<4x8x8xf32>
    %63 = arith.mulf %62, %62 : vector<4x8x8xf32>
    %cst_34 = arith.constant dense<0.000000e+00> : vector<4x8xf32>
    %64 = vector.multi_reduction <add>, %63, %cst_34 [2] : vector<4x8x8xf32> to vector<4x8xf32>
    %65 = vector.shape_cast %64 : vector<4x8xf32> to vector<4x8x1xf32>
    %cst_35 = arith.constant 1.000000e+00 : f32
    %66 = vector.broadcast %cst_35 : f32 to vector<4x8x1xf32>
    %67 = arith.subf %65, %66 : vector<4x8x1xf32>
    %cst_36 = arith.constant 0.000000e+00 : f32
    %68 = vector.broadcast %cst_36 : f32 to vector<4x8x1xf32>
    %69 = arith.cmpf oge, %67, %68 : vector<4x8x1xf32>
    %70 = arith.select %69, %58, %54 : vector<4x8x1xi1>, vector<4x8x1xf32>
    %71 = arith.select %69, %55, %58 : vector<4x8x1xi1>, vector<4x8x1xf32>
    %c2_i32 = arith.constant 2 : i32
    %72 = arith.addf %70, %71 : vector<4x8x1xf32>
    %cst_37 = arith.constant 5.000000e-01 : f32
    %73 = vector.broadcast %cst_37 : f32 to vector<4x8x1xf32>
    %74 = arith.mulf %73, %72 : vector<4x8x1xf32>
    %75 = vector.broadcast %74 : vector<4x8x1xf32> to vector<4x8x8xf32>
    %76 = arith.subf %37, %75 : vector<4x8x8xf32>
    %cst_38 = arith.constant 0.000000e+00 : f32
    %77 = vector.broadcast %cst_38 : f32 to vector<4x8x8xf32>
    %78 = arith.maximumf %76, %77 : vector<4x8x8xf32>
    %79 = arith.mulf %78, %78 : vector<4x8x8xf32>
    %cst_39 = arith.constant dense<0.000000e+00> : vector<4x8xf32>
    %80 = vector.multi_reduction <add>, %79, %cst_39 [2] : vector<4x8x8xf32> to vector<4x8xf32>
    %81 = vector.shape_cast %80 : vector<4x8xf32> to vector<4x8x1xf32>
    %cst_40 = arith.constant 1.000000e+00 : f32
    %82 = vector.broadcast %cst_40 : f32 to vector<4x8x1xf32>
    %83 = arith.subf %81, %82 : vector<4x8x1xf32>
    %cst_41 = arith.constant 0.000000e+00 : f32
    %84 = vector.broadcast %cst_41 : f32 to vector<4x8x1xf32>
    %85 = arith.cmpf oge, %83, %84 : vector<4x8x1xf32>
    %86 = arith.select %85, %74, %70 : vector<4x8x1xi1>, vector<4x8x1xf32>
    %87 = arith.select %85, %71, %74 : vector<4x8x1xi1>, vector<4x8x1xf32>
    %c3_i32 = arith.constant 3 : i32
    %88 = arith.addf %86, %87 : vector<4x8x1xf32>
    %cst_42 = arith.constant 5.000000e-01 : f32
    %89 = vector.broadcast %cst_42 : f32 to vector<4x8x1xf32>
    %90 = arith.mulf %89, %88 : vector<4x8x1xf32>
    %91 = vector.broadcast %90 : vector<4x8x1xf32> to vector<4x8x8xf32>
    %92 = arith.subf %37, %91 : vector<4x8x8xf32>
    %cst_43 = arith.constant 0.000000e+00 : f32
    %93 = vector.broadcast %cst_43 : f32 to vector<4x8x8xf32>
    %94 = arith.maximumf %92, %93 : vector<4x8x8xf32>
    %95 = arith.mulf %94, %94 : vector<4x8x8xf32>
    %cst_44 = arith.constant dense<0.000000e+00> : vector<4x8xf32>
    %96 = vector.multi_reduction <add>, %95, %cst_44 [2] : vector<4x8x8xf32> to vector<4x8xf32>
    %97 = vector.shape_cast %96 : vector<4x8xf32> to vector<4x8x1xf32>
    %cst_45 = arith.constant 1.000000e+00 : f32
    %98 = vector.broadcast %cst_45 : f32 to vector<4x8x1xf32>
    %99 = arith.subf %97, %98 : vector<4x8x1xf32>
    %cst_46 = arith.constant 0.000000e+00 : f32
    %100 = vector.broadcast %cst_46 : f32 to vector<4x8x1xf32>
    %101 = arith.cmpf oge, %99, %100 : vector<4x8x1xf32>
    %102 = arith.select %101, %90, %86 : vector<4x8x1xi1>, vector<4x8x1xf32>
    %103 = arith.select %101, %87, %90 : vector<4x8x1xi1>, vector<4x8x1xf32>
    %c4_i32 = arith.constant 4 : i32
    %104 = arith.addf %102, %103 : vector<4x8x1xf32>
    %cst_47 = arith.constant 5.000000e-01 : f32
    %105 = vector.broadcast %cst_47 : f32 to vector<4x8x1xf32>
    %106 = arith.mulf %105, %104 : vector<4x8x1xf32>
    %107 = vector.broadcast %106 : vector<4x8x1xf32> to vector<4x8x8xf32>
    %108 = arith.subf %37, %107 : vector<4x8x8xf32>
    %cst_48 = arith.constant 0.000000e+00 : f32
    %109 = vector.broadcast %cst_48 : f32 to vector<4x8x8xf32>
    %110 = arith.maximumf %108, %109 : vector<4x8x8xf32>
    %111 = arith.mulf %110, %110 : vector<4x8x8xf32>
    %cst_49 = arith.constant dense<0.000000e+00> : vector<4x8xf32>
    %112 = vector.multi_reduction <add>, %111, %cst_49 [2] : vector<4x8x8xf32> to vector<4x8xf32>
    %113 = vector.shape_cast %112 : vector<4x8xf32> to vector<4x8x1xf32>
    %cst_50 = arith.constant 1.000000e+00 : f32
    %114 = vector.broadcast %cst_50 : f32 to vector<4x8x1xf32>
    %115 = arith.subf %113, %114 : vector<4x8x1xf32>
    %cst_51 = arith.constant 0.000000e+00 : f32
    %116 = vector.broadcast %cst_51 : f32 to vector<4x8x1xf32>
    %117 = arith.cmpf oge, %115, %116 : vector<4x8x1xf32>
    %118 = arith.select %117, %106, %102 : vector<4x8x1xi1>, vector<4x8x1xf32>
    %119 = arith.select %117, %103, %106 : vector<4x8x1xi1>, vector<4x8x1xf32>
    %c5_i32 = arith.constant 5 : i32
    %120 = arith.addf %118, %119 : vector<4x8x1xf32>
    %cst_52 = arith.constant 5.000000e-01 : f32
    %121 = vector.broadcast %cst_52 : f32 to vector<4x8x1xf32>
    %122 = arith.mulf %121, %120 : vector<4x8x1xf32>
    %123 = vector.broadcast %122 : vector<4x8x1xf32> to vector<4x8x8xf32>
    %124 = arith.subf %37, %123 : vector<4x8x8xf32>
    %cst_53 = arith.constant 0.000000e+00 : f32
    %125 = vector.broadcast %cst_53 : f32 to vector<4x8x8xf32>
    %126 = arith.maximumf %124, %125 : vector<4x8x8xf32>
    %127 = arith.mulf %126, %126 : vector<4x8x8xf32>
    %cst_54 = arith.constant dense<0.000000e+00> : vector<4x8xf32>
    %128 = vector.multi_reduction <add>, %127, %cst_54 [2] : vector<4x8x8xf32> to vector<4x8xf32>
    %129 = vector.shape_cast %128 : vector<4x8xf32> to vector<4x8x1xf32>
    %cst_55 = arith.constant 1.000000e+00 : f32
    %130 = vector.broadcast %cst_55 : f32 to vector<4x8x1xf32>
    %131 = arith.subf %129, %130 : vector<4x8x1xf32>
    %cst_56 = arith.constant 0.000000e+00 : f32
    %132 = vector.broadcast %cst_56 : f32 to vector<4x8x1xf32>
    %133 = arith.cmpf oge, %131, %132 : vector<4x8x1xf32>
    %134 = arith.select %133, %122, %118 : vector<4x8x1xi1>, vector<4x8x1xf32>
    %135 = arith.select %133, %119, %122 : vector<4x8x1xi1>, vector<4x8x1xf32>
    %c6_i32 = arith.constant 6 : i32
    %136 = arith.addf %134, %135 : vector<4x8x1xf32>
    %cst_57 = arith.constant 5.000000e-01 : f32
    %137 = vector.broadcast %cst_57 : f32 to vector<4x8x1xf32>
    %138 = arith.mulf %137, %136 : vector<4x8x1xf32>
    %139 = vector.broadcast %138 : vector<4x8x1xf32> to vector<4x8x8xf32>
    %140 = arith.subf %37, %139 : vector<4x8x8xf32>
    %cst_58 = arith.constant 0.000000e+00 : f32
    %141 = vector.broadcast %cst_58 : f32 to vector<4x8x8xf32>
    %142 = arith.maximumf %140, %141 : vector<4x8x8xf32>
    %143 = arith.mulf %142, %142 : vector<4x8x8xf32>
    %cst_59 = arith.constant dense<0.000000e+00> : vector<4x8xf32>
    %144 = vector.multi_reduction <add>, %143, %cst_59 [2] : vector<4x8x8xf32> to vector<4x8xf32>
    %145 = vector.shape_cast %144 : vector<4x8xf32> to vector<4x8x1xf32>
    %cst_60 = arith.constant 1.000000e+00 : f32
    %146 = vector.broadcast %cst_60 : f32 to vector<4x8x1xf32>
    %147 = arith.subf %145, %146 : vector<4x8x1xf32>
    %cst_61 = arith.constant 0.000000e+00 : f32
    %148 = vector.broadcast %cst_61 : f32 to vector<4x8x1xf32>
    %149 = arith.cmpf oge, %147, %148 : vector<4x8x1xf32>
    %150 = arith.select %149, %138, %134 : vector<4x8x1xi1>, vector<4x8x1xf32>
    %151 = arith.select %149, %135, %138 : vector<4x8x1xi1>, vector<4x8x1xf32>
    %c7_i32 = arith.constant 7 : i32
    %152 = arith.addf %150, %151 : vector<4x8x1xf32>
    %cst_62 = arith.constant 5.000000e-01 : f32
    %153 = vector.broadcast %cst_62 : f32 to vector<4x8x1xf32>
    %154 = arith.mulf %153, %152 : vector<4x8x1xf32>
    %155 = vector.broadcast %154 : vector<4x8x1xf32> to vector<4x8x8xf32>
    %156 = arith.subf %37, %155 : vector<4x8x8xf32>
    %cst_63 = arith.constant 0.000000e+00 : f32
    %157 = vector.broadcast %cst_63 : f32 to vector<4x8x8xf32>
    %158 = arith.maximumf %156, %157 : vector<4x8x8xf32>
    %159 = arith.mulf %158, %158 : vector<4x8x8xf32>
    %cst_64 = arith.constant dense<0.000000e+00> : vector<4x8xf32>
    %160 = vector.multi_reduction <add>, %159, %cst_64 [2] : vector<4x8x8xf32> to vector<4x8xf32>
    %161 = vector.shape_cast %160 : vector<4x8xf32> to vector<4x8x1xf32>
    %cst_65 = arith.constant 1.000000e+00 : f32
    %162 = vector.broadcast %cst_65 : f32 to vector<4x8x1xf32>
    %163 = arith.subf %161, %162 : vector<4x8x1xf32>
    %cst_66 = arith.constant 0.000000e+00 : f32
    %164 = vector.broadcast %cst_66 : f32 to vector<4x8x1xf32>
    %165 = arith.cmpf oge, %163, %164 : vector<4x8x1xf32>
    %166 = arith.select %165, %154, %150 : vector<4x8x1xi1>, vector<4x8x1xf32>
    %167 = arith.select %165, %151, %154 : vector<4x8x1xi1>, vector<4x8x1xf32>
    %c8_i32 = arith.constant 8 : i32
    %168 = arith.addf %166, %167 : vector<4x8x1xf32>
    %cst_67 = arith.constant 5.000000e-01 : f32
    %169 = vector.broadcast %cst_67 : f32 to vector<4x8x1xf32>
    %170 = arith.mulf %169, %168 : vector<4x8x1xf32>
    %171 = vector.broadcast %170 : vector<4x8x1xf32> to vector<4x8x8xf32>
    %172 = arith.subf %37, %171 : vector<4x8x8xf32>
    %cst_68 = arith.constant 0.000000e+00 : f32
    %173 = vector.broadcast %cst_68 : f32 to vector<4x8x8xf32>
    %174 = arith.maximumf %172, %173 : vector<4x8x8xf32>
    %175 = arith.mulf %174, %174 : vector<4x8x8xf32>
    %cst_69 = arith.constant dense<0.000000e+00> : vector<4x8xf32>
    %176 = vector.multi_reduction <add>, %175, %cst_69 [2] : vector<4x8x8xf32> to vector<4x8xf32>
    %177 = vector.shape_cast %176 : vector<4x8xf32> to vector<4x8x1xf32>
    %cst_70 = arith.constant 1.000000e+00 : f32
    %178 = vector.broadcast %cst_70 : f32 to vector<4x8x1xf32>
    %179 = arith.subf %177, %178 : vector<4x8x1xf32>
    %cst_71 = arith.constant 0.000000e+00 : f32
    %180 = vector.broadcast %cst_71 : f32 to vector<4x8x1xf32>
    %181 = arith.cmpf oge, %179, %180 : vector<4x8x1xf32>
    %182 = arith.select %181, %170, %166 : vector<4x8x1xi1>, vector<4x8x1xf32>
    %183 = arith.select %181, %167, %170 : vector<4x8x1xi1>, vector<4x8x1xf32>
    %c9_i32 = arith.constant 9 : i32
    %184 = arith.addf %182, %183 : vector<4x8x1xf32>
    %cst_72 = arith.constant 5.000000e-01 : f32
    %185 = vector.broadcast %cst_72 : f32 to vector<4x8x1xf32>
    %186 = arith.mulf %185, %184 : vector<4x8x1xf32>
    %187 = vector.broadcast %186 : vector<4x8x1xf32> to vector<4x8x8xf32>
    %188 = arith.subf %37, %187 : vector<4x8x8xf32>
    %cst_73 = arith.constant 0.000000e+00 : f32
    %189 = vector.broadcast %cst_73 : f32 to vector<4x8x8xf32>
    %190 = arith.maximumf %188, %189 : vector<4x8x8xf32>
    %191 = arith.mulf %190, %190 : vector<4x8x8xf32>
    %cst_74 = arith.constant dense<0.000000e+00> : vector<4x8xf32>
    %192 = vector.multi_reduction <add>, %191, %cst_74 [2] : vector<4x8x8xf32> to vector<4x8xf32>
    %193 = vector.shape_cast %192 : vector<4x8xf32> to vector<4x8x1xf32>
    %cst_75 = arith.constant 1.000000e+00 : f32
    %194 = vector.broadcast %cst_75 : f32 to vector<4x8x1xf32>
    %195 = arith.subf %193, %194 : vector<4x8x1xf32>
    %cst_76 = arith.constant 0.000000e+00 : f32
    %196 = vector.broadcast %cst_76 : f32 to vector<4x8x1xf32>
    %197 = arith.cmpf oge, %195, %196 : vector<4x8x1xf32>
    %198 = arith.select %197, %186, %182 : vector<4x8x1xi1>, vector<4x8x1xf32>
    %199 = arith.select %197, %183, %186 : vector<4x8x1xi1>, vector<4x8x1xf32>
    %c10_i32 = arith.constant 10 : i32
    %200 = arith.addf %198, %199 : vector<4x8x1xf32>
    %cst_77 = arith.constant 5.000000e-01 : f32
    %201 = vector.broadcast %cst_77 : f32 to vector<4x8x1xf32>
    %202 = arith.mulf %201, %200 : vector<4x8x1xf32>
    %203 = vector.broadcast %202 : vector<4x8x1xf32> to vector<4x8x8xf32>
    %204 = arith.subf %37, %203 : vector<4x8x8xf32>
    %cst_78 = arith.constant 0.000000e+00 : f32
    %205 = vector.broadcast %cst_78 : f32 to vector<4x8x8xf32>
    %206 = arith.maximumf %204, %205 : vector<4x8x8xf32>
    %207 = arith.mulf %206, %206 : vector<4x8x8xf32>
    %cst_79 = arith.constant dense<0.000000e+00> : vector<4x8xf32>
    %208 = vector.multi_reduction <add>, %207, %cst_79 [2] : vector<4x8x8xf32> to vector<4x8xf32>
    %209 = vector.shape_cast %208 : vector<4x8xf32> to vector<4x8x1xf32>
    %cst_80 = arith.constant 1.000000e+00 : f32
    %210 = vector.broadcast %cst_80 : f32 to vector<4x8x1xf32>
    %211 = arith.subf %209, %210 : vector<4x8x1xf32>
    %cst_81 = arith.constant 0.000000e+00 : f32
    %212 = vector.broadcast %cst_81 : f32 to vector<4x8x1xf32>
    %213 = arith.cmpf oge, %211, %212 : vector<4x8x1xf32>
    %214 = arith.select %213, %202, %198 : vector<4x8x1xi1>, vector<4x8x1xf32>
    %215 = arith.select %213, %199, %202 : vector<4x8x1xi1>, vector<4x8x1xf32>
    %c11_i32 = arith.constant 11 : i32
    %216 = arith.addf %214, %215 : vector<4x8x1xf32>
    %cst_82 = arith.constant 5.000000e-01 : f32
    %217 = vector.broadcast %cst_82 : f32 to vector<4x8x1xf32>
    %218 = arith.mulf %217, %216 : vector<4x8x1xf32>
    %219 = vector.broadcast %218 : vector<4x8x1xf32> to vector<4x8x8xf32>
    %220 = arith.subf %37, %219 : vector<4x8x8xf32>
    %cst_83 = arith.constant 0.000000e+00 : f32
    %221 = vector.broadcast %cst_83 : f32 to vector<4x8x8xf32>
    %222 = arith.maximumf %220, %221 : vector<4x8x8xf32>
    %223 = arith.mulf %222, %222 : vector<4x8x8xf32>
    %cst_84 = arith.constant dense<0.000000e+00> : vector<4x8xf32>
    %224 = vector.multi_reduction <add>, %223, %cst_84 [2] : vector<4x8x8xf32> to vector<4x8xf32>
    %225 = vector.shape_cast %224 : vector<4x8xf32> to vector<4x8x1xf32>
    %cst_85 = arith.constant 1.000000e+00 : f32
    %226 = vector.broadcast %cst_85 : f32 to vector<4x8x1xf32>
    %227 = arith.subf %225, %226 : vector<4x8x1xf32>
    %cst_86 = arith.constant 0.000000e+00 : f32
    %228 = vector.broadcast %cst_86 : f32 to vector<4x8x1xf32>
    %229 = arith.cmpf oge, %227, %228 : vector<4x8x1xf32>
    %230 = arith.select %229, %218, %214 : vector<4x8x1xi1>, vector<4x8x1xf32>
    %231 = arith.select %229, %215, %218 : vector<4x8x1xi1>, vector<4x8x1xf32>
    %c12_i32 = arith.constant 12 : i32
    %232 = arith.addf %230, %231 : vector<4x8x1xf32>
    %cst_87 = arith.constant 5.000000e-01 : f32
    %233 = vector.broadcast %cst_87 : f32 to vector<4x8x1xf32>
    %234 = arith.mulf %233, %232 : vector<4x8x1xf32>
    %235 = vector.broadcast %234 : vector<4x8x1xf32> to vector<4x8x8xf32>
    %236 = arith.subf %37, %235 : vector<4x8x8xf32>
    %cst_88 = arith.constant 0.000000e+00 : f32
    %237 = vector.broadcast %cst_88 : f32 to vector<4x8x8xf32>
    %238 = arith.maximumf %236, %237 : vector<4x8x8xf32>
    %239 = arith.mulf %238, %238 : vector<4x8x8xf32>
    %cst_89 = arith.constant dense<0.000000e+00> : vector<4x8xf32>
    %240 = vector.multi_reduction <add>, %239, %cst_89 [2] : vector<4x8x8xf32> to vector<4x8xf32>
    %241 = vector.shape_cast %240 : vector<4x8xf32> to vector<4x8x1xf32>
    %cst_90 = arith.constant 1.000000e+00 : f32
    %242 = vector.broadcast %cst_90 : f32 to vector<4x8x1xf32>
    %243 = arith.subf %241, %242 : vector<4x8x1xf32>
    %cst_91 = arith.constant 0.000000e+00 : f32
    %244 = vector.broadcast %cst_91 : f32 to vector<4x8x1xf32>
    %245 = arith.cmpf oge, %243, %244 : vector<4x8x1xf32>
    %246 = arith.select %245, %234, %230 : vector<4x8x1xi1>, vector<4x8x1xf32>
    %247 = arith.select %245, %231, %234 : vector<4x8x1xi1>, vector<4x8x1xf32>
    %c13_i32 = arith.constant 13 : i32
    %248 = arith.addf %246, %247 : vector<4x8x1xf32>
    %cst_92 = arith.constant 5.000000e-01 : f32
    %249 = vector.broadcast %cst_92 : f32 to vector<4x8x1xf32>
    %250 = arith.mulf %249, %248 : vector<4x8x1xf32>
    %251 = vector.broadcast %250 : vector<4x8x1xf32> to vector<4x8x8xf32>
    %252 = arith.subf %37, %251 : vector<4x8x8xf32>
    %cst_93 = arith.constant 0.000000e+00 : f32
    %253 = vector.broadcast %cst_93 : f32 to vector<4x8x8xf32>
    %254 = arith.maximumf %252, %253 : vector<4x8x8xf32>
    %255 = arith.mulf %254, %254 : vector<4x8x8xf32>
    %cst_94 = arith.constant dense<0.000000e+00> : vector<4x8xf32>
    %256 = vector.multi_reduction <add>, %255, %cst_94 [2] : vector<4x8x8xf32> to vector<4x8xf32>
    %257 = vector.shape_cast %256 : vector<4x8xf32> to vector<4x8x1xf32>
    %cst_95 = arith.constant 1.000000e+00 : f32
    %258 = vector.broadcast %cst_95 : f32 to vector<4x8x1xf32>
    %259 = arith.subf %257, %258 : vector<4x8x1xf32>
    %cst_96 = arith.constant 0.000000e+00 : f32
    %260 = vector.broadcast %cst_96 : f32 to vector<4x8x1xf32>
    %261 = arith.cmpf oge, %259, %260 : vector<4x8x1xf32>
    %262 = arith.select %261, %250, %246 : vector<4x8x1xi1>, vector<4x8x1xf32>
    %263 = arith.select %261, %247, %250 : vector<4x8x1xi1>, vector<4x8x1xf32>
    %264 = arith.addf %262, %263 : vector<4x8x1xf32>
    %cst_97 = arith.constant 5.000000e-01 : f32
    %265 = vector.broadcast %cst_97 : f32 to vector<4x8x1xf32>
    %266 = arith.mulf %265, %264 : vector<4x8x1xf32>
    %267 = vector.broadcast %266 : vector<4x8x1xf32> to vector<4x8x8xf32>
    %268 = arith.cmpf ogt, %37, %267 : vector<4x8x8xf32>
    %269 = arith.extui %268 : vector<4x8x8xi1> to vector<4x8x8xi32>
    %270 = arith.sitofp %269 : vector<4x8x8xi32> to vector<4x8x8xf32>
    %cst_98 = arith.constant dense<0.000000e+00> : vector<4x8xf32>
    %271 = vector.multi_reduction <add>, %270, %cst_98 [2] : vector<4x8x8xf32> to vector<4x8xf32>
    %272 = vector.shape_cast %271 : vector<4x8xf32> to vector<4x8x1xf32>
    %273 = arith.mulf %37, %270 : vector<4x8x8xf32>
    %cst_99 = arith.constant dense<0.000000e+00> : vector<4x8xf32>
    %274 = vector.multi_reduction <add>, %273, %cst_99 [2] : vector<4x8x8xf32> to vector<4x8xf32>
    %275 = vector.shape_cast %274 : vector<4x8xf32> to vector<4x8x1xf32>
    %276 = arith.divf %275, %272 : vector<4x8x1xf32>
    %277 = arith.mulf %37, %37 : vector<4x8x8xf32>
    %278 = arith.mulf %277, %270 : vector<4x8x8xf32>
    %cst_100 = arith.constant dense<0.000000e+00> : vector<4x8xf32>
    %279 = vector.multi_reduction <add>, %278, %cst_100 [2] : vector<4x8x8xf32> to vector<4x8xf32>
    %280 = vector.shape_cast %279 : vector<4x8xf32> to vector<4x8x1xf32>
    %281 = arith.divf %280, %272 : vector<4x8x1xf32>
    %282 = arith.mulf %276, %276 : vector<4x8x1xf32>
    %283 = arith.subf %281, %282 : vector<4x8x1xf32>
    %284 = arith.mulf %272, %283 : vector<4x8x1xf32>
    %cst_101 = arith.constant 1.000000e+00 : f32
    %285 = vector.broadcast %cst_101 : f32 to vector<4x8x1xf32>
    %286 = arith.subf %285, %284 : vector<4x8x1xf32>
    %287 = arith.divf %286, %272 : vector<4x8x1xf32>
    %cst_102 = arith.constant 0.000000e+00 : f32
    %288 = vector.broadcast %cst_102 : f32 to vector<4x8x1xf32>
    %289 = arith.maximumf %287, %288 : vector<4x8x1xf32>
    %290 = math.sqrt %289 : vector<4x8x1xf32>
    %291 = arith.subf %276, %290 : vector<4x8x1xf32>
    %292 = vector.broadcast %291 : vector<4x8x1xf32> to vector<4x8x8xf32>
    %293 = arith.subf %37, %292 : vector<4x8x8xf32>
    %cst_103 = arith.constant 0.000000e+00 : f32
    %294 = vector.broadcast %cst_103 : f32 to vector<4x8x8xf32>
    %295 = arith.maximumf %293, %294 : vector<4x8x8xf32>
    %296 = arith.mulf %295, %295 : vector<4x8x8xf32>
    %297 = arith.truncf %296 : vector<4x8x8xf32> to vector<4x8x8xbf16>
    %c0_104 = arith.constant 0 : index
    %c0_105 = arith.constant 0 : index
    %c0_106 = arith.constant 0 : index
    %298 = vector.load %arg15[%c0_104, %c0_105, %c0_106] : memref<4x8x8xbf16, #tpu.memory_space<vmem>>, vector<4x8x8xbf16>
    "tpu.trace_start"() <{level = 10 : i32, message = "hqk,hke->hqe"}> : () -> ()
    %cst_107 = arith.constant dense<0.000000e+00> : vector<4x8x8xf32>
    %299 = tpu.matmul %297, %298, %cst_107 {dimension_numbers = #tpu.dot_dimension_numbers<[2], [1], [1], [2], [0, 0, 0, 1, 1, 2], [0], [0]>} : vector<4x8x8xbf16>, vector<4x8x8xbf16>, vector<4x8x8xf32> -> vector<4x8x8xf32>
    "tpu.trace_stop"() : () -> ()
    %300 = vector.extract_strided_slice %299 {offsets = [0, 0, 0], sizes = [1, 8, 8], strides = [1, 1, 1]} : vector<4x8x8xf32> to vector<1x8x8xf32>
    %301 = vector.shape_cast %300 : vector<1x8x8xf32> to vector<8x8xf32>
    %302 = arith.truncf %301 : vector<8x8xf32> to vector<8x8xbf16>
    %c0_108 = arith.constant 0 : index
    %c0_109 = arith.constant 0 : index
    %303 = vector.load %arg17[%c0_108, %c0_109] : memref<8x32xbf16, #tpu.memory_space<vmem>>, vector<8x8xbf16>
    tpu.vector_store %arg17[%c0_108, %c0_109], %302 {strides = array<i32>} : memref<8x32xbf16, #tpu.memory_space<vmem>>, vector<8x8xbf16>,
    %304 = vector.extract_strided_slice %299 {offsets = [1, 0, 0], sizes = [1, 8, 8], strides = [1, 1, 1]} : vector<4x8x8xf32> to vector<1x8x8xf32>
    %305 = vector.shape_cast %304 : vector<1x8x8xf32> to vector<8x8xf32>
    %306 = arith.truncf %305 : vector<8x8xf32> to vector<8x8xbf16>
    %c0_110 = arith.constant 0 : index
    %c8 = arith.constant 8 : index
    %307 = vector.load %arg17[%c0_110, %c8] : memref<8x32xbf16, #tpu.memory_space<vmem>>, vector<8x8xbf16>
    tpu.vector_store %arg17[%c0_110, %c8], %306 {strides = array<i32>} : memref<8x32xbf16, #tpu.memory_space<vmem>>, vector<8x8xbf16>,
    %308 = vector.extract_strided_slice %299 {offsets = [2, 0, 0], sizes = [1, 8, 8], strides = [1, 1, 1]} : vector<4x8x8xf32> to vector<1x8x8xf32>
    %309 = vector.shape_cast %308 : vector<1x8x8xf32> to vector<8x8xf32>
    %310 = arith.truncf %309 : vector<8x8xf32> to vector<8x8xbf16>
    %c0_111 = arith.constant 0 : index
    %c16 = arith.constant 16 : index
    %311 = vector.load %arg17[%c0_111, %c16] : memref<8x32xbf16, #tpu.memory_space<vmem>>, vector<8x8xbf16>
    tpu.vector_store %arg17[%c0_111, %c16], %310 {strides = array<i32>} : memref<8x32xbf16, #tpu.memory_space<vmem>>, vector<8x8xbf16>,
    %312 = vector.extract_strided_slice %299 {offsets = [3, 0, 0], sizes = [1, 8, 8], strides = [1, 1, 1]} : vector<4x8x8xf32> to vector<1x8x8xf32>
    %313 = vector.shape_cast %312 : vector<1x8x8xf32> to vector<8x8xf32>
    %314 = arith.truncf %313 : vector<8x8xf32> to vector<8x8xbf16>
    %c0_112 = arith.constant 0 : index
    %c24 = arith.constant 24 : index
    %315 = vector.load %arg17[%c0_112, %c24] : memref<8x32xbf16, #tpu.memory_space<vmem>>, vector<8x8xbf16>
    tpu.vector_store %arg17[%c0_112, %c24], %314 {strides = array<i32>} : memref<8x32xbf16, #tpu.memory_space<vmem>>, vector<8x8xbf16>,
    %c0_113 = arith.constant 0 : index
    %c0_114 = arith.constant 0 : index
    %316 = vector.load %arg17[%c0_113, %c0_114] : memref<8x32xbf16, #tpu.memory_space<vmem>>, vector<8x32xbf16>
    %c0_115 = arith.constant 0 : index
    %c0_116 = arith.constant 0 : index
    %317 = vector.load %arg11[%c0_115, %c0_116] : memref<32x32xbf16, #tpu.memory_space<vmem>>, vector<32x32xbf16>
    %cst_117 = arith.constant dense<0.000000e+00> : vector<8x32xf32>
    %318 = tpu.matmul %316, %317, %cst_117 {dimension_numbers = #tpu.dot_dimension_numbers<[1], [0], [0], [1], [0, 0, 1, 1], [], []>} : vector<8x32xbf16>, vector<32x32xbf16>, vector<8x32xf32> -> vector<8x32xf32>
    %c0_118 = arith.constant 0 : index
    %c0_119 = arith.constant 0 : index
    %319 = vector.load %arg12[%c0_118, %c0_119] : memref<1x32xf32, #tpu.memory_space<vmem>>, vector<1x32xf32>
    %320 = vector.broadcast %319 : vector<1x32xf32> to vector<8x32xf32>
    %321 = arith.addf %318, %320 : vector<8x32xf32>
    %c0_120 = arith.constant 0 : index
    %c0_121 = arith.constant 0 : index
    %c0_122 = arith.constant 0 : index
    %322 = vector.load %arg13[%c0_120, %c0_121, %c0_122] : memref<1x8x32xf32, #tpu.memory_space<vmem>>, vector<1x8x32xf32>
    %323 = vector.shape_cast %322 : vector<1x8x32xf32> to vector<8x32xf32>
    %324 = vector.shape_cast %321 : vector<8x32xf32> to vector<1x8x32xf32>
    tpu.vector_store %arg13[%c0_120, %c0_121, %c0_122], %324 {strides = array<i32>} : memref<1x8x32xf32, #tpu.memory_space<vmem>>, vector<1x8x32xf32>,
    return
  }
  func.func @transform_0(%arg0: i32, %arg1: i32) -> (i32, i32, i32) {
    %c0_i32 = arith.constant 0 : i32
    %c0_i32_0 = arith.constant 0 : i32
    return %arg0, %arg1, %c0_i32 : i32, i32, i32
  }
  func.func @transform_1(%arg0: i32, %arg1: i32) -> (i32, i32, i32) {
    %c0_i32 = arith.constant 0 : i32
    %c0_i32_0 = arith.constant 0 : i32
    %c0_i32_1 = arith.constant 0 : i32
    return %arg0, %c0_i32, %c0_i32_0 : i32, i32, i32
  }
  func.func @transform_2(%arg0: i32, %arg1: i32) -> (i32, i32, i32) {
    %c0_i32 = arith.constant 0 : i32
    %c0_i32_0 = arith.constant 0 : i32
    %c0_i32_1 = arith.constant 0 : i32
    return %arg0, %c0_i32, %c0_i32_0 : i32, i32, i32
  }
  func.func @transform_3(%arg0: i32, %arg1: i32) -> (i32, i32) {
    %c0_i32 = arith.constant 0 : i32
    %c0_i32_0 = arith.constant 0 : i32
    %c0_i32_1 = arith.constant 0 : i32
    return %c0_i32, %c0_i32_0 : i32, i32
  }
  func.func @transform_4(%arg0: i32, %arg1: i32) -> (i32, i32) {
    %c0_i32 = arith.constant 0 : i32
    %c0_i32_0 = arith.constant 0 : i32
    %c0_i32_1 = arith.constant 0 : i32
    return %c0_i32, %c0_i32_0 : i32, i32
  }
  func.func @transform_5(%arg0: i32, %arg1: i32) -> (i32, i32) {
    %c0_i32 = arith.constant 0 : i32
    %c0_i32_0 = arith.constant 0 : i32
    %c0_i32_1 = arith.constant 0 : i32
    return %c0_i32, %c0_i32_0 : i32, i32
  }
  func.func @transform_6(%arg0: i32, %arg1: i32) -> (i32, i32) {
    %c0_i32 = arith.constant 0 : i32
    %c0_i32_0 = arith.constant 0 : i32
    %c0_i32_1 = arith.constant 0 : i32
    return %c0_i32, %c0_i32_0 : i32, i32
  }
  func.func @transform_7(%arg0: i32, %arg1: i32) -> (i32, i32) {
    %c0_i32 = arith.constant 0 : i32
    %c0_i32_0 = arith.constant 0 : i32
    %c0_i32_1 = arith.constant 0 : i32
    return %c0_i32, %c0_i32_0 : i32, i32
  }
  func.func @transform_8(%arg0: i32, %arg1: i32) -> (i32, i32) {
    %c0_i32 = arith.constant 0 : i32
    %c0_i32_0 = arith.constant 0 : i32
    %c0_i32_1 = arith.constant 0 : i32
    return %c0_i32, %c0_i32_0 : i32, i32
  }
  func.func @transform_9(%arg0: i32, %arg1: i32) -> (i32, i32) {
    %c0_i32 = arith.constant 0 : i32
    %c0_i32_0 = arith.constant 0 : i32
    %c0_i32_1 = arith.constant 0 : i32
    return %c0_i32, %c0_i32_0 : i32, i32
  }
  func.func @transform_10(%arg0: i32, %arg1: i32) -> (i32, i32) {
    %c0_i32 = arith.constant 0 : i32
    %c0_i32_0 = arith.constant 0 : i32
    %c0_i32_1 = arith.constant 0 : i32
    return %c0_i32, %c0_i32_0 : i32, i32
  }
  func.func @transform_11(%arg0: i32, %arg1: i32) -> (i32, i32, i32) {
    %c0_i32 = arith.constant 0 : i32
    %c0_i32_0 = arith.constant 0 : i32
    return %arg0, %arg1, %c0_i32 : i32, i32, i32
  }
}

</mosaic_0001>

<bundles_post_ra>
// kernel: tpu_custom_call.1
= control target key start
LH: loop header
LB: loop body
LE: loop exit
PB: predicated region body
PF: predicated region fallthrough
CT: control target
= control target key end

     0   :  { %s3736_s0 = inlined_call_operand.hbm [shape: f32[2,8,32], index: 0, kind: input, shape index: {}]   ;;  %s3737_s1 = inlined_call_operand.hbm [shape: f32[2,8,32], index: 1, kind: input, shape index: {}]   ;;  %s3738_s2 = inlined_call_operand.hbm [shape: f32[2,8,32], index: 2, kind: input, shape index: {}]   ;;  %s3739_s3 = inlined_call_operand.hbm [shape: bf16[32,32], index: 3, kind: input, shape index: {}]   ;;  %s3740_s4 = inlined_call_operand.hbm [shape: f32[1,32], index: 4, kind: input, shape index: {}]   ;;  %s3741_s5 = inlined_call_operand.hbm [shape: bf16[32,32], index: 5, kind: input, shape index: {}]   ;;  %s3742_s6 = inlined_call_operand.hbm [shape: f32[1,32], index: 6, kind: input, shape index: {}]   ;;  %s3743_s7 = inlined_call_operand.hbm [shape: bf16[32,32], index: 7, kind: input, shape index: {}]   ;;  %s3744_s8 = inlined_call_operand.hbm [shape: f32[1,32], index: 8, kind: input, shape index: {}]   ;;  %s3745_s9 = inlined_call_operand.vmem [shape: bf16[32,32], index: 9, kind: input, shape index: {}]   ;;  %s3746_s10 = inlined_call_operand.vmem [shape: f32[1,32], index: 10, kind: input, shape index: {}]   ;;  %s3747_s11 = inlined_call_operand.hbm [shape: f32[2,8,32], index: 11, kind: output, shape index: {}]  }
   0x1   :  { %3763 = sst [smem:[#allocation34_spill]] %s3739_s3 }
   0x2   :  { %3764 = sst [smem:[#allocation35_spill]] %s3741_s5 }
   0x3   :  { %3765 = sst [smem:[#allocation36_spill]] %s3743_s7 }
   0x4   :  { %3766 = sst [smem:[#allocation37_spill]] %s3746_s10 }
   0x5   :  { %3767 = sst [smem:[#allocation38_spill]] %s3747_s11 }
   0x6   :  { %16 = vsyncpa [#allocation7], 0 }
   0x7   :  { %18 = vsyncpa [#allocation7 + $0x1], 0 }
   0x8   :  { %19 = vsyncpa [#allocation10], 0 }
   0x9   :  { %21 = vsyncpa [#allocation10 + $0x1], 0 }
   0xa   :  { %22 = vsyncpa [#allocation13], 0 }
   0xb   :  { %23 = vsyncpa [#allocation16], 0 }
   0xc   :  { %24 = vsyncpa [#allocation19], 0 }
   0xd   :  { %25 = vsyncpa [#allocation8], 0 }
   0xe   :  { %27 = vsyncpa [#allocation8 + $0x1], 0  ;;  %s3178_s17 = smov 0   ;;  %s3180_s18 = smov 0  }
   0xf   :  { %s3182_s19 = smov 0   ;;  %s3184_s20 = smov 0  }
  0x10   :  { %s3186_s21 = smov 0   ;;  %s3188_s22 = smov 0  }
  0x11 LB: > { %3768 = sst [smem:[#allocation28_spill]] %s3074_s17  ;;  %s3209_s23 = sadd.s32 4294967295, %s3094_s22   ;;  %s3094_s22 = sphi %s3188_s22, %s33_s22   ;;  %s3090_s21 = sphi %s3186_s21, %s3808_s21   ;;  %s3086_s20 = sphi %s3184_s20, %s3807_s20   ;;  %s3082_s19 = sphi %s3182_s19, %s3811_s19   ;;  %s3078_s18 = sphi %s3180_s18, %s3810_s18   ;;  %s3074_s17 = sphi %s3178_s17, %s3809_s17  }
  0x12   : > { %3769 = sst [smem:[#allocation29_spill]] %s3090_s21  ;;  %p2352_p0 = scmp.ge.s32.totalorder %s3094_s22, 1 }
  0x13   : > { %3770 = sst [smem:[#allocation30_spill]] %s3094_s22  ;;  %p3748_p1 = scmp.eq.s32.totalorder %s3209_s23, 0 }
  0x14   : > { %p326_p2 = scmp.lt.s32.totalorder %s3094_s22, 3  ;;  %s3096_s25 = smov [#allocation12]  }
  0x15   : > { %s338_s26 = sshll.u32 %s3096_s25, 4  ;;  %s3097_s28 = smov [#allocation15]   ;;  %s339_s26 = int_to_ptr.vmem [resolvable:$true] %s338_s26 }
  0x16   : > { %p3214_p3 = pnand %p2352_p0, %p326_p2  ;;  %s362_s29 = sshll.u32 %s3097_s28, 4  ;;  %s363_s29 = int_to_ptr.vmem [resolvable:$true] %s362_s29 }
  0x17   : > { %s3098_s30 = smov [#allocation18]   ;;  %s2769_s14 = scalar_lea.vmem %s339_s26, 256 }
  0x18   : > { %s3771_s24 = scalar_select %p3214_p3, 1, 0 }
  0x19   : > { %p2621_p4 = pneg %p3214_p3  ;;  %s386_s12 = sshll.u32 %s3098_s30, 4  ;;  %s387_s12 = int_to_ptr.vmem [resolvable:$true] %s386_s12 }
  0x1a   : > { %p2770_p8 = scmp.ne.s32.totalorder %s339_s26, %s2769_s14  ;;  %p2777_p11 = scmp.lt.s32.totalorder %s339_s26, %s339_s26 }
  0x1b   : > { %p3223_p6 = pnand %p2621_p4, %p3748_p1  ;;  %p2778_p12 = scmp.lt.s32.totalorder %s2769_s14, %s2769_s14 }
  0x1d   : > { %s3772_s27 = scalar_select %p3223_p6, 1, 0 }
  0x1e   : > { %p3229_p7 = pneg %p3223_p6  ;;  %p2779_p13 = por %p2778_p12, %p2777_p11 }
  0x20   : > { %p2772_p9 = pnand %p2770_p8, %p3229_p7 }
  0x22   : > { %p2773_p10 = pneg %p2772_p9 }
  0x24   : > { %p2780_p0 = pnand %p2779_p13, %p2773_p10 }
  0x26   : > { %2783 = shalt.err (!%p2780_p0)
}
  0x27   : > { %s3099_s15 = smov 64   ;;  %s3100_s16 = smov 4  }
  0x28   : > { %s3774_s3 = sld [smem:[#allocation34_spill]]  ;;  %s2795_s30 = scalar_lea.vmem %s363_s29, 256 }
  0x29   : > { %p2796_p2 = scmp.ne.s32.totalorder %s363_s29, %s2795_s30  ;;  %p2803_p9 = scmp.lt.s32.totalorder %s363_s29, %s363_s29 }
  0x2a   : > { %p2804_p5 = scmp.lt.s32.totalorder %s2795_s30, %s2795_s30 }
  0x2b   : > { %p2798_p4 = pnand %p2796_p2, %p3229_p7 }
  0x2c   : > { %p2805_p1 = por %p2804_p5, %p2803_p9 }
  0x2d   : > { %p2799_p8 = pneg %p2798_p4 }
  0x2e   : > { %2624 = dma.hbm_to_vmem [thread:$0]  (!%p3223_p6), %s3774_s3, 256, %s339_s26, [#allocation13], %s3099_s15, %s3099_s15, %s3100_s16  }
  0x2f   : > { %p2806_p11 = pnand %p2805_p1, %p2799_p8 }
  0x31   : > { %2809 = shalt.err (!%p2806_p11)
}
  0x32   : > { %s3775_s5 = sld [smem:[#allocation35_spill]]  ;;  %s2821_s25 = scalar_lea.vmem %s387_s12, 256 }
  0x33   : > { %p2822_p10 = scmp.ne.s32.totalorder %s387_s12, %s2821_s25  ;;  %p2829_p0 = scmp.lt.s32.totalorder %s387_s12, %s387_s12 }
  0x34   : > { %p2830_p2 = scmp.lt.s32.totalorder %s2821_s25, %s2821_s25 }
  0x35   : > { %p2824_p12 = pnand %p2822_p10, %p3229_p7 }
  0x36   : > { %p2831_p4 = por %p2830_p2, %p2829_p0 }
  0x37   : > { %p2825_p13 = pneg %p2824_p12 }
  0x38   : > { %2630 = dma.hbm_to_vmem [thread:$0]  (!%p3223_p6), %s3775_s5, 256, %s363_s29, [#allocation16], %s3099_s15, %s3099_s15, %s3100_s16  }
  0x39   : > { %p2832_p3 = pnand %p2831_p4, %p2825_p13 }
  0x3b   : > { %2835 = shalt.err (!%p2832_p3)
}
  0x3c   : > { %s3776_s7 = sld [smem:[#allocation36_spill]]  ;;  %s2351_s11 = sadd.s32 4294967294, %s3094_s22  }
  0x3d   : > { %s45_s29 = sadd.s32 1, %s3090_s21  ;;  %s54_s30 = sadd.s32 1, %s3082_s19 }
  0x3e   : > { %p47_p1 = scmp.ge.s32.totalorder %s45_s29, 2  ;;  %p61_p3 = scmp.ne.s32.totalorder %s3082_s19, %s3078_s18 }
  0x3f   : > { %p62_p5 = scmp.eq.s32.totalorder %s3094_s22, 0  ;;  %p67_p8 = scmp.ne.s32.totalorder %s3078_s18, %s3074_s17 }
  0x40   : > { %s3813_s29 = smov (%p47_p1, %s45_s29), 0  ;;  %p3779_p11 = scmp.eq.s32.totalorder %s3209_s23, 0 }
  0x41   : > { %3777 = sst [smem:[#allocation31_spill]] %s3813_s29  ;;  %p3264_p9 = por %p62_p5, %p61_p3 }
  0x42   : > { %2636 = dma.hbm_to_vmem [thread:$0]  (!%p3223_p6), %s3776_s7, 256, %s387_s12, [#allocation19], %s3099_s15, %s3099_s15, %s3100_s16  }
  0x43   : > { %p3270_p10 = por %p3779_p11, %p67_p8  ;;  %s49_s15 = ssub.s32 %s3090_s21, %s3813_s29 }
  0x44   : > { %p313_p12 = scmp.eq.s32.totalorder %s3209_s23, 1  ;;  %p52_p13 = scmp.eq.s32.totalorder %s49_s15, 0 }
  0x45   : > { %s3780_s12 = scalar_select %p3270_p10, 1, 0 }
  0x46   : > { %p319_p0 = scmp.eq.s32.totalorder %s2351_s11, 1  ;;  %p3277_p2 = por %p313_p12, %p61_p3 }
  0x47   : > { %p2660_p4 = scmp.lt.s32.totalorder %s3094_s22, 2  ;;  %s3753_s28 = sand.u32 1, %s3082_s19  }
  0x48   : > { %s3781_s16 = scalar_select %p3277_p2, 1, 0 }
  0x49   : > { %s3283_s25 = scalar_select %p52_p13, %s3082_s19, %s54_s30  }
  0x4a   : > { %p3285_p1 = por %p319_p0, %p67_p8  ;;  %s3292_s3 = sshll.u32 %s3753_s28, 3 }
  0x4b   : > { %3782 = sst [smem:[#allocation32_spill]] %s3283_s25  ;;  %s3295_s5 = sshll.u32 %s3090_s21, 7 }
  0x4c   : > { %s3783_s26 = scalar_select %p3285_p1, 1, 0 }
  0x4d   : > { %p3299_p3 = pnand %p2660_p4, %p3264_p9  ;;  %s436_s30 = sand.u32 1, %s3094_s22  }
  0x4e   : > { %3784 = sst [smem:[#allocation33_spill]] %s3783_s26  ;;  %s445_s29 = scalar_lea.hbm %s3737_s1, %s3295_s5 }
  0x4f   : > { %s440_s25 = scalar_lea.vmem [#allocation9], %s3292_s3  ;;  %s3101_s28 = smov [#allocation14]  }
  0x50   : > { %s447_s26 = sshll.u32 %s440_s25, 4  ;;  %s352_s17 = sshll.u32 %s3101_s28, 4  ;;  %s448_s26 = int_to_ptr.vmem [resolvable:$true] %s447_s26  ;;  %s353_s17 = int_to_ptr.vmem [resolvable:$true] %s352_s17 }
  0x51   : > { %s3309_s21 = scalar_lea.sflag [#allocation10], %s436_s30  ;;  %p3758_p5 = pneg %p3299_p3 }
  0x52   : > { %s2849_s14 = scalar_lea.vmem %s448_s26, 128  ;;  %s3102_s22 = smov [#allocation9]  }
  0x53   : > { %p2850_p8 = scmp.ne.s32.totalorder %s448_s26, %s2849_s14  ;;  %s2854_s10 = sshll.u32 %s3102_s22, 4  ;;  %s2855_s10 = int_to_ptr.vmem [resolvable:$false] %s2854_s10 }
  0x54   : > { %s2856_s7 = scalar_lea.vmem %s2855_s10, 256  ;;  %p2857_p12 = scmp.lt.s32.totalorder %s448_s26, %s2855_s10 }
  0x55   : > { %p2852_p9 = pnand %p2850_p8, %p3758_p5  ;;  %p2858_p13 = scmp.lt.s32.totalorder %s2856_s7, %s2849_s14 }
  0x57   : > { %p2853_p11 = pneg %p2852_p9  ;;  %p2859_p0 = por %p2858_p13, %p2857_p12 }
  0x59   : > { %p2860_p4 = pnand %p2859_p0, %p2853_p11 }
  0x5b   : > { %2863 = shalt.err (!%p2860_p4)
}
  0x5c   : > { %2646 = dma.hbm_to_vmem [thread:$0]  (!%p3299_p3), %s445_s29, 128, %s448_s26, %s3309_s21  }
  0x5d   : > { %s2875_s25 = scalar_lea.vmem %s353_s17, 16  ;;  %s2882_s28 = scalar_lea.vmem %s353_s17, 32 }
  0x5e   : > { %p2876_p1 = scmp.ne.s32.totalorder %s353_s17, %s2875_s25  ;;  %p2883_p5 = scmp.lt.s32.totalorder %s353_s17, %s353_s17 }
  0x5f   : > { %p2884_p2 = scmp.lt.s32.totalorder %s2882_s28, %s2875_s25 }
  0x60   : > { %p2878_p8 = pnand %p2876_p1, %p3229_p7 }
  0x61   : > { %p2885_p10 = por %p2884_p2, %p2883_p5 }
  0x62   : > { %p2879_p9 = pneg %p2878_p8 }
  0x64   : > { %p2886_p6 = pnand %p2885_p10, %p2879_p9 }
  0x66   : > { %2889 = shalt.err (!%p2886_p6)
}
  0x67   : > { %p3786_p11 = scmp.ne.s32.totalorder %s3772_s27, 0  ;;  %s3103_s29 = smov [#allocation17]  }
  0x68   : > { %s376_s26 = sshll.u32 %s3103_s29, 4  ;;  %s3104_s30 = smov [#allocation20]   ;;  %s377_s26 = int_to_ptr.vmem [resolvable:$true] %s376_s26 }
  0x69   : > { %2627 = dma.hbm_to_vmem [thread:$0]  (!%p3786_p11), %s3740_s4, 16, %s353_s17, [#allocation13]  }
  0x6a   : > { %s400_s15 = sshll.u32 %s3104_s30, 4  ;;  %s2901_s14 = scalar_lea.vmem %s377_s26, 16  ;;  %s401_s15 = int_to_ptr.vmem [resolvable:$true] %s400_s15 }
  0x6b   : > { %p2902_p1 = scmp.ne.s32.totalorder %s377_s26, %s2901_s14  ;;  %s2908_s7 = scalar_lea.vmem %s377_s26, 32 }
  0x6c   : > { %p2909_p10 = scmp.lt.s32.totalorder %s377_s26, %s377_s26  ;;  %p2910_p6 = scmp.lt.s32.totalorder %s2908_s7, %s2901_s14 }
  0x6d   : > { %p2904_p12 = pnand %p2902_p1, %p3229_p7 }
  0x6e   : > { %p2911_p2 = por %p2910_p6, %p2909_p10 }
  0x6f   : > { %p2905_p13 = pneg %p2904_p12 }
  0x71   : > { %p2912_p5 = pnand %p2911_p2, %p2905_p13 }
  0x73   : > { %2915 = shalt.err (!%p2912_p5)
}
  0x74   : > { %2633 = dma.hbm_to_vmem [thread:$0]  (!%p3786_p11), %s3742_s6, 16, %s377_s26, [#allocation16]  }
  0x75   : > { %s2927_s28 = scalar_lea.vmem %s401_s15, 16  ;;  %s2934_s10 = scalar_lea.vmem %s401_s15, 32 }
  0x76   : > { %p2928_p0 = scmp.ne.s32.totalorder %s401_s15, %s2927_s28  ;;  %p2935_p9 = scmp.lt.s32.totalorder %s401_s15, %s401_s15 }
  0x77   : > { %p2936_p1 = scmp.lt.s32.totalorder %s2934_s10, %s2927_s28 }
  0x78   : > { %p2930_p4 = pnand %p2928_p0, %p3229_p7 }
  0x79   : > { %p2937_p12 = por %p2936_p1, %p2935_p9 }
  0x7a   : > { %p2931_p8 = pneg %p2930_p4 }
  0x7c   : > { %p2938_p10 = pnand %p2937_p12, %p2931_p8 }
  0x7e   : > { %2941 = shalt.err (!%p2938_p10)
}
  0x7f   : > { %2639 = dma.hbm_to_vmem [thread:$0]  (!%p3786_p11), %s3744_s8, 16, %s401_s15, [#allocation19]  }
  0x80   : > { %s427_s30 = scalar_lea.hbm %s3736_s0, %s3295_s5  ;;  %s421_s14 = scalar_lea.vmem [#allocation6], %s3292_s3 }
  0x81   : > { %s429_s7 = sshll.u32 %s421_s14, 4  ;;  %s463_s27 = scalar_lea.hbm %s3738_s2, %s3295_s5  ;;  %s430_s7 = int_to_ptr.vmem [resolvable:$true] %s429_s7 }
  0x82   : > { %s3787_s28 = sand.u32 1, %s3082_s19   ;;  %s2955_s22 = scalar_lea.vmem %s430_s7, 128 }
  0x83   : > { %s418_s10 = scalar_lea.sflag [#allocation7], %s3787_s28  ;;  %p2956_p7 = scmp.ne.s32.totalorder %s430_s7, %s2955_s22 }
  0x84   : > { %p3788_p13 = pneg %p3299_p3  ;;  %s3105_s15 = smov [#allocation6]  }
  0x85   : > { %s2960_s29 = sshll.u32 %s3105_s15, 4  ;;  %s2961_s29 = int_to_ptr.vmem [resolvable:$false] %s2960_s29 }
  0x86   : > { %p2958_p6 = pnand %p2956_p7, %p3788_p13  ;;  %s2962_s13 = scalar_lea.vmem %s2961_s29, 256 }
  0x87   : > { %p2963_p11 = scmp.lt.s32.totalorder %s430_s7, %s2961_s29  ;;  %p2964_p5 = scmp.lt.s32.totalorder %s2962_s13, %s2955_s22 }
  0x88   : > { %p2959_p2 = pneg %p2958_p6 }
  0x89   : > { %p2965_p0 = por %p2964_p5, %p2963_p11 }
  0x8b   : > { %p2966_p4 = pnand %p2965_p0, %p2959_p2 }
  0x8d   : > { %2969 = shalt.err (!%p2966_p4)
}
  0x8e   : > { %2643 = dma.hbm_to_vmem [thread:$0]  (!%p3299_p3), %s427_s30, 128, %s430_s7, %s418_s10  }
  0x8f   : > { %s458_s26 = scalar_lea.vmem [#allocation11], %s3292_s3  ;;  %p3789_p9 = pmov %p3788_p13 }
  0x90   : > { %s465_s14 = sshll.u32 %s458_s26, 4  ;;  %s3106_s17 = smov [#allocation11]   ;;  %s466_s14 = int_to_ptr.vmem [resolvable:$true] %s465_s14 }
  0x91   : > { %s2983_s25 = scalar_lea.vmem %s466_s14, 128  ;;  %s2988_s28 = sshll.u32 %s3106_s17, 4  ;;  %s2989_s28 = int_to_ptr.vmem [resolvable:$false] %s2988_s28 }
  0x92   : > { %p2984_p8 = scmp.ne.s32.totalorder %s466_s14, %s2983_s25  ;;  %s2990_s22 = scalar_lea.vmem %s2989_s28, 256 }
  0x93   : > { %p2991_p10 = scmp.lt.s32.totalorder %s466_s14, %s2989_s28  ;;  %p2992_p7 = scmp.lt.s32.totalorder %s2990_s22, %s2983_s25 }
  0x94   : > { %p2986_p1 = pnand %p2984_p8, %p3789_p9 }
  0x95   : > { %p2993_p13 = por %p2992_p7, %p2991_p10 }
  0x96   : > { %p2987_p12 = pneg %p2986_p1 }
  0x98   : > { %p2994_p6 = pnand %p2993_p13, %p2987_p12 }
  0x9a   : > { %2997 = shalt.err (!%p2994_p6)
}
  0x9b   : > { %2649 = dma.hbm_to_vmem [thread:$0]  (!%p3299_p3), %s463_s27, 128, %s466_s14, %s3309_s21  }
  0x9c   : > { %p3790_p2 = scmp.ne.s32.totalorder %s3771_s24, 0 }
  0x9d   : > { %s3371_s7 = sand.u32 (!%p3790_p2), 1, %s3078_s18   ;;  %p3791_p11 = scmp.ne.s32.totalorder (!%p3790_p2), %s3780_s12, 0 }
  0x9e   : > { %474 = sbr.rel (%p3790_p2) target bundleno = 3723 (0xe8b), region = 64  ;;  %s3374_s10 = sshll.u32 (!%p3790_p2), %s3371_s7, 3 }
  0x9f   : > { %s477_s11 = scalar_lea.sflag (!%p3790_p2), [#allocation7], %s3371_s7  ;;  %s480_s15 = scalar_lea.vmem (!%p3790_p2), [#allocation6], %s3374_s10 }
  0xa3   : > { %3049 = dma.done.wait (%p3791_p11), %s477_s11, 128  }
  0xa4   : > { %3051 = vsyncadd (%p3791_p11), %s477_s11, 4294967168  ;;  %s485_s5 = sand.u32 1, %s3209_s23   ;;  %s489_s24 = scalar_lea.vmem [#allocation9], %s3374_s10 }
  0xa5   : > { %s486_s21 = scalar_lea.sflag [#allocation10], %s485_s5 }
  0xa6   : > { %3053 = dma.done.wait (%p3791_p11), %s486_s21, 256  }
  0xa7   : > { %3055 = vsyncadd (%p3791_p11), %s486_s21, 4294967040  ;;  %s498_s27 = scalar_lea.vmem [#allocation11], %s3374_s10  ;;  %p3792_p3 = scmp.eq.s32.totalorder %s3209_s23, 0 }
  0xa9   : > { %3057 = dma.done.wait (%p3792_p3), [#allocation13], 272   ;;  %p3793_p5 = pmov %p3792_p3 }
  0xaa   : > { %p3794_p0 = pmov %p3792_p3 }
  0xab   : > { %3059 = vsyncadd (%p3793_p5), [#allocation13], 4294967024 }
  0xac   : > { %3061 = dma.done.wait (%p3794_p0), [#allocation16], 272   ;;  %p3795_p4 = pmov %p3794_p0 }
  0xad   : > { %p3796_p8 = pmov %p3794_p0 }
  0xae   : > { %3063 = vsyncadd (%p3795_p4), [#allocation16], 4294967024 }
  0xaf   : > { %3065 = dma.done.wait (%p3796_p8), [#allocation19], 272   ;;  %p3797_p9 = pmov %p3794_p0 }
  0xb0   : > { %v3107_v0 = vmov 0.0   ;;  %vm3108_vm0 = vmmov 0   ;;  %v2734_v1 = vld [vmem:[#allocation15 + $0x8] sm:$0xff]   ;;  %v2735_v2 = vld [vmem:[#allocation15] sm:$0xff]   ;;  %vm603_vm1 = vcmask 261120   ;;  %v2736_v4 = vld [vmem:[#allocation12 + $0x8] sm:$0xff]  }
  0xb1   : > { %3067 = vsyncadd (%p3797_p9), [#allocation19], 4294967024  ;;  %2509 = vmatprep.subr.bf16.mxu0 %v3107_v0  ;;  %2513 = vmatprep.mubr.msk.bf16.mxu0 %vm3108_vm0, %v3107_v0  ;;  %v576_v3 = vld [vmem:[%s489_s24] sm:$0xff]  ;;  %v754_v7 = vld [vmem:[%s480_s15] sm:$0xff]  ;;  %vm714_vm2 = vcmask 60416   ;;  %s3109_s23 = smov 104  }
  0xb2   : > { %2517 = vmatprep.subr.bf16.mxu1 %v3107_v0  ;;  %2521 = vmatprep.mubr.msk.bf16.mxu1 %vm3108_vm0, %v3107_v0  ;;  %v577_v5 = vpack.c.bf16 %v576_v3, %v576_v3  ;;  %v2737_v6 = vld [vmem:[#allocation12] sm:$0xff]   ;;  %v755_v8 = vpack.c.bf16 %v754_v7, %v754_v7  ;;  %v2738_v9 = vld [vmem:[#allocation18 + $0x8] sm:$0xff]   ;;  %s3110_s12 = smov 120   ;;  %s3111_s29 = smov 112   ;;  %vm852_vm3 = vcmask 64512   ;;  %vm1876_vm4 = vcmask 1043456  }
  0xb3   : > { %2510 = vmatpush3.bf16.msra.mxu0 %v2734_v1  ;;  %2518 = vmatpush3.bf16.msra.mxu1 %v2738_v9  ;;  %v2739_v10 = vld [vmem:[#allocation18] sm:$0xff]   ;;  %v578_v11 = vld [vmem:[%s498_s27] sm:$0xff]  ;;  %v2377_v13 = vld [vmem:[#allocation17] ss:$0 sm:$0xff]  ;;  %s3114_s17 = smov 8   ;;  %s3115_s28 = smov 16  }
  0xb4   : > { %2511 = vmatprep.subr.bf16.mxu0 %v3107_v0  ;;  %2519 = vmatprep.subr.bf16.mxu1 %v3107_v0  ;;  %v579_v12 = vpack.c.bf16 %v578_v11, %v578_v11  ;;  %v2387_v20 = vld [vmem:[#allocation14] ss:$0 sm:$0xff]  ;;  %v2381_v30 = vld [vmem:[#allocation20] ss:$0 sm:$0xff]  ;;  %s3116_s22 = smov 24   ;;  %s3798_s11 = sld [smem:[#allocation37_spill]] }
  0xb5   : > { %s2472_s15 = sshll.u32 %s3086_s20, 7  ;;  %s570_s5 = scalar_lea.vmem [#allocation21], %s3374_s10 }
  0xb6   : > { %s2170_s21 = sshll.u32 %s570_s5, 4  ;;  %p3800_p12 = scmp.ne.s32.totalorder %s3781_s16, 0  ;;  %s3689_s21 = int_to_ptr.vmem [resolvable:$true] %s2170_s21 }
  0xb7   : > { %2512 = vmatpush3.bf16.msra.mxu0 %v2735_v2  ;;  %2520 = vmatpush3.bf16.msra.mxu1 %v2739_v10  ;;  %s2998_s20 = scalar_lea.vmem %s3689_s21, 128  ;;  %s3117_s10 = smov [#allocation21]  }
  0xb8   : > { %2525 = vmatprep.subr.bf16.mxu0 %v3107_v0  ;;  %2533 = vmatprep.subr.bf16.mxu1 %v3107_v0  ;;  %p2999_p1 = scmp.ne.s32.totalorder %s3689_s21, %s2998_s20  ;;  %s3002_s13 = sshll.u32 %s3117_s10, 4  ;;  %s3003_s13 = int_to_ptr.vmem [resolvable:$false] %s3002_s13 }
  0xb9   : > { %s3004_s26 = scalar_lea.vmem %s3003_s13, 256  ;;  %p3005_p13 = scmp.lt.s32.totalorder %s3689_s21, %s3003_s13 }
  0xba   : > { %2514 = vmatmul.mubr.msk.bf16.vlgmr.msra.gmra.mxu0 %vm603_vm1, %v577_v5  ;;  %2522 = vmatmul.mubr.msk.bf16.vlgmr.msra.gmra.mxu1 %vm603_vm1, %v579_v12  ;;  %p3000_p10 = pnand %p2999_p1, %p3800_p12  ;;  %p3006_p6 = scmp.lt.s32.totalorder %s3004_s26, %s2998_s20 }
  0xbb   : > { %2526 = vmatpush3.bf16.msra.mxu0 %v2736_v4  ;;  %2529 = vmatprep.mubr.msk.bf16.mxu0 %vm3108_vm0, %v3107_v0 }
  0xbc   : > { %2527 = vmatprep.subr.bf16.mxu0 %v3107_v0  ;;  %2535 = vmatprep.mubr.msk.bf16.mxu1 %vm3108_vm0, %v3107_v0  ;;  %p3001_p7 = pneg %p3000_p10  ;;  %p3007_p2 = por %p3006_p6, %p3005_p13 }
  0xbe   : > { %p3008_p11 = pnand %p3007_p2, %p3001_p7 }
  0xbf   : > { %2528 = vmatpush3.bf16.msra.mxu0 %v2737_v6 }
  0xc0   : > { %2539 = vmatprep.subr.bf16.mxu0 %v3107_v0 }
  0xc2   : > { %2530 = vmatmul.mubr.msk.bf16.vlgmr.msra.gmra.mxu0 %vm603_vm1, %v755_v8 }
  0xc3   : > { %2541 = vmatprep.mubr.msk.bf16.mxu0 %vm3108_vm0, %v3107_v0 }
 0x17a   : > { %v641_v14 = vpop.f32.mrf.mxu0  ;;  %v707_v31 = vpop.f32.mrf.mxu1 }
 0x17b   : > { %v642_v15 = vadd.f32 %v2377_v13, %v641_v14  ;;  %v708_v32 = vadd.f32 %v2381_v30, %v707_v31 }
 0x17c   : > { %v2515_v16 = vpop.f32.mrf.mxu0  ;;  %v2523_v33 = vpop.f32.mrf.mxu1 }
 0x17d   : > { %v713_v17 = vpack.c.bf16 %v642_v15, %v642_v15  ;;  %v3439_v34 = vpack.c.bf16 %v708_v32, %v708_v32 }
 0x17e   : > { %v644_v18 = vpop.f32.mrf.mxu0  ;;  %v710_v35 = vpop.f32.mrf.mxu1 }
 0x17f   : > { %715 = vst.msk [vmem:[#allocation2] sm:$0xf] %vm714_vm2, %v713_v17  ;;  %744 = vrot.lane.b32.xlu1 %v713_v17, %s3109_s23  ;;  %721 = vrot.lane.b32.xlu0 %v713_v17, %s3110_s12  ;;  %717 = vst.msk [vmem:[#allocation3] sm:$0xf] %vm714_vm2, %v3439_v34 }
 0x180   : > { %v2516_v19 = vpop.f32.mrf.mxu0  ;;  %v2524_v36 = vpop.f32.mrf.mxu1 }
 0x182   : > { %v817_v21 = vpop.f32.mrf.mxu0 }
 0x183   : > { %v818_v22 = vadd.f32 %v2387_v20, %v817_v21  ;;  %734 = vrot.lane.b32.xlu0 %v713_v17, %s3111_s29 }
 0x184   : > { %v2531_v23 = vpop.f32.mrf.mxu0 }
 0x185   : > { %v823_v24 = vpack.c.bf16 %v818_v22, %v818_v22 }
 0x186   : > { %v820_v25 = vpop.f32.mrf.mxu0  ;;  %v848_v26 = vld [vmem:[#allocation2] sm:$0xf]  ;;  %v1869_v52 = vld [vmem:[#allocation3] sm:$0xf] }
 0x187   : > { %825 = vst.msk [vmem:[#allocation4] sm:$0xf] %vm714_vm2, %v823_v24  ;;  %829 = vrot.lane.b32.xlu1 %v823_v24, %s3110_s12  ;;  %v857_v27 = vsel %vm852_vm3, %v848_v26, 0  ;;  %834 = vrot.lane.b32.xlu0 %v823_v24, %s3111_s29  ;;  %v1878_v53 = vsel %vm1876_vm4, %v1869_v52, 0 }
 0x188   : > { %2534 = vmatpush3.bf16.xpose.msra.mxu1 %v857_v27  ;;  %v2532_v28 = vpop.f32.mrf.mxu0 }
 0x189   : > { %2545 = vmatprep.subr.bf16.mxu1 %v3107_v0 }
 0x18b   : > { %839 = vrot.lane.b32.xlu1 %v823_v24, %s3109_s23 }
 0x18e   : > { %v844_v29 = vld [vmem:[#allocation4] sm:$0xf] }
 0x18f   : > { %2536 = vmatmul.mubr.msk.bf16.vlgmr.msra.gmra.mxu1 %vm852_vm3, %v844_v29 }
 0x190   : > { %2547 = vmatprep.mubr.msk.bf16.mxu1 %vm3108_vm0, %v3107_v0 }
 0x1f1   : > { %v745_v37 = vpop.permute.xlu1 %744  ;;  %v722_v38 = vpop.permute.xlu0 %721 }
 0x1f2   : > { %748 = vst.msk [vmem:[#allocation2 + $0xc] sm:$0xf] %vm714_vm2, %v745_v37  ;;  %725 = vst.msk [vmem:[#allocation2 + $0x4] sm:$0xf] %vm714_vm2, %v722_v38  ;;  %v3112_v38 = vmov -1.0  }
 0x1f5   : > { %v735_v39 = vpop.permute.xlu0 %734 }
 0x1f6   : > { %738 = vst.msk [vmem:[#allocation2 + $0x8] sm:$0xf] %vm714_vm2, %v735_v39 }
 0x1f9   : > { %v830_v40 = vpop.permute.xlu1 %829  ;;  %v835_v41 = vpop.permute.xlu0 %834  ;;  %v849_v42 = vld [vmem:[#allocation2 + $0x4] sm:$0xf]  ;;  %v851_v47 = vld [vmem:[#allocation2 + $0xc] sm:$0xf] }
 0x1fa   : > { %833 = vst.msk [vmem:[#allocation4 + $0x4] sm:$0xf] %vm714_vm2, %v830_v40  ;;  %838 = vst.msk [vmem:[#allocation4 + $0x8] sm:$0xf] %vm714_vm2, %v835_v41  ;;  %v903_v43 = vsel %vm852_vm3, %v849_v42, 0  ;;  %v995_v49 = vsel %vm852_vm3, %v851_v47, 0 }
 0x1fb   : > { %2540 = vmatpush3.bf16.xpose.msra.mxu0 %v903_v43  ;;  %v3113_v40 = vmov -0.5  }
 0x1fc   : > { %2551 = vmatprep.subr.bf16.mxu0 %v3107_v0 }
 0x1fd   : > { %v840_v44 = vpop.permute.xlu1 %839  ;;  %v850_v45 = vld [vmem:[#allocation2 + $0x8] sm:$0xf] }
 0x1fe   : > { %843 = vst.msk [vmem:[#allocation4 + $0xc] sm:$0xf] %vm714_vm2, %v840_v44  ;;  %v949_v46 = vsel %vm852_vm3, %v850_v45, 0 }
 0x1ff   : > { %2546 = vmatpush3.bf16.xpose.msra.mxu1 %v949_v46 }
 0x200   : > { %2557 = vmatprep.subr.bf16.mxu1 %v3107_v0 }
 0x201   : > { %v845_v48 = vld [vmem:[#allocation4 + $0x4] sm:$0xf]  ;;  %v846_v50 = vld [vmem:[#allocation4 + $0x8] sm:$0xf] }
 0x202   : > { %2542 = vmatmul.mubr.msk.bf16.vlgmr.msra.gmra.mxu0 %vm852_vm3, %v845_v48 }
 0x203   : > { %2552 = vmatpush3.bf16.xpose.msra.mxu0 %v995_v49  ;;  %2553 = vmatprep.mubr.msk.bf16.mxu0 %vm3108_vm0, %v3107_v0 }
 0x204   : > { %2563 = vmatprep.subr.bf16.mxu0 %v3107_v0 }
 0x205   : > { %v847_v51 = vld [vmem:[#allocation4 + $0xc] sm:$0xf] }
 0x206   : > { %2548 = vmatmul.mubr.msk.bf16.vlgmr.msra.gmra.mxu1 %vm852_vm3, %v846_v50 }
 0x207   : > { %2559 = vmatprep.mubr.msk.bf16.mxu1 %vm3108_vm0, %v3107_v0  ;;  %2558 = vmatpush3.bf16.msra.mxu1 %v1878_v53 }
 0x208   : > { %2569 = vmatprep.subr.bf16.mxu1 %v3107_v0 }
 0x20a   : > { %2554 = vmatmul.mubr.msk.bf16.vlgmr.msra.gmra.mxu0 %vm852_vm3, %v847_v51 }
 0x20b   : > { %2565 = vmatprep.mubr.msk.bf16.mxu0 %vm3108_vm0, %v3107_v0 }
 0x24f   : > { %v893_v54 = vpop.f32.mrf.mxu1 }
 0x250   : > { %v1037_v55 = vsel %vm852_vm3, %v893_v54, -inf }
 0x251   : > { %1038 = vmax.xlane.f32.xlu0 %v1037_v55  ;;  %v2537_v56 = vpop.f32.mrf.mxu1 }
 0x253   : > { %v896_v57 = vpop.f32.mrf.mxu1 }
 0x255   : > { %v2538_v58 = vpop.f32.mrf.mxu1 }
 0x2c2   : > { %v939_v59 = vpop.f32.mrf.mxu0 }
 0x2c3   : > { %v1040_v60 = vsel %vm852_vm3, %v939_v59, -inf }
 0x2c4   : > { %1041 = vmax.xlane.f32.xlu1 %v1040_v60  ;;  %v2543_v61 = vpop.f32.mrf.mxu0 }
 0x2c6   : > { %v942_v62 = vpop.f32.mrf.mxu0  ;;  %v985_v63 = vpop.f32.mrf.mxu1 }
 0x2c7   : > { %v1043_v1 = vsel %vm852_vm3, %v985_v63, -inf }
 0x2c8   : > { %1044 = vmax.xlane.f32.xlu0 %v1043_v1  ;;  %v2544_v2 = vpop.f32.mrf.mxu0  ;;  %v2549_v3 = vpop.f32.mrf.mxu1 }
 0x2ca   : > { %v988_v4 = vpop.f32.mrf.mxu1  ;;  %v1031_v5 = vpop.f32.mrf.mxu0 }
 0x2cb   : > { %v1046_v6 = vsel %vm852_vm3, %v1031_v5, -inf }
 0x2cc   : > { %v2550_v7 = vpop.f32.mrf.mxu1  ;;  %1047 = vmax.xlane.f32.xlu0 %v1046_v6  ;;  %v2555_v8 = vpop.f32.mrf.mxu0 }
 0x2ce   : > { %v1034_v9 = vpop.f32.mrf.mxu0 }
 0x2d0   : > { %v2556_v10 = vpop.f32.mrf.mxu0 }
 0x2da   : > { %v1039_v11 = vpop.xlane.xlu0 %1038 }
 0x2db   : > { %v3470_v12 = vsub.f32 %v893_v54, %v1039_v11 }
 0x2dd   : > { %v2396_v13 = vadd.f32 0.5, %v3470_v12 }
 0x2df   : > { %v1057_v14 = vmax.f32 %v2396_v13, 0.0 }
 0x2e1   : > { %v1061_v15 = vmul.f32 %v1057_v14, %v1057_v14 }
 0x2e3   : > { %v1065_v16 = vsel %vm852_vm3, %v1061_v15, 0.0 }
 0x2e4   : > { %1066 = vadd.xlane.f32.xlu1 %v1065_v16 }
 0x34d   : > { %v1042_v17 = vpop.xlane.xlu1 %1041 }
 0x34e   : > { %v3474_v18 = vsub.f32 %v939_v59, %v1042_v17 }
 0x350   : > { %v2397_v19 = vadd.f32 0.5, %v3474_v18 }
 0x351   : > { %v1045_v20 = vpop.xlane.xlu0 %1044 }
 0x352   : > { %v3477_v21 = vsub.f32 %v985_v63, %v1045_v20  ;;  %v1058_v22 = vmax.f32 %v2397_v19, 0.0 }
 0x354   : > { %v1062_v23 = vmul.f32 %v1058_v22, %v1058_v22  ;;  %v2398_v24 = vadd.f32 0.5, %v3477_v21 }
 0x355   : > { %v1048_v25 = vpop.xlane.xlu0 %1047 }
 0x356   : > { %v3480_v26 = vsub.f32 %v1031_v5, %v1048_v25  ;;  %v1068_v27 = vsel %vm852_vm3, %v1062_v23, 0.0  ;;  %v1059_v28 = vmax.f32 %v2398_v24, 0.0 }
 0x357   : > { %1069 = vadd.xlane.f32.xlu0 %v1068_v27 }
 0x358   : > { %v1063_v29 = vmul.f32 %v1059_v28, %v1059_v28  ;;  %v2399_v30 = vadd.f32 0.5, %v3480_v26 }
 0x35a   : > { %v1071_v31 = vsel %vm852_vm3, %v1063_v29, 0.0  ;;  %v1060_v32 = vmax.f32 %v2399_v30, 0.0 }
 0x35b   : > { %1072 = vadd.xlane.f32.xlu1 %v1071_v31 }
 0x35c   : > { %v1064_v33 = vmul.f32 %v1060_v32, %v1060_v32 }
 0x35e   : > { %v1074_v35 = vsel %vm852_vm3, %v1064_v33, 0.0 }
 0x35f   : > { %1075 = vadd.xlane.f32.xlu0 %v1074_v35 }
 0x36d   : > { %v1067_v36 = vpop.xlane.xlu1 %1066 }
 0x36e   : > { %v2400_v37 = vadd.f32 -1.0, %v1067_v36 }
 0x370   : > { %vm1081_vm5 = vcmp.ge.f32.partialorder %v2400_v37, 0.0 }
 0x371   : > { %v1085_v39 = vsel %vm1081_vm5, -0.5, %v3112_v38  ;;  %v1089_v41 = vsel %vm1081_vm5, 0.0, %v3113_v40 }
 0x372   : > { %v1093_v42 = vadd.f32 %v1089_v41, %v1085_v39 }
 0x374   : > { %v1097_v43 = vmul.f32 0.5, %v1093_v42 }
 0x376   : > { %v1101_v44 = vsub.f32 %v3470_v12, %v1097_v43 }
 0x378   : > { %v1105_v45 = vmax.f32 %v1101_v44, 0.0 }
 0x37a   : > { %v1109_v46 = vmul.f32 %v1105_v45, %v1105_v45 }
 0x37c   : > { %v1113_v47 = vsel %vm852_vm3, %v1109_v46, 0.0 }
 0x37d   : > { %1114 = vadd.xlane.f32.xlu1 %v1113_v47 }
 0x3e0   : > { %v1070_v48 = vpop.xlane.xlu0 %1069 }
 0x3e1   : > { %v2401_v49 = vadd.f32 -1.0, %v1070_v48 }
 0x3e3   : > { %vm1082_vm6 = vcmp.ge.f32.partialorder %v2401_v49, 0.0 }
 0x3e4   : > { %v1086_v50 = vsel %vm1082_vm6, -0.5, %v3112_v38  ;;  %v1090_v51 = vsel %vm1082_vm6, 0.0, %v3113_v40  ;;  %v1073_v52 = vpop.xlane.xlu1 %1072 }
 0x3e5   : > { %v1094_v53 = vadd.f32 %v1090_v51, %v1086_v50  ;;  %v2402_v54 = vadd.f32 -1.0, %v1073_v52 }
 0x3e7   : > { %v1098_v55 = vmul.f32 0.5, %v1094_v53  ;;  %vm1083_vm7 = vcmp.ge.f32.partialorder %v2402_v54, 0.0 }
 0x3e8   : > { %v1087_v56 = vsel %vm1083_vm7, -0.5, %v3112_v38  ;;  %v1091_v57 = vsel %vm1083_vm7, 0.0, %v3113_v40  ;;  %v1076_v58 = vpop.xlane.xlu0 %1075 }
 0x3e9   : > { %v1095_v59 = vadd.f32 %v1091_v57, %v1087_v56  ;;  %v2403_v60 = vadd.f32 -1.0, %v1076_v58  ;;  %v1102_v61 = vsub.f32 %v3474_v18, %v1098_v55 }
 0x3eb   : > { %v1099_v62 = vmul.f32 0.5, %v1095_v59  ;;  %vm1084_vm8 = vcmp.ge.f32.partialorder %v2403_v60, 0.0  ;;  %v1106_v63 = vmax.f32 %v1102_v61, 0.0 }
 0x3ec   : > { %v1088_v1 = vsel %vm1084_vm8, -0.5, %v3112_v38  ;;  %v1092_v2 = vsel %vm1084_vm8, 0.0, %v3113_v40 }
 0x3ed   : > { %v1096_v3 = vadd.f32 %v1092_v2, %v1088_v1  ;;  %v1110_v4 = vmul.f32 %v1106_v63, %v1106_v63  ;;  %v1103_v5 = vsub.f32 %v3477_v21, %v1099_v62 }
 0x3ef   : > { %v1100_v6 = vmul.f32 0.5, %v1096_v3  ;;  %v1116_v7 = vsel %vm852_vm3, %v1110_v4, 0.0  ;;  %v1107_v8 = vmax.f32 %v1103_v5, 0.0 }
 0x3f0   : > { %1117 = vadd.xlane.f32.xlu0 %v1116_v7 }
 0x3f1   : > { %v1111_v9 = vmul.f32 %v1107_v8, %v1107_v8  ;;  %v1104_v10 = vsub.f32 %v3480_v26, %v1100_v6 }
 0x3f3   : > { %v1119_v11 = vsel %vm852_vm3, %v1111_v9, 0.0  ;;  %v1108_v13 = vmax.f32 %v1104_v10, 0.0 }
 0x3f4   : > { %1120 = vadd.xlane.f32.xlu1 %v1119_v11 }
 0x3f5   : > { %v1112_v14 = vmul.f32 %v1108_v13, %v1108_v13 }
 0x3f7   : > { %v1122_v15 = vsel %vm852_vm3, %v1112_v14, 0.0 }
 0x3f8   : > { %1123 = vadd.xlane.f32.xlu0 %v1122_v15 }
 0x406   : > { %v1115_v16 = vpop.xlane.xlu1 %1114 }
 0x407   : > { %v2404_v17 = vadd.f32 -1.0, %v1115_v16 }
 0x409   : > { %vm1129_vm9 = vcmp.ge.f32.partialorder %v2404_v17, 0.0 }
 0x40a   : > { %v1133_v19 = vsel %vm1129_vm9, %v1097_v43, %v1085_v39  ;;  %v1137_v20 = vsel %vm1129_vm9, %v1089_v41, %v1097_v43 }
 0x40b   : > { %v1141_v22 = vadd.f32 %v1137_v20, %v1133_v19 }
 0x40d   : > { %v1145_v23 = vmul.f32 0.5, %v1141_v22 }
 0x40f   : > { %v1149_v24 = vsub.f32 %v3470_v12, %v1145_v23 }
 0x411   : > { %v1153_v25 = vmax.f32 %v1149_v24, 0.0 }
 0x413   : > { %v1157_v27 = vmul.f32 %v1153_v25, %v1153_v25 }
 0x415   : > { %v1161_v28 = vsel %vm852_vm3, %v1157_v27, 0.0 }
 0x416   : > { %1162 = vadd.xlane.f32.xlu1 %v1161_v28 }
 0x479   : > { %v1118_v29 = vpop.xlane.xlu0 %1117 }
 0x47a   : > { %v2405_v30 = vadd.f32 -1.0, %v1118_v29 }
 0x47c   : > { %vm1130_vm10 = vcmp.ge.f32.partialorder %v2405_v30, 0.0 }
 0x47d   : > { %v1134_v31 = vsel %vm1130_vm10, %v1098_v55, %v1086_v50  ;;  %v1138_v32 = vsel %vm1130_vm10, %v1090_v51, %v1098_v55  ;;  %v1121_v33 = vpop.xlane.xlu1 %1120 }
 0x47e   : > { %v1142_v35 = vadd.f32 %v1138_v32, %v1134_v31  ;;  %v2406_v36 = vadd.f32 -1.0, %v1121_v33 }
 0x480   : > { %v1146_v37 = vmul.f32 0.5, %v1142_v35  ;;  %vm1131_vm11 = vcmp.ge.f32.partialorder %v2406_v36, 0.0 }
 0x481   : > { %v1135_v38 = vsel %vm1131_vm11, %v1099_v62, %v1087_v56  ;;  %v1139_v39 = vsel %vm1131_vm11, %v1091_v57, %v1099_v62  ;;  %v1124_v40 = vpop.xlane.xlu0 %1123 }
 0x482   : > { %v1143_v41 = vadd.f32 %v1139_v39, %v1135_v38  ;;  %v2407_v42 = vadd.f32 -1.0, %v1124_v40  ;;  %v1150_v43 = vsub.f32 %v3474_v18, %v1146_v37 }
 0x484   : > { %v1147_v44 = vmul.f32 0.5, %v1143_v41  ;;  %vm1132_vm12 = vcmp.ge.f32.partialorder %v2407_v42, 0.0  ;;  %v1154_v45 = vmax.f32 %v1150_v43, 0.0 }
 0x485   : > { %v1136_v46 = vsel %vm1132_vm12, %v1100_v6, %v1088_v1  ;;  %v1140_v47 = vsel %vm1132_vm12, %v1092_v2, %v1100_v6 }
 0x486   : > { %v1144_v48 = vadd.f32 %v1140_v47, %v1136_v46  ;;  %v1158_v49 = vmul.f32 %v1154_v45, %v1154_v45  ;;  %v1151_v50 = vsub.f32 %v3477_v21, %v1147_v44 }
 0x488   : > { %v1148_v51 = vmul.f32 0.5, %v1144_v48  ;;  %v1164_v52 = vsel %vm852_vm3, %v1158_v49, 0.0  ;;  %v1155_v53 = vmax.f32 %v1151_v50, 0.0 }
 0x489   : > { %1165 = vadd.xlane.f32.xlu0 %v1164_v52 }
 0x48a   : > { %v1159_v54 = vmul.f32 %v1155_v53, %v1155_v53  ;;  %v1152_v55 = vsub.f32 %v3480_v26, %v1148_v51 }
 0x48c   : > { %v1167_v56 = vsel %vm852_vm3, %v1159_v54, 0.0  ;;  %v1156_v57 = vmax.f32 %v1152_v55, 0.0 }
 0x48d   : > { %1168 = vadd.xlane.f32.xlu1 %v1167_v56 }
 0x48e   : > { %v1160_v58 = vmul.f32 %v1156_v57, %v1156_v57 }
 0x490   : > { %v1170_v59 = vsel %vm852_vm3, %v1160_v58, 0.0 }
 0x491   : > { %1171 = vadd.xlane.f32.xlu0 %v1170_v59 }
 0x49f   : > { %v1163_v60 = vpop.xlane.xlu1 %1162 }
 0x4a0   : > { %v2408_v61 = vadd.f32 -1.0, %v1163_v60 }
 0x4a2   : > { %vm1177_vm13 = vcmp.ge.f32.partialorder %v2408_v61, 0.0 }
 0x4a3   : > { %v1181_v62 = vsel %vm1177_vm13, %v1145_v23, %v1133_v19  ;;  %v1185_v63 = vsel %vm1177_vm13, %v1137_v20, %v1145_v23 }
 0x4a4   : > { %v1189_v1 = vadd.f32 %v1185_v63, %v1181_v62 }
 0x4a6   : > { %v1193_v2 = vmul.f32 0.5, %v1189_v1 }
 0x4a8   : > { %v1197_v3 = vsub.f32 %v3470_v12, %v1193_v2 }
 0x4aa   : > { %v1201_v4 = vmax.f32 %v1197_v3, 0.0 }
 0x4ac   : > { %v1205_v5 = vmul.f32 %v1201_v4, %v1201_v4 }
 0x4ae   : > { %v1209_v6 = vsel %vm852_vm3, %v1205_v5, 0.0 }
 0x4af   : > { %1210 = vadd.xlane.f32.xlu1 %v1209_v6 }
 0x512   : > { %v1166_v7 = vpop.xlane.xlu0 %1165 }
 0x513   : > { %v2409_v8 = vadd.f32 -1.0, %v1166_v7 }
 0x515   : > { %vm1178_vm14 = vcmp.ge.f32.partialorder %v2409_v8, 0.0 }
 0x516   : > { %v1182_v9 = vsel %vm1178_vm14, %v1146_v37, %v1134_v31  ;;  %v1186_v10 = vsel %vm1178_vm14, %v1138_v32, %v1146_v37  ;;  %v1169_v11 = vpop.xlane.xlu1 %1168 }
 0x517   : > { %v1190_v13 = vadd.f32 %v1186_v10, %v1182_v9  ;;  %v2410_v14 = vadd.f32 -1.0, %v1169_v11 }
 0x519   : > { %v1194_v15 = vmul.f32 0.5, %v1190_v13  ;;  %vm1179_vm15 = vcmp.ge.f32.partialorder %v2410_v14, 0.0 }
 0x51a   : > { %v1183_v16 = vsel %vm1179_vm15, %v1147_v44, %v1135_v38  ;;  %v1187_v17 = vsel %vm1179_vm15, %v1139_v39, %v1147_v44  ;;  %v1172_v19 = vpop.xlane.xlu0 %1171 }
 0x51b   : > { %v1191_v20 = vadd.f32 %v1187_v17, %v1183_v16  ;;  %v2411_v22 = vadd.f32 -1.0, %v1172_v19  ;;  %v1198_v23 = vsub.f32 %v3474_v18, %v1194_v15 }
 0x51d   : > { %v1195_v24 = vmul.f32 0.5, %v1191_v20  ;;  %vm1180_vm5 = vcmp.ge.f32.partialorder %v2411_v22, 0.0  ;;  %v1202_v25 = vmax.f32 %v1198_v23, 0.0 }
 0x51e   : > { %v1184_v27 = vsel %vm1180_vm5, %v1148_v51, %v1136_v46  ;;  %v1188_v28 = vsel %vm1180_vm5, %v1140_v47, %v1148_v51 }
 0x51f   : > { %v1192_v29 = vadd.f32 %v1188_v28, %v1184_v27  ;;  %v1206_v30 = vmul.f32 %v1202_v25, %v1202_v25  ;;  %v1199_v31 = vsub.f32 %v3477_v21, %v1195_v24 }
 0x521   : > { %v1196_v32 = vmul.f32 0.5, %v1192_v29  ;;  %v1212_v33 = vsel %vm852_vm3, %v1206_v30, 0.0  ;;  %v1203_v35 = vmax.f32 %v1199_v31, 0.0 }
 0x522   : > { %1213 = vadd.xlane.f32.xlu0 %v1212_v33 }
 0x523   : > { %v1207_v36 = vmul.f32 %v1203_v35, %v1203_v35  ;;  %v1200_v37 = vsub.f32 %v3480_v26, %v1196_v32 }
 0x525   : > { %v1215_v38 = vsel %vm852_vm3, %v1207_v36, 0.0  ;;  %v1204_v39 = vmax.f32 %v1200_v37, 0.0 }
 0x526   : > { %1216 = vadd.xlane.f32.xlu1 %v1215_v38 }
 0x527   : > { %v1208_v40 = vmul.f32 %v1204_v39, %v1204_v39 }
 0x529   : > { %v1218_v41 = vsel %vm852_vm3, %v1208_v40, 0.0 }
 0x52a   : > { %1219 = vadd.xlane.f32.xlu0 %v1218_v41 }
 0x538   : > { %v1211_v42 = vpop.xlane.xlu1 %1210 }
 0x539   : > { %v2412_v43 = vadd.f32 -1.0, %v1211_v42 }
 0x53b   : > { %vm1225_vm6 = vcmp.ge.f32.partialorder %v2412_v43, 0.0 }
 0x53c   : > { %v1229_v44 = vsel %vm1225_vm6, %v1193_v2, %v1181_v62  ;;  %v1233_v45 = vsel %vm1225_vm6, %v1185_v63, %v1193_v2 }
 0x53d   : > { %v1237_v46 = vadd.f32 %v1233_v45, %v1229_v44 }
 0x53f   : > { %v1241_v47 = vmul.f32 0.5, %v1237_v46 }
 0x541   : > { %v1245_v48 = vsub.f32 %v3470_v12, %v1241_v47 }
 0x543   : > { %v1249_v49 = vmax.f32 %v1245_v48, 0.0 }
 0x545   : > { %v1253_v50 = vmul.f32 %v1249_v49, %v1249_v49 }
 0x547   : > { %v1257_v51 = vsel %vm852_vm3, %v1253_v50, 0.0 }
 0x548   : > { %1258 = vadd.xlane.f32.xlu1 %v1257_v51 }
 0x5ab   : > { %v1214_v52 = vpop.xlane.xlu0 %1213 }
 0x5ac   : > { %v2413_v53 = vadd.f32 -1.0, %v1214_v52 }
 0x5ae   : > { %vm1226_vm7 = vcmp.ge.f32.partialorder %v2413_v53, 0.0 }
 0x5af   : > { %v1230_v54 = vsel %vm1226_vm7, %v1194_v15, %v1182_v9  ;;  %v1234_v55 = vsel %vm1226_vm7, %v1186_v10, %v1194_v15  ;;  %v1217_v56 = vpop.xlane.xlu1 %1216 }
 0x5b0   : > { %v1238_v57 = vadd.f32 %v1234_v55, %v1230_v54  ;;  %v2414_v58 = vadd.f32 -1.0, %v1217_v56 }
 0x5b2   : > { %v1242_v59 = vmul.f32 0.5, %v1238_v57  ;;  %vm1227_vm8 = vcmp.ge.f32.partialorder %v2414_v58, 0.0 }
 0x5b3   : > { %v1231_v60 = vsel %vm1227_vm8, %v1195_v24, %v1183_v16  ;;  %v1235_v61 = vsel %vm1227_vm8, %v1187_v17, %v1195_v24  ;;  %v1220_v62 = vpop.xlane.xlu0 %1219 }
 0x5b4   : > { %v1239_v63 = vadd.f32 %v1235_v61, %v1231_v60  ;;  %v2415_v1 = vadd.f32 -1.0, %v1220_v62  ;;  %v1246_v2 = vsub.f32 %v3474_v18, %v1242_v59 }
 0x5b6   : > { %v1243_v3 = vmul.f32 0.5, %v1239_v63  ;;  %vm1228_vm9 = vcmp.ge.f32.partialorder %v2415_v1, 0.0  ;;  %v1250_v4 = vmax.f32 %v1246_v2, 0.0 }
 0x5b7   : > { %v1232_v5 = vsel %vm1228_vm9, %v1196_v32, %v1184_v27  ;;  %v1236_v6 = vsel %vm1228_vm9, %v1188_v28, %v1196_v32 }
 0x5b8   : > { %v1240_v7 = vadd.f32 %v1236_v6, %v1232_v5  ;;  %v1254_v8 = vmul.f32 %v1250_v4, %v1250_v4  ;;  %v1247_v9 = vsub.f32 %v3477_v21, %v1243_v3 }
 0x5ba   : > { %v1244_v10 = vmul.f32 0.5, %v1240_v7  ;;  %v1260_v11 = vsel %vm852_vm3, %v1254_v8, 0.0  ;;  %v1251_v13 = vmax.f32 %v1247_v9, 0.0 }
 0x5bb   : > { %1261 = vadd.xlane.f32.xlu0 %v1260_v11 }
 0x5bc   : > { %v1255_v14 = vmul.f32 %v1251_v13, %v1251_v13  ;;  %v1248_v15 = vsub.f32 %v3480_v26, %v1244_v10 }
 0x5be   : > { %v1263_v16 = vsel %vm852_vm3, %v1255_v14, 0.0  ;;  %v1252_v17 = vmax.f32 %v1248_v15, 0.0 }
 0x5bf   : > { %1264 = vadd.xlane.f32.xlu1 %v1263_v16 }
 0x5c0   : > { %v1256_v19 = vmul.f32 %v1252_v17, %v1252_v17 }
 0x5c2   : > { %v1266_v20 = vsel %vm852_vm3, %v1256_v19, 0.0 }
 0x5c3   : > { %1267 = vadd.xlane.f32.xlu0 %v1266_v20 }
 0x5d1   : > { %v1259_v22 = vpop.xlane.xlu1 %1258 }
 0x5d2   : > { %v2416_v23 = vadd.f32 -1.0, %v1259_v22 }
 0x5d4   : > { %vm1273_vm10 = vcmp.ge.f32.partialorder %v2416_v23, 0.0 }
 0x5d5   : > { %v1277_v24 = vsel %vm1273_vm10, %v1241_v47, %v1229_v44  ;;  %v1281_v25 = vsel %vm1273_vm10, %v1233_v45, %v1241_v47 }
 0x5d6   : > { %v1285_v27 = vadd.f32 %v1281_v25, %v1277_v24 }
 0x5d8   : > { %v1289_v28 = vmul.f32 0.5, %v1285_v27 }
 0x5da   : > { %v1293_v29 = vsub.f32 %v3470_v12, %v1289_v28 }
 0x5dc   : > { %v1297_v30 = vmax.f32 %v1293_v29, 0.0 }
 0x5de   : > { %v1301_v31 = vmul.f32 %v1297_v30, %v1297_v30 }
 0x5e0   : > { %v1305_v32 = vsel %vm852_vm3, %v1301_v31, 0.0 }
 0x5e1   : > { %1306 = vadd.xlane.f32.xlu1 %v1305_v32 }
 0x644   : > { %v1262_v33 = vpop.xlane.xlu0 %1261 }
 0x645   : > { %v2417_v35 = vadd.f32 -1.0, %v1262_v33 }
 0x647   : > { %vm1274_vm11 = vcmp.ge.f32.partialorder %v2417_v35, 0.0 }
 0x648   : > { %v1278_v36 = vsel %vm1274_vm11, %v1242_v59, %v1230_v54  ;;  %v1282_v37 = vsel %vm1274_vm11, %v1234_v55, %v1242_v59  ;;  %v1265_v38 = vpop.xlane.xlu1 %1264 }
 0x649   : > { %v1286_v39 = vadd.f32 %v1282_v37, %v1278_v36  ;;  %v2418_v40 = vadd.f32 -1.0, %v1265_v38 }
 0x64b   : > { %v1290_v41 = vmul.f32 0.5, %v1286_v39  ;;  %vm1275_vm12 = vcmp.ge.f32.partialorder %v2418_v40, 0.0 }
 0x64c   : > { %v1279_v42 = vsel %vm1275_vm12, %v1243_v3, %v1231_v60  ;;  %v1283_v43 = vsel %vm1275_vm12, %v1235_v61, %v1243_v3  ;;  %v1268_v44 = vpop.xlane.xlu0 %1267 }
 0x64d   : > { %v1287_v45 = vadd.f32 %v1283_v43, %v1279_v42  ;;  %v2419_v46 = vadd.f32 -1.0, %v1268_v44  ;;  %v1294_v47 = vsub.f32 %v3474_v18, %v1290_v41 }
 0x64f   : > { %v1291_v48 = vmul.f32 0.5, %v1287_v45  ;;  %vm1276_vm13 = vcmp.ge.f32.partialorder %v2419_v46, 0.0  ;;  %v1298_v49 = vmax.f32 %v1294_v47, 0.0 }
 0x650   : > { %v1280_v50 = vsel %vm1276_vm13, %v1244_v10, %v1232_v5  ;;  %v1284_v51 = vsel %vm1276_vm13, %v1236_v6, %v1244_v10 }
 0x651   : > { %v1288_v52 = vadd.f32 %v1284_v51, %v1280_v50  ;;  %v1302_v53 = vmul.f32 %v1298_v49, %v1298_v49  ;;  %v1295_v54 = vsub.f32 %v3477_v21, %v1291_v48 }
 0x653   : > { %v1292_v55 = vmul.f32 0.5, %v1288_v52  ;;  %v1308_v56 = vsel %vm852_vm3, %v1302_v53, 0.0  ;;  %v1299_v57 = vmax.f32 %v1295_v54, 0.0 }
 0x654   : > { %1309 = vadd.xlane.f32.xlu0 %v1308_v56 }
 0x655   : > { %v1303_v58 = vmul.f32 %v1299_v57, %v1299_v57  ;;  %v1296_v59 = vsub.f32 %v3480_v26, %v1292_v55 }
 0x657   : > { %v1311_v60 = vsel %vm852_vm3, %v1303_v58, 0.0  ;;  %v1300_v61 = vmax.f32 %v1296_v59, 0.0 }
 0x658   : > { %1312 = vadd.xlane.f32.xlu1 %v1311_v60 }
 0x659   : > { %v1304_v62 = vmul.f32 %v1300_v61, %v1300_v61 }
 0x65b   : > { %v1314_v63 = vsel %vm852_vm3, %v1304_v62, 0.0 }
 0x65c   : > { %1315 = vadd.xlane.f32.xlu0 %v1314_v63 }
 0x66a   : > { %v1307_v1 = vpop.xlane.xlu1 %1306 }
 0x66b   : > { %v2420_v2 = vadd.f32 -1.0, %v1307_v1 }
 0x66d   : > { %vm1321_vm14 = vcmp.ge.f32.partialorder %v2420_v2, 0.0 }
 0x66e   : > { %v1325_v3 = vsel %vm1321_vm14, %v1289_v28, %v1277_v24  ;;  %v1329_v4 = vsel %vm1321_vm14, %v1281_v25, %v1289_v28 }
 0x66f   : > { %v1333_v5 = vadd.f32 %v1329_v4, %v1325_v3 }
 0x671   : > { %v1337_v6 = vmul.f32 0.5, %v1333_v5 }
 0x673   : > { %v1341_v7 = vsub.f32 %v3470_v12, %v1337_v6 }
 0x675   : > { %v1345_v8 = vmax.f32 %v1341_v7, 0.0 }
 0x677   : > { %v1349_v9 = vmul.f32 %v1345_v8, %v1345_v8 }
 0x679   : > { %v1353_v10 = vsel %vm852_vm3, %v1349_v9, 0.0 }
 0x67a   : > { %1354 = vadd.xlane.f32.xlu1 %v1353_v10 }
 0x6dd   : > { %v1310_v11 = vpop.xlane.xlu0 %1309 }
 0x6de   : > { %v2421_v13 = vadd.f32 -1.0, %v1310_v11 }
 0x6e0   : > { %vm1322_vm15 = vcmp.ge.f32.partialorder %v2421_v13, 0.0 }
 0x6e1   : > { %v1326_v14 = vsel %vm1322_vm15, %v1290_v41, %v1278_v36  ;;  %v1330_v15 = vsel %vm1322_vm15, %v1282_v37, %v1290_v41  ;;  %v1313_v16 = vpop.xlane.xlu1 %1312 }
 0x6e2   : > { %v1334_v17 = vadd.f32 %v1330_v15, %v1326_v14  ;;  %v2422_v19 = vadd.f32 -1.0, %v1313_v16 }
 0x6e4   : > { %v1338_v20 = vmul.f32 0.5, %v1334_v17  ;;  %vm1323_vm5 = vcmp.ge.f32.partialorder %v2422_v19, 0.0 }
 0x6e5   : > { %v1327_v22 = vsel %vm1323_vm5, %v1291_v48, %v1279_v42  ;;  %v1331_v23 = vsel %vm1323_vm5, %v1283_v43, %v1291_v48  ;;  %v1316_v24 = vpop.xlane.xlu0 %1315 }
 0x6e6   : > { %v1335_v25 = vadd.f32 %v1331_v23, %v1327_v22  ;;  %v2423_v27 = vadd.f32 -1.0, %v1316_v24  ;;  %v1342_v28 = vsub.f32 %v3474_v18, %v1338_v20 }
 0x6e8   : > { %v1339_v29 = vmul.f32 0.5, %v1335_v25  ;;  %vm1324_vm6 = vcmp.ge.f32.partialorder %v2423_v27, 0.0  ;;  %v1346_v30 = vmax.f32 %v1342_v28, 0.0 }
 0x6e9   : > { %v1328_v31 = vsel %vm1324_vm6, %v1292_v55, %v1280_v50  ;;  %v1332_v32 = vsel %vm1324_vm6, %v1284_v51, %v1292_v55 }
 0x6ea   : > { %v1336_v33 = vadd.f32 %v1332_v32, %v1328_v31  ;;  %v1350_v35 = vmul.f32 %v1346_v30, %v1346_v30  ;;  %v1343_v36 = vsub.f32 %v3477_v21, %v1339_v29 }
 0x6ec   : > { %v1340_v37 = vmul.f32 0.5, %v1336_v33  ;;  %v1356_v38 = vsel %vm852_vm3, %v1350_v35, 0.0  ;;  %v1347_v39 = vmax.f32 %v1343_v36, 0.0 }
 0x6ed   : > { %1357 = vadd.xlane.f32.xlu0 %v1356_v38 }
 0x6ee   : > { %v1351_v40 = vmul.f32 %v1347_v39, %v1347_v39  ;;  %v1344_v41 = vsub.f32 %v3480_v26, %v1340_v37 }
 0x6f0   : > { %v1359_v42 = vsel %vm852_vm3, %v1351_v40, 0.0  ;;  %v1348_v43 = vmax.f32 %v1344_v41, 0.0 }
 0x6f1   : > { %1360 = vadd.xlane.f32.xlu1 %v1359_v42 }
 0x6f2   : > { %v1352_v44 = vmul.f32 %v1348_v43, %v1348_v43 }
 0x6f4   : > { %v1362_v45 = vsel %vm852_vm3, %v1352_v44, 0.0 }
 0x6f5   : > { %1363 = vadd.xlane.f32.xlu0 %v1362_v45 }
 0x703   : > { %v1355_v46 = vpop.xlane.xlu1 %1354 }
 0x704   : > { %v2424_v47 = vadd.f32 -1.0, %v1355_v46 }
 0x706   : > { %vm1369_vm7 = vcmp.ge.f32.partialorder %v2424_v47, 0.0 }
 0x707   : > { %v1373_v48 = vsel %vm1369_vm7, %v1337_v6, %v1325_v3  ;;  %v1377_v49 = vsel %vm1369_vm7, %v1329_v4, %v1337_v6 }
 0x708   : > { %v1381_v50 = vadd.f32 %v1377_v49, %v1373_v48 }
 0x70a   : > { %v1385_v51 = vmul.f32 0.5, %v1381_v50 }
 0x70c   : > { %v1389_v52 = vsub.f32 %v3470_v12, %v1385_v51 }
 0x70e   : > { %v1393_v53 = vmax.f32 %v1389_v52, 0.0 }
 0x710   : > { %v1397_v54 = vmul.f32 %v1393_v53, %v1393_v53 }
 0x712   : > { %v1401_v55 = vsel %vm852_vm3, %v1397_v54, 0.0 }
 0x713   : > { %1402 = vadd.xlane.f32.xlu1 %v1401_v55 }
 0x776   : > { %v1358_v56 = vpop.xlane.xlu0 %1357 }
 0x777   : > { %v2425_v57 = vadd.f32 -1.0, %v1358_v56 }
 0x779   : > { %vm1370_vm8 = vcmp.ge.f32.partialorder %v2425_v57, 0.0 }
 0x77a   : > { %v1374_v58 = vsel %vm1370_vm8, %v1338_v20, %v1326_v14  ;;  %v1378_v59 = vsel %vm1370_vm8, %v1330_v15, %v1338_v20  ;;  %v1361_v60 = vpop.xlane.xlu1 %1360 }
 0x77b   : > { %v1382_v61 = vadd.f32 %v1378_v59, %v1374_v58  ;;  %v2426_v62 = vadd.f32 -1.0, %v1361_v60 }
 0x77d   : > { %v1386_v63 = vmul.f32 0.5, %v1382_v61  ;;  %vm1371_vm9 = vcmp.ge.f32.partialorder %v2426_v62, 0.0 }
 0x77e   : > { %v1375_v1 = vsel %vm1371_vm9, %v1339_v29, %v1327_v22  ;;  %v1379_v2 = vsel %vm1371_vm9, %v1331_v23, %v1339_v29  ;;  %v1364_v3 = vpop.xlane.xlu0 %1363 }
 0x77f   : > { %v1383_v4 = vadd.f32 %v1379_v2, %v1375_v1  ;;  %v2427_v5 = vadd.f32 -1.0, %v1364_v3  ;;  %v1390_v6 = vsub.f32 %v3474_v18, %v1386_v63 }
 0x781   : > { %v1387_v7 = vmul.f32 0.5, %v1383_v4  ;;  %vm1372_vm10 = vcmp.ge.f32.partialorder %v2427_v5, 0.0  ;;  %v1394_v8 = vmax.f32 %v1390_v6, 0.0 }
 0x782   : > { %v1376_v9 = vsel %vm1372_vm10, %v1340_v37, %v1328_v31  ;;  %v1380_v10 = vsel %vm1372_vm10, %v1332_v32, %v1340_v37 }
 0x783   : > { %v1384_v11 = vadd.f32 %v1380_v10, %v1376_v9  ;;  %v1398_v13 = vmul.f32 %v1394_v8, %v1394_v8  ;;  %v1391_v14 = vsub.f32 %v3477_v21, %v1387_v7 }
 0x785   : > { %v1388_v15 = vmul.f32 0.5, %v1384_v11  ;;  %v1404_v16 = vsel %vm852_vm3, %v1398_v13, 0.0  ;;  %v1395_v17 = vmax.f32 %v1391_v14, 0.0 }
 0x786   : > { %1405 = vadd.xlane.f32.xlu0 %v1404_v16 }
 0x787   : > { %v1399_v19 = vmul.f32 %v1395_v17, %v1395_v17  ;;  %v1392_v20 = vsub.f32 %v3480_v26, %v1388_v15 }
 0x789   : > { %v1407_v22 = vsel %vm852_vm3, %v1399_v19, 0.0  ;;  %v1396_v23 = vmax.f32 %v1392_v20, 0.0 }
 0x78a   : > { %1408 = vadd.xlane.f32.xlu1 %v1407_v22 }
 0x78b   : > { %v1400_v24 = vmul.f32 %v1396_v23, %v1396_v23 }
 0x78d   : > { %v1410_v25 = vsel %vm852_vm3, %v1400_v24, 0.0 }
 0x78e   : > { %1411 = vadd.xlane.f32.xlu0 %v1410_v25 }
 0x79c   : > { %v1403_v27 = vpop.xlane.xlu1 %1402 }
 0x79d   : > { %v2428_v28 = vadd.f32 -1.0, %v1403_v27 }
 0x79f   : > { %vm1417_vm11 = vcmp.ge.f32.partialorder %v2428_v28, 0.0 }
 0x7a0   : > { %v1421_v29 = vsel %vm1417_vm11, %v1385_v51, %v1373_v48  ;;  %v1425_v30 = vsel %vm1417_vm11, %v1377_v49, %v1385_v51 }
 0x7a1   : > { %v1429_v31 = vadd.f32 %v1425_v30, %v1421_v29 }
 0x7a3   : > { %v1433_v32 = vmul.f32 0.5, %v1429_v31 }
 0x7a5   : > { %v1437_v33 = vsub.f32 %v3470_v12, %v1433_v32 }
 0x7a7   : > { %v1441_v35 = vmax.f32 %v1437_v33, 0.0 }
 0x7a9   : > { %v1445_v36 = vmul.f32 %v1441_v35, %v1441_v35 }
 0x7ab   : > { %v1449_v37 = vsel %vm852_vm3, %v1445_v36, 0.0 }
 0x7ac   : > { %1450 = vadd.xlane.f32.xlu1 %v1449_v37 }
 0x80f   : > { %v1406_v38 = vpop.xlane.xlu0 %1405 }
 0x810   : > { %v2429_v39 = vadd.f32 -1.0, %v1406_v38 }
 0x812   : > { %vm1418_vm12 = vcmp.ge.f32.partialorder %v2429_v39, 0.0 }
 0x813   : > { %v1422_v40 = vsel %vm1418_vm12, %v1386_v63, %v1374_v58  ;;  %v1426_v41 = vsel %vm1418_vm12, %v1378_v59, %v1386_v63  ;;  %v1409_v42 = vpop.xlane.xlu1 %1408 }
 0x814   : > { %v1430_v43 = vadd.f32 %v1426_v41, %v1422_v40  ;;  %v2430_v44 = vadd.f32 -1.0, %v1409_v42 }
 0x816   : > { %v1434_v45 = vmul.f32 0.5, %v1430_v43  ;;  %vm1419_vm13 = vcmp.ge.f32.partialorder %v2430_v44, 0.0 }
 0x817   : > { %v1423_v46 = vsel %vm1419_vm13, %v1387_v7, %v1375_v1  ;;  %v1427_v47 = vsel %vm1419_vm13, %v1379_v2, %v1387_v7  ;;  %v1412_v48 = vpop.xlane.xlu0 %1411 }
 0x818   : > { %v1431_v49 = vadd.f32 %v1427_v47, %v1423_v46  ;;  %v2431_v50 = vadd.f32 -1.0, %v1412_v48  ;;  %v1438_v51 = vsub.f32 %v3474_v18, %v1434_v45 }
 0x81a   : > { %v1435_v52 = vmul.f32 0.5, %v1431_v49  ;;  %vm1420_vm14 = vcmp.ge.f32.partialorder %v2431_v50, 0.0  ;;  %v1442_v53 = vmax.f32 %v1438_v51, 0.0 }
 0x81b   : > { %v1424_v54 = vsel %vm1420_vm14, %v1388_v15, %v1376_v9  ;;  %v1428_v55 = vsel %vm1420_vm14, %v1380_v10, %v1388_v15 }
 0x81c   : > { %v1432_v56 = vadd.f32 %v1428_v55, %v1424_v54  ;;  %v1446_v57 = vmul.f32 %v1442_v53, %v1442_v53  ;;  %v1439_v58 = vsub.f32 %v3477_v21, %v1435_v52 }
 0x81e   : > { %v1436_v59 = vmul.f32 0.5, %v1432_v56  ;;  %v1452_v60 = vsel %vm852_vm3, %v1446_v57, 0.0  ;;  %v1443_v61 = vmax.f32 %v1439_v58, 0.0 }
 0x81f   : > { %1453 = vadd.xlane.f32.xlu0 %v1452_v60 }
 0x820   : > { %v1447_v62 = vmul.f32 %v1443_v61, %v1443_v61  ;;  %v1440_v63 = vsub.f32 %v3480_v26, %v1436_v59 }
 0x822   : > { %v1455_v1 = vsel %vm852_vm3, %v1447_v62, 0.0  ;;  %v1444_v2 = vmax.f32 %v1440_v63, 0.0 }
 0x823   : > { %1456 = vadd.xlane.f32.xlu1 %v1455_v1 }
 0x824   : > { %v1448_v3 = vmul.f32 %v1444_v2, %v1444_v2 }
 0x826   : > { %v1458_v4 = vsel %vm852_vm3, %v1448_v3, 0.0 }
 0x827   : > { %1459 = vadd.xlane.f32.xlu0 %v1458_v4 }
 0x835   : > { %v1451_v5 = vpop.xlane.xlu1 %1450 }
 0x836   : > { %v2432_v6 = vadd.f32 -1.0, %v1451_v5 }
 0x838   : > { %vm1465_vm15 = vcmp.ge.f32.partialorder %v2432_v6, 0.0 }
 0x839   : > { %v1469_v7 = vsel %vm1465_vm15, %v1433_v32, %v1421_v29  ;;  %v1473_v8 = vsel %vm1465_vm15, %v1425_v30, %v1433_v32 }
 0x83a   : > { %v1477_v9 = vadd.f32 %v1473_v8, %v1469_v7 }
 0x83c   : > { %v1481_v10 = vmul.f32 0.5, %v1477_v9 }
 0x83e   : > { %v1485_v11 = vsub.f32 %v3470_v12, %v1481_v10 }
 0x840   : > { %v1489_v13 = vmax.f32 %v1485_v11, 0.0 }
 0x842   : > { %v1493_v14 = vmul.f32 %v1489_v13, %v1489_v13 }
 0x844   : > { %v1497_v15 = vsel %vm852_vm3, %v1493_v14, 0.0 }
 0x845   : > { %1498 = vadd.xlane.f32.xlu1 %v1497_v15 }
 0x8a8   : > { %v1454_v16 = vpop.xlane.xlu0 %1453 }
 0x8a9   : > { %v2433_v17 = vadd.f32 -1.0, %v1454_v16 }
 0x8ab   : > { %vm1466_vm5 = vcmp.ge.f32.partialorder %v2433_v17, 0.0 }
 0x8ac   : > { %v1470_v19 = vsel %vm1466_vm5, %v1434_v45, %v1422_v40  ;;  %v1474_v20 = vsel %vm1466_vm5, %v1426_v41, %v1434_v45  ;;  %v1457_v22 = vpop.xlane.xlu1 %1456 }
 0x8ad   : > { %v1478_v23 = vadd.f32 %v1474_v20, %v1470_v19  ;;  %v2434_v24 = vadd.f32 -1.0, %v1457_v22 }
 0x8af   : > { %v1482_v25 = vmul.f32 0.5, %v1478_v23  ;;  %vm1467_vm6 = vcmp.ge.f32.partialorder %v2434_v24, 0.0 }
 0x8b0   : > { %v1471_v27 = vsel %vm1467_vm6, %v1435_v52, %v1423_v46  ;;  %v1475_v28 = vsel %vm1467_vm6, %v1427_v47, %v1435_v52  ;;  %v1460_v29 = vpop.xlane.xlu0 %1459 }
 0x8b1   : > { %v1479_v30 = vadd.f32 %v1475_v28, %v1471_v27  ;;  %v2435_v31 = vadd.f32 -1.0, %v1460_v29  ;;  %v1486_v32 = vsub.f32 %v3474_v18, %v1482_v25 }
 0x8b3   : > { %v1483_v33 = vmul.f32 0.5, %v1479_v30  ;;  %vm1468_vm7 = vcmp.ge.f32.partialorder %v2435_v31, 0.0  ;;  %v1490_v35 = vmax.f32 %v1486_v32, 0.0 }
 0x8b4   : > { %v1472_v36 = vsel %vm1468_vm7, %v1436_v59, %v1424_v54  ;;  %v1476_v37 = vsel %vm1468_vm7, %v1428_v55, %v1436_v59 }
 0x8b5   : > { %v1480_v38 = vadd.f32 %v1476_v37, %v1472_v36  ;;  %v1494_v39 = vmul.f32 %v1490_v35, %v1490_v35  ;;  %v1487_v40 = vsub.f32 %v3477_v21, %v1483_v33 }
 0x8b7   : > { %v1484_v41 = vmul.f32 0.5, %v1480_v38  ;;  %v1500_v42 = vsel %vm852_vm3, %v1494_v39, 0.0  ;;  %v1491_v43 = vmax.f32 %v1487_v40, 0.0 }
 0x8b8   : > { %1501 = vadd.xlane.f32.xlu0 %v1500_v42 }
 0x8b9   : > { %v1495_v44 = vmul.f32 %v1491_v43, %v1491_v43  ;;  %v1488_v45 = vsub.f32 %v3480_v26, %v1484_v41 }
 0x8bb   : > { %v1503_v46 = vsel %vm852_vm3, %v1495_v44, 0.0  ;;  %v1492_v47 = vmax.f32 %v1488_v45, 0.0 }
 0x8bc   : > { %1504 = vadd.xlane.f32.xlu1 %v1503_v46 }
 0x8bd   : > { %v1496_v48 = vmul.f32 %v1492_v47, %v1492_v47 }
 0x8bf   : > { %v1506_v49 = vsel %vm852_vm3, %v1496_v48, 0.0 }
 0x8c0   : > { %1507 = vadd.xlane.f32.xlu0 %v1506_v49 }
 0x8ce   : > { %v1499_v50 = vpop.xlane.xlu1 %1498 }
 0x8cf   : > { %v2436_v51 = vadd.f32 -1.0, %v1499_v50 }
 0x8d1   : > { %vm1513_vm8 = vcmp.ge.f32.partialorder %v2436_v51, 0.0 }
 0x8d2   : > { %v1517_v52 = vsel %vm1513_vm8, %v1481_v10, %v1469_v7  ;;  %v1521_v53 = vsel %vm1513_vm8, %v1473_v8, %v1481_v10 }
 0x8d3   : > { %v1525_v54 = vadd.f32 %v1521_v53, %v1517_v52 }
 0x8d5   : > { %v1529_v55 = vmul.f32 0.5, %v1525_v54 }
 0x8d7   : > { %v1533_v56 = vsub.f32 %v3470_v12, %v1529_v55 }
 0x8d9   : > { %v1537_v57 = vmax.f32 %v1533_v56, 0.0 }
 0x8db   : > { %v1541_v58 = vmul.f32 %v1537_v57, %v1537_v57 }
 0x8dd   : > { %v1545_v59 = vsel %vm852_vm3, %v1541_v58, 0.0 }
 0x8de   : > { %1546 = vadd.xlane.f32.xlu1 %v1545_v59 }
 0x941   : > { %v1502_v60 = vpop.xlane.xlu0 %1501 }
 0x942   : > { %v2437_v61 = vadd.f32 -1.0, %v1502_v60 }
 0x944   : > { %vm1514_vm9 = vcmp.ge.f32.partialorder %v2437_v61, 0.0 }
 0x945   : > { %v1518_v62 = vsel %vm1514_vm9, %v1482_v25, %v1470_v19  ;;  %v1522_v63 = vsel %vm1514_vm9, %v1474_v20, %v1482_v25  ;;  %v1505_v1 = vpop.xlane.xlu1 %1504 }
 0x946   : > { %v1526_v2 = vadd.f32 %v1522_v63, %v1518_v62  ;;  %v2438_v3 = vadd.f32 -1.0, %v1505_v1 }
 0x948   : > { %v1530_v4 = vmul.f32 0.5, %v1526_v2  ;;  %vm1515_vm10 = vcmp.ge.f32.partialorder %v2438_v3, 0.0 }
 0x949   : > { %v1519_v5 = vsel %vm1515_vm10, %v1483_v33, %v1471_v27  ;;  %v1523_v6 = vsel %vm1515_vm10, %v1475_v28, %v1483_v33  ;;  %v1508_v7 = vpop.xlane.xlu0 %1507 }
 0x94a   : > { %v1527_v8 = vadd.f32 %v1523_v6, %v1519_v5  ;;  %v2439_v9 = vadd.f32 -1.0, %v1508_v7  ;;  %v1534_v10 = vsub.f32 %v3474_v18, %v1530_v4 }
 0x94c   : > { %v1531_v11 = vmul.f32 0.5, %v1527_v8  ;;  %vm1516_vm11 = vcmp.ge.f32.partialorder %v2439_v9, 0.0  ;;  %v1538_v13 = vmax.f32 %v1534_v10, 0.0 }
 0x94d   : > { %v1520_v14 = vsel %vm1516_vm11, %v1484_v41, %v1472_v36  ;;  %v1524_v15 = vsel %vm1516_vm11, %v1476_v37, %v1484_v41 }
 0x94e   : > { %v1528_v16 = vadd.f32 %v1524_v15, %v1520_v14  ;;  %v1542_v17 = vmul.f32 %v1538_v13, %v1538_v13  ;;  %v1535_v19 = vsub.f32 %v3477_v21, %v1531_v11 }
 0x950   : > { %v1532_v20 = vmul.f32 0.5, %v1528_v16  ;;  %v1548_v22 = vsel %vm852_vm3, %v1542_v17, 0.0  ;;  %v1539_v23 = vmax.f32 %v1535_v19, 0.0 }
 0x951   : > { %1549 = vadd.xlane.f32.xlu0 %v1548_v22 }
 0x952   : > { %v1543_v24 = vmul.f32 %v1539_v23, %v1539_v23  ;;  %v1536_v25 = vsub.f32 %v3480_v26, %v1532_v20 }
 0x954   : > { %v1551_v27 = vsel %vm852_vm3, %v1543_v24, 0.0  ;;  %v1540_v28 = vmax.f32 %v1536_v25, 0.0 }
 0x955   : > { %1552 = vadd.xlane.f32.xlu1 %v1551_v27 }
 0x956   : > { %v1544_v29 = vmul.f32 %v1540_v28, %v1540_v28 }
 0x958   : > { %v1554_v30 = vsel %vm852_vm3, %v1544_v29, 0.0 }
 0x959   : > { %1555 = vadd.xlane.f32.xlu0 %v1554_v30 }
 0x967   : > { %v1547_v31 = vpop.xlane.xlu1 %1546 }
 0x968   : > { %v2440_v32 = vadd.f32 -1.0, %v1547_v31 }
 0x96a   : > { %vm1561_vm12 = vcmp.ge.f32.partialorder %v2440_v32, 0.0 }
 0x96b   : > { %v1565_v33 = vsel %vm1561_vm12, %v1529_v55, %v1517_v52  ;;  %v1569_v35 = vsel %vm1561_vm12, %v1521_v53, %v1529_v55 }
 0x96c   : > { %v1573_v36 = vadd.f32 %v1569_v35, %v1565_v33 }
 0x96e   : > { %v1577_v37 = vmul.f32 0.5, %v1573_v36 }
 0x970   : > { %v1581_v38 = vsub.f32 %v3470_v12, %v1577_v37 }
 0x972   : > { %v1585_v39 = vmax.f32 %v1581_v38, 0.0 }
 0x974   : > { %v1589_v40 = vmul.f32 %v1585_v39, %v1585_v39 }
 0x976   : > { %v1593_v41 = vsel %vm852_vm3, %v1589_v40, 0.0 }
 0x977   : > { %1594 = vadd.xlane.f32.xlu1 %v1593_v41 }
 0x9da   : > { %v1550_v42 = vpop.xlane.xlu0 %1549 }
 0x9db   : > { %v2441_v43 = vadd.f32 -1.0, %v1550_v42 }
 0x9dd   : > { %vm1562_vm13 = vcmp.ge.f32.partialorder %v2441_v43, 0.0 }
 0x9de   : > { %v1566_v44 = vsel %vm1562_vm13, %v1530_v4, %v1518_v62  ;;  %v1570_v45 = vsel %vm1562_vm13, %v1522_v63, %v1530_v4  ;;  %v1553_v46 = vpop.xlane.xlu1 %1552 }
 0x9df   : > { %v1574_v47 = vadd.f32 %v1570_v45, %v1566_v44  ;;  %v2442_v48 = vadd.f32 -1.0, %v1553_v46 }
 0x9e1   : > { %v1578_v49 = vmul.f32 0.5, %v1574_v47  ;;  %vm1563_vm14 = vcmp.ge.f32.partialorder %v2442_v48, 0.0 }
 0x9e2   : > { %v1567_v50 = vsel %vm1563_vm14, %v1531_v11, %v1519_v5  ;;  %v1571_v51 = vsel %vm1563_vm14, %v1523_v6, %v1531_v11  ;;  %v1556_v52 = vpop.xlane.xlu0 %1555 }
 0x9e3   : > { %v1575_v53 = vadd.f32 %v1571_v51, %v1567_v50  ;;  %v2443_v54 = vadd.f32 -1.0, %v1556_v52  ;;  %v1582_v55 = vsub.f32 %v3474_v18, %v1578_v49 }
 0x9e5   : > { %v1579_v56 = vmul.f32 0.5, %v1575_v53  ;;  %vm1564_vm15 = vcmp.ge.f32.partialorder %v2443_v54, 0.0  ;;  %v1586_v57 = vmax.f32 %v1582_v55, 0.0 }
 0x9e6   : > { %v1568_v58 = vsel %vm1564_vm15, %v1532_v20, %v1520_v14  ;;  %v1572_v59 = vsel %vm1564_vm15, %v1524_v15, %v1532_v20 }
 0x9e7   : > { %v1576_v60 = vadd.f32 %v1572_v59, %v1568_v58  ;;  %v1590_v61 = vmul.f32 %v1586_v57, %v1586_v57  ;;  %v1583_v62 = vsub.f32 %v3477_v21, %v1579_v56 }
 0x9e9   : > { %v1580_v63 = vmul.f32 0.5, %v1576_v60  ;;  %v1596_v1 = vsel %vm852_vm3, %v1590_v61, 0.0  ;;  %v1587_v2 = vmax.f32 %v1583_v62, 0.0 }
 0x9ea   : > { %1597 = vadd.xlane.f32.xlu0 %v1596_v1 }
 0x9eb   : > { %v1591_v3 = vmul.f32 %v1587_v2, %v1587_v2  ;;  %v1584_v4 = vsub.f32 %v3480_v26, %v1580_v63 }
 0x9ed   : > { %v1599_v5 = vsel %vm852_vm3, %v1591_v3, 0.0  ;;  %v1588_v6 = vmax.f32 %v1584_v4, 0.0 }
 0x9ee   : > { %1600 = vadd.xlane.f32.xlu1 %v1599_v5 }
 0x9ef   : > { %v1592_v7 = vmul.f32 %v1588_v6, %v1588_v6 }
 0x9f1   : > { %v1602_v8 = vsel %vm852_vm3, %v1592_v7, 0.0 }
 0x9f2   : > { %1603 = vadd.xlane.f32.xlu0 %v1602_v8 }
 0xa00   : > { %v1595_v9 = vpop.xlane.xlu1 %1594 }
 0xa01   : > { %v2444_v10 = vadd.f32 -1.0, %v1595_v9 }
 0xa03   : > { %vm1609_vm5 = vcmp.ge.f32.partialorder %v2444_v10, 0.0 }
 0xa04   : > { %v1613_v11 = vsel %vm1609_vm5, %v1577_v37, %v1565_v33  ;;  %v1617_v13 = vsel %vm1609_vm5, %v1569_v35, %v1577_v37 }
 0xa05   : > { %v1621_v14 = vadd.f32 %v1617_v13, %v1613_v11 }
 0xa07   : > { %v1625_v15 = vmul.f32 0.5, %v1621_v14 }
 0xa09   : > { %v1629_v16 = vsub.f32 %v3470_v12, %v1625_v15 }
 0xa0b   : > { %v1633_v17 = vmax.f32 %v1629_v16, 0.0 }
 0xa0d   : > { %v1637_v19 = vmul.f32 %v1633_v17, %v1633_v17 }
 0xa0f   : > { %v1641_v20 = vsel %vm852_vm3, %v1637_v19, 0.0 }
 0xa10   : > { %1642 = vadd.xlane.f32.xlu1 %v1641_v20 }
 0xa73   : > { %v1598_v22 = vpop.xlane.xlu0 %1597 }
 0xa74   : > { %v2445_v23 = vadd.f32 -1.0, %v1598_v22 }
 0xa76   : > { %vm1610_vm6 = vcmp.ge.f32.partialorder %v2445_v23, 0.0 }
 0xa77   : > { %v1614_v24 = vsel %vm1610_vm6, %v1578_v49, %v1566_v44  ;;  %v1618_v25 = vsel %vm1610_vm6, %v1570_v45, %v1578_v49  ;;  %v1601_v27 = vpop.xlane.xlu1 %1600 }
 0xa78   : > { %v1622_v28 = vadd.f32 %v1618_v25, %v1614_v24  ;;  %v2446_v29 = vadd.f32 -1.0, %v1601_v27 }
 0xa7a   : > { %v1626_v30 = vmul.f32 0.5, %v1622_v28  ;;  %vm1611_vm7 = vcmp.ge.f32.partialorder %v2446_v29, 0.0 }
 0xa7b   : > { %v1615_v31 = vsel %vm1611_vm7, %v1579_v56, %v1567_v50  ;;  %v1619_v32 = vsel %vm1611_vm7, %v1571_v51, %v1579_v56  ;;  %v1604_v33 = vpop.xlane.xlu0 %1603 }
 0xa7c   : > { %v1623_v35 = vadd.f32 %v1619_v32, %v1615_v31  ;;  %v2447_v36 = vadd.f32 -1.0, %v1604_v33  ;;  %v1630_v37 = vsub.f32 %v3474_v18, %v1626_v30 }
 0xa7e   : > { %v1627_v38 = vmul.f32 0.5, %v1623_v35  ;;  %vm1612_vm8 = vcmp.ge.f32.partialorder %v2447_v36, 0.0  ;;  %v1634_v39 = vmax.f32 %v1630_v37, 0.0 }
 0xa7f   : > { %v1616_v40 = vsel %vm1612_vm8, %v1580_v63, %v1568_v58  ;;  %v1620_v41 = vsel %vm1612_vm8, %v1572_v59, %v1580_v63 }
 0xa80   : > { %v1624_v42 = vadd.f32 %v1620_v41, %v1616_v40  ;;  %v1638_v43 = vmul.f32 %v1634_v39, %v1634_v39  ;;  %v1631_v44 = vsub.f32 %v3477_v21, %v1627_v38 }
 0xa82   : > { %v1628_v45 = vmul.f32 0.5, %v1624_v42  ;;  %v1644_v46 = vsel %vm852_vm3, %v1638_v43, 0.0  ;;  %v1635_v47 = vmax.f32 %v1631_v44, 0.0 }
 0xa83   : > { %1645 = vadd.xlane.f32.xlu0 %v1644_v46 }
 0xa84   : > { %v1639_v48 = vmul.f32 %v1635_v47, %v1635_v47  ;;  %v1632_v49 = vsub.f32 %v3480_v26, %v1628_v45 }
 0xa86   : > { %v1647_v50 = vsel %vm852_vm3, %v1639_v48, 0.0  ;;  %v1636_v51 = vmax.f32 %v1632_v49, 0.0 }
 0xa87   : > { %1648 = vadd.xlane.f32.xlu1 %v1647_v50 }
 0xa88   : > { %v1640_v52 = vmul.f32 %v1636_v51, %v1636_v51 }
 0xa8a   : > { %v1650_v53 = vsel %vm852_vm3, %v1640_v52, 0.0 }
 0xa8b   : > { %1651 = vadd.xlane.f32.xlu0 %v1650_v53 }
 0xa99   : > { %v1643_v54 = vpop.xlane.xlu1 %1642 }
 0xa9a   : > { %v2448_v55 = vadd.f32 -1.0, %v1643_v54 }
 0xa9c   : > { %vm1657_vm9 = vcmp.ge.f32.partialorder %v2448_v55, 0.0 }
 0xa9d   : > { %v1661_v56 = vsel %vm1657_vm9, %v1625_v15, %v1613_v11  ;;  %v1665_v57 = vsel %vm1657_vm9, %v1617_v13, %v1625_v15 }
 0xa9e   : > { %v1669_v58 = vadd.f32 %v1665_v57, %v1661_v56 }
 0xaa0   : > { %v1673_v59 = vmul.f32 0.5, %v1669_v58 }
 0xaa2   : > { %v1677_v60 = vsub.f32 %v3470_v12, %v1673_v59 }
 0xaa4   : > { %v1681_v61 = vmax.f32 %v1677_v60, 0.0 }
 0xaa6   : > { %v1685_v62 = vmul.f32 %v1681_v61, %v1681_v61 }
 0xaa8   : > { %v1689_v63 = vsel %vm852_vm3, %v1685_v62, 0.0 }
 0xaa9   : > { %1690 = vadd.xlane.f32.xlu1 %v1689_v63 }
 0xb0c   : > { %v1646_v1 = vpop.xlane.xlu0 %1645 }
 0xb0d   : > { %v2449_v2 = vadd.f32 -1.0, %v1646_v1 }
 0xb0f   : > { %vm1658_vm10 = vcmp.ge.f32.partialorder %v2449_v2, 0.0 }
 0xb10   : > { %v1662_v3 = vsel %vm1658_vm10, %v1626_v30, %v1614_v24  ;;  %v1666_v4 = vsel %vm1658_vm10, %v1618_v25, %v1626_v30  ;;  %v1649_v5 = vpop.xlane.xlu1 %1648 }
 0xb11   : > { %v1670_v6 = vadd.f32 %v1666_v4, %v1662_v3  ;;  %v2450_v7 = vadd.f32 -1.0, %v1649_v5 }
 0xb13   : > { %v1674_v8 = vmul.f32 0.5, %v1670_v6  ;;  %vm1659_vm11 = vcmp.ge.f32.partialorder %v2450_v7, 0.0 }
 0xb14   : > { %v1663_v9 = vsel %vm1659_vm11, %v1627_v38, %v1615_v31  ;;  %v1667_v10 = vsel %vm1659_vm11, %v1619_v32, %v1627_v38  ;;  %v1652_v11 = vpop.xlane.xlu0 %1651 }
 0xb15   : > { %v1671_v13 = vadd.f32 %v1667_v10, %v1663_v9  ;;  %v2451_v14 = vadd.f32 -1.0, %v1652_v11  ;;  %v1678_v15 = vsub.f32 %v3474_v18, %v1674_v8 }
 0xb17   : > { %v1675_v16 = vmul.f32 0.5, %v1671_v13  ;;  %vm1660_vm12 = vcmp.ge.f32.partialorder %v2451_v14, 0.0  ;;  %v1682_v17 = vmax.f32 %v1678_v15, 0.0 }
 0xb18   : > { %v1664_v19 = vsel %vm1660_vm12, %v1628_v45, %v1616_v40  ;;  %v1668_v20 = vsel %vm1660_vm12, %v1620_v41, %v1628_v45 }
 0xb19   : > { %v1672_v22 = vadd.f32 %v1668_v20, %v1664_v19  ;;  %v1686_v23 = vmul.f32 %v1682_v17, %v1682_v17  ;;  %v1679_v24 = vsub.f32 %v3477_v21, %v1675_v16 }
 0xb1b   : > { %v1676_v25 = vmul.f32 0.5, %v1672_v22  ;;  %v1692_v27 = vsel %vm852_vm3, %v1686_v23, 0.0  ;;  %v1683_v28 = vmax.f32 %v1679_v24, 0.0  ;;  %v1776_v23 = vmul.f32 %v3480_v26, %v3480_v26 }
 0xb1c   : > { %1693 = vadd.xlane.f32.xlu0 %v1692_v27 }
 0xb1d   : > { %v1687_v29 = vmul.f32 %v1683_v28, %v1683_v28  ;;  %v1680_v30 = vsub.f32 %v3480_v26, %v1676_v25 }
 0xb1f   : > { %v1695_v31 = vsel %vm852_vm3, %v1687_v29, 0.0  ;;  %v1684_v32 = vmax.f32 %v1680_v30, 0.0 }
 0xb20   : > { %1696 = vadd.xlane.f32.xlu1 %v1695_v31 }
 0xb21   : > { %v1688_v33 = vmul.f32 %v1684_v32, %v1684_v32 }
 0xb23   : > { %v1698_v35 = vsel %vm852_vm3, %v1688_v33, 0.0 }
 0xb24   : > { %1699 = vadd.xlane.f32.xlu0 %v1698_v35 }
 0xb32   : > { %v1691_v36 = vpop.xlane.xlu1 %1690 }
 0xb33   : > { %v2452_v37 = vadd.f32 -1.0, %v1691_v36 }
 0xb35   : > { %vm1705_vm13 = vcmp.ge.f32.partialorder %v2452_v37, 0.0 }
 0xb36   : > { %v1709_v38 = vsel %vm1705_vm13, %v1673_v59, %v1661_v56  ;;  %v1713_v39 = vsel %vm1705_vm13, %v1665_v57, %v1673_v59 }
 0xb37   : > { %v1717_v40 = vadd.f32 %v1713_v39, %v1709_v38 }
 0xb39   : > { %v1721_v41 = vmul.f32 0.5, %v1717_v40 }
 0xb3b   : > { %vm1725_vm14 = vcmp.gt.f32.partialorder %v3470_v12, %v1721_v41 }
 0xb3c   : > { %v2456_v42 = vsel %vm1725_vm14, 1.0, %v3107_v0 }
 0xb3d   : > { %v1737_v43 = vsel %vm852_vm3, %v2456_v42, 0.0 }
 0xb3e   : > { %1738 = vadd.xlane.f32.xlu1 %v1737_v43 }
 0xba5   : > { %v1694_v44 = vpop.xlane.xlu0 %1693 }
 0xba6   : > { %v2453_v45 = vadd.f32 -1.0, %v1694_v44 }
 0xba8   : > { %vm1706_vm15 = vcmp.ge.f32.partialorder %v2453_v45, 0.0 }
 0xba9   : > { %v1710_v46 = vsel %vm1706_vm15, %v1674_v8, %v1662_v3  ;;  %v1714_v47 = vsel %vm1706_vm15, %v1666_v4, %v1674_v8  ;;  %v1697_v48 = vpop.xlane.xlu1 %1696  ;;  %v1749_v3 = vmul.f32 %v2456_v42, %v3470_v12  ;;  %v1773_v4 = vmul.f32 %v3470_v12, %v3470_v12 }
 0xbaa   : > { %v1718_v49 = vadd.f32 %v1714_v47, %v1710_v46  ;;  %v2454_v50 = vadd.f32 -1.0, %v1697_v48 }
 0xbab   : > { %v1753_v6 = vsel %vm852_vm3, %v1749_v3, 0.0  ;;  %v1777_v8 = vmul.f32 %v2456_v42, %v1773_v4 }
 0xbac   : > { %v1722_v51 = vmul.f32 0.5, %v1718_v49  ;;  %vm1707_vm5 = vcmp.ge.f32.partialorder %v2454_v50, 0.0 }
 0xbad   : > { %v1711_v52 = vsel %vm1707_vm5, %v1675_v16, %v1663_v9  ;;  %v1715_v53 = vsel %vm1707_vm5, %v1667_v10, %v1675_v16  ;;  %v1700_v54 = vpop.xlane.xlu0 %1699  ;;  %v1774_v10 = vmul.f32 %v3474_v18, %v3474_v18  ;;  %v1781_v11 = vsel %vm852_vm3, %v1777_v8, 0.0 }
 0xbae   : > { %v1719_v55 = vadd.f32 %v1715_v53, %v1711_v52  ;;  %v2455_v56 = vadd.f32 -1.0, %v1700_v54  ;;  %vm1726_vm6 = vcmp.gt.f32.partialorder %v3474_v18, %v1722_v51  ;;  %v1775_v16 = vmul.f32 %v3477_v21, %v3477_v21 }
 0xbaf   : > { %v2457_v57 = vsel %vm1726_vm6, 1.0, %v3107_v0 }
 0xbb0   : > { %v1723_v58 = vmul.f32 0.5, %v1719_v55  ;;  %vm1708_vm7 = vcmp.ge.f32.partialorder %v2455_v56, 0.0  ;;  %v1740_v59 = vsel %vm852_vm3, %v2457_v57, 0.0  ;;  %v1750_v9 = vmul.f32 %v2457_v57, %v3474_v18 }
 0xbb1   : > { %v1712_v60 = vsel %vm1708_vm7, %v1676_v25, %v1664_v19  ;;  %v1716_v61 = vsel %vm1708_vm7, %v1668_v20, %v1676_v25  ;;  %1741 = vadd.xlane.f32.xlu0 %v1740_v59  ;;  %v1778_v15 = vmul.f32 %v2457_v57, %v1774_v10 }
 0xbb2   : > { %v1720_v62 = vadd.f32 %v1716_v61, %v1712_v60  ;;  %vm1727_vm8 = vcmp.gt.f32.partialorder %v3477_v21, %v1723_v58  ;;  %v1756_v13 = vsel %vm852_vm3, %v1750_v9, 0.0 }
 0xbb3   : > { %v2458_v63 = vsel %vm1727_vm8, 1.0, %v3107_v0  ;;  %v1784_v19 = vsel %vm852_vm3, %v1778_v15, 0.0 }
 0xbb4   : > { %v1724_v1 = vmul.f32 0.5, %v1720_v62  ;;  %v1743_v2 = vsel %vm852_vm3, %v2458_v63, 0.0  ;;  %v1751_v14 = vmul.f32 %v2458_v63, %v3477_v21  ;;  %v1779_v20 = vmul.f32 %v2458_v63, %v1775_v16 }
 0xbb5   : > { %1744 = vadd.xlane.f32.xlu1 %v1743_v2 }
 0xbb6   : > { %vm1728_vm9 = vcmp.gt.f32.partialorder %v3480_v26, %v1724_v1  ;;  %v1759_v17 = vsel %vm852_vm3, %v1751_v14, 0.0  ;;  %v1787_v24 = vsel %vm852_vm3, %v1779_v20, 0.0 }
 0xbb7   : > { %v2459_v5 = vsel %vm1728_vm9, 1.0, %v3107_v0 }
 0xbb8   : > { %v1746_v7 = vsel %vm852_vm3, %v2459_v5, 0.0  ;;  %v1752_v22 = vmul.f32 %v2459_v5, %v3480_v26  ;;  %v1780_v27 = vmul.f32 %v2459_v5, %v1776_v23 }
 0xbb9   : > { %1754 = vadd.xlane.f32.xlu1 %v1753_v6  ;;  %1747 = vadd.xlane.f32.xlu0 %v1746_v7 }
 0xbba   : > { %v1762_v25 = vsel %vm852_vm3, %v1752_v22, 0.0  ;;  %v1790_v28 = vsel %vm852_vm3, %v1780_v27, 0.0 }
 0xbbd   : > { %1782 = vadd.xlane.f32.xlu1 %v1781_v11  ;;  %1757 = vadd.xlane.f32.xlu0 %v1756_v13 }
 0xbc1   : > { %1760 = vadd.xlane.f32.xlu1 %v1759_v17  ;;  %1785 = vadd.xlane.f32.xlu0 %v1784_v19 }
 0xbc5   : > { %1788 = vadd.xlane.f32.xlu1 %v1787_v24  ;;  %1763 = vadd.xlane.f32.xlu0 %v1762_v25 }
 0xbc7   : > { %v1739_v29 = vpop.xlane.xlu1 %1738 }
 0xbc8   : > { %2742 = vrcp.f32 %v1739_v29 }
 0xbc9   : > { %1791 = vadd.xlane.f32.xlu0 %v1790_v28 }
 0xbd5   : > { %v2743_v32 = vpop.eup %2742 }
 0xbd6   : > { %729 = vrot.lane.b32.xlu1 %v3439_v34, %s3110_s12 }
 0xbda   : > { %749 = vrot.lane.b32.xlu1 %v3439_v34, %s3109_s23  ;;  %s3799_s23 = sld [smem:[#allocation38_spill]] }
 0xbdf   : > { %739 = vrot.lane.b32.xlu0 %v3439_v34, %s3111_s29  ;;  %s2156_s29 = scalar_lea.sflag [#allocation8], %s3371_s7 }
 0xbe0   : > { %s3687_s12 = scalar_lea.hbm %s3799_s23, %s2472_s15 }
 0xc3a   : > { %v1742_v30 = vpop.xlane.xlu0 %1741 }
 0xc3b   : > { %2744 = vrcp.f32 %v1742_v30 }
 0xc3e   : > { %v1745_v31 = vpop.xlane.xlu1 %1744 }
 0xc3f   : > { %2746 = vrcp.f32 %v1745_v31 }
 0xc42   : > { %v1755_v33 = vpop.xlane.xlu1 %1754  ;;  %v1748_v35 = vpop.xlane.xlu0 %1747 }
 0xc43   : > { %v3628_v36 = vmul.f32 %v2743_v32, %v1755_v33  ;;  %2748 = vrcp.f32 %v1748_v35 }
 0xc45   : > { %v1797_v39 = vmul.f32 %v3628_v36, %v3628_v36 }
 0xc46   : > { %v1783_v37 = vpop.xlane.xlu1 %1782  ;;  %v1758_v38 = vpop.xlane.xlu0 %1757 }
 0xc47   : > { %v1793_v40 = vmul.f32 %v2743_v32, %v1783_v37 }
 0xc48   : > { %v2745_v41 = vpop.eup %2744 }
 0xc49   : > { %v1801_v34 = vsub.f32 %v1793_v40, %v1797_v39  ;;  %v3632_v42 = vmul.f32 %v2745_v41, %v1758_v38 }
 0xc4a   : > { %v1761_v43 = vpop.xlane.xlu1 %1760  ;;  %v1786_v44 = vpop.xlane.xlu0 %1785 }
 0xc4b   : > { %v1805_v45 = vmul.f32 %v1801_v34, %v1739_v29  ;;  %v1798_v46 = vmul.f32 %v3632_v42, %v3632_v42  ;;  %v1794_v47 = vmul.f32 %v2745_v41, %v1786_v44 }
 0xc4c   : > { %v2747_v48 = vpop.eup %2746 }
 0xc4d   : > { %v1809_v49 = vsub.f32 1.0, %v1805_v45  ;;  %v3636_v50 = vmul.f32 %v2747_v48, %v1761_v43  ;;  %v1802_v51 = vsub.f32 %v1794_v47, %v1798_v46 }
 0xc4e   : > { %v1789_v52 = vpop.xlane.xlu1 %1788  ;;  %v1764_v53 = vpop.xlane.xlu0 %1763 }
 0xc4f   : > { %v1813_v54 = vmul.f32 %v2743_v32, %v1809_v49  ;;  %v1799_v55 = vmul.f32 %v3636_v50, %v3636_v50  ;;  %v1806_v56 = vmul.f32 %v1802_v51, %v1742_v30  ;;  %v1795_v57 = vmul.f32 %v2747_v48, %v1789_v52 }
 0xc50   : > { %v2749_v58 = vpop.eup %2748 }
 0xc51   : > { %v1817_v59 = vmax.f32 %v1813_v54, 0.0  ;;  %v1810_v60 = vsub.f32 1.0, %v1806_v56  ;;  %v1803_v61 = vsub.f32 %v1795_v57, %v1799_v55  ;;  %v3640_v62 = vmul.f32 %v2749_v58, %v1764_v53 }
 0xc52   : > { %v730_v63 = vpop.permute.xlu1 %729  ;;  %v1792_v1 = vpop.xlane.xlu0 %1791 }
 0xc53   : > { %2750 = vrsqrt.f32 %v1817_v59  ;;  %v1814_v2 = vmul.f32 %v2745_v41, %v1810_v60  ;;  %v1807_v3 = vmul.f32 %v1803_v61, %v1745_v31  ;;  %v1800_v4 = vmul.f32 %v3640_v62, %v3640_v62  ;;  %733 = vst.msk [vmem:[#allocation3 + $0x4] sm:$0xf] %vm714_vm2, %v730_v63 }
 0xc54   : > { %v1796_v5 = vmul.f32 %v2749_v58, %v1792_v1  ;;  %vm1823_vm10 = vcmp.eq.f32.partialorder %v1817_v59, inf  ;;  %v1826_v24 = vand.u32 2147483648, %v1817_v59  ;;  %vm1825_vm11 = vcmp.eq.f32.partialorder %v1817_v59, 0.0 }
 0xc55   : > { %v1818_v6 = vmax.f32 %v1814_v2, 0.0  ;;  %v1811_v7 = vsub.f32 1.0, %v1807_v3 }
 0xc56   : > { %v1804_v8 = vsub.f32 %v1796_v5, %v1800_v4  ;;  %v750_v9 = vpop.permute.xlu1 %749  ;;  %v740_v10 = vpop.permute.xlu0 %739  ;;  %v2740_v4 = vld [vmem:[%s3745_s9 + $0x8] sm:$0xff]  }
 0xc57   : > { %2752 = vrsqrt.f32 %v1818_v6  ;;  %v1815_v11 = vmul.f32 %v2747_v48, %v1811_v7  ;;  %753 = vst.msk [vmem:[#allocation3 + $0xc] sm:$0xf] %vm714_vm2, %v750_v9  ;;  %743 = vst.msk [vmem:[#allocation3 + $0x8] sm:$0xf] %vm714_vm2, %v740_v10  ;;  %vm1830_vm12 = vcmp.eq.f32.partialorder %v1818_v6, inf  ;;  %v1833_v31 = vand.u32 2147483648, %v1818_v6 }
 0xc58   : > { %v1808_v13 = vmul.f32 %v1804_v8, %v1748_v35  ;;  %vm1832_vm13 = vcmp.eq.f32.partialorder %v1818_v6, 0.0 }
 0xc59   : > { %v1819_v14 = vmax.f32 %v1815_v11, 0.0 }
 0xc5a   : > { %v1812_v15 = vsub.f32 1.0, %v1808_v13  ;;  %v1870_v16 = vld [vmem:[#allocation3 + $0x4] sm:$0xf] }
 0xc5b   : > { %2754 = vrsqrt.f32 %v1819_v14  ;;  %v1924_v17 = vsel %vm1876_vm4, %v1870_v16, 0  ;;  %vm1837_vm14 = vcmp.eq.f32.partialorder %v1819_v14, inf  ;;  %v1840_v41 = vand.u32 2147483648, %v1819_v14 }
 0xc5c   : > { %v1816_v19 = vmul.f32 %v2749_v58, %v1812_v15  ;;  %2564 = vmatpush3.bf16.msra.mxu0 %v1924_v17  ;;  %vm1839_vm15 = vcmp.eq.f32.partialorder %v1819_v14, 0.0 }
 0xc5d   : > { %2575 = vmatprep.subr.bf16.mxu0 %v3107_v0 }
 0xc5e   : > { %v1820_v20 = vmax.f32 %v1816_v19, 0.0  ;;  %v1871_v43 = vld [vmem:[#allocation3 + $0x8] sm:$0xf] }
 0xc5f   : > { %v1970_v49 = vsel %vm1876_vm4, %v1871_v43, 0 }
 0xc60   : > { %v2751_v22 = vpop.eup %2750  ;;  %2756 = vrsqrt.f32 %v1820_v20  ;;  %vm1844_vm5 = vcmp.eq.f32.partialorder %v1820_v20, inf  ;;  %v1847_v53 = vand.u32 2147483648, %v1820_v20  ;;  %vm1846_vm6 = vcmp.eq.f32.partialorder %v1820_v20, 0.0 }
 0xc61   : > { %v1822_v23 = vmul.f32 %v2751_v22, %v1817_v59 }
 0xc63   : > { %v1824_v25 = vsel %vm1823_vm10, %v1817_v59, %v1822_v23 }
 0xc64   : > { %v2753_v27 = vpop.eup %2752  ;;  %v1827_v28 = vsel %vm1825_vm11, %v1826_v24, %v1824_v25 }
 0xc65   : > { %v1849_v29 = vsub.f32 %v3628_v36, %v1827_v28  ;;  %v1829_v30 = vmul.f32 %v2753_v27, %v1818_v6 }
 0xc67   : > { %v1853_v32 = vsub.f32 %v3470_v12, %v1849_v29  ;;  %v1831_v33 = vsel %vm1830_vm12, %v1818_v6, %v1829_v30  ;;  %v2741_v6 = vld [vmem:[%s3745_s9] sm:$0xff]  }
 0xc68   : > { %v2755_v35 = vpop.eup %2754  ;;  %v1834_v37 = vsel %vm1832_vm13, %v1833_v31, %v1831_v33  ;;  %v2467_v29 = vld [vmem:[%s3798_s11] ss:$0 sm:$0xff] }
 0xc69   : > { %v1857_v38 = vmax.f32 %v1853_v32, 0.0  ;;  %v1850_v39 = vsub.f32 %v3632_v42, %v1834_v37  ;;  %v1836_v40 = vmul.f32 %v2755_v35, %v1819_v14 }
 0xc6b   : > { %v1861_v34 = vmul.f32 %v1857_v38, %v1857_v38  ;;  %v1854_v44 = vsub.f32 %v3474_v18, %v1850_v39  ;;  %v1838_v36 = vsel %vm1837_vm14, %v1819_v14, %v1836_v40  ;;  %v1872_v18 = vld [vmem:[#allocation3 + $0xc] sm:$0xf] }
 0xc6c   : > { %v1841_v45 = vsel %vm1839_vm15, %v1840_v41, %v1838_v36 }
 0xc6d   : > { %v2757_v46 = vpop.eup %2756  ;;  %v1865_v47 = vpack.c.bf16 %v1861_v34, %v1861_v34  ;;  %v1858_v12 = vmax.f32 %v1854_v44, 0.0  ;;  %v1851_v48 = vsub.f32 %v3636_v50, %v1841_v45 }
 0xc6e   : > { %v1843_v51 = vmul.f32 %v2757_v46, %v1820_v20 }
 0xc6f   : > { %2560 = vmatmul.mubr.msk.bf16.vlgmr.msra.gmra.mxu1 %vm852_vm3, %v1865_v47  ;;  %v1862_v42 = vmul.f32 %v1858_v12, %v1858_v12  ;;  %v1855_v52 = vsub.f32 %v3477_v21, %v1851_v48  ;;  %v2016_v21 = vsel %vm1876_vm4, %v1872_v18, 0 }
 0xc70   : > { %2570 = vmatpush3.bf16.msra.mxu1 %v1970_v49  ;;  %2571 = vmatprep.mubr.msk.bf16.mxu1 %vm3108_vm0, %v3107_v0  ;;  %v1845_v54 = vsel %vm1844_vm5, %v1820_v20, %v1843_v51 }
 0xc71   : > { %v1866_v55 = vpack.c.bf16 %v1862_v42, %v1862_v42  ;;  %v1859_v56 = vmax.f32 %v1855_v52, 0.0  ;;  %v1848_v50 = vsel %vm1846_vm6, %v1847_v53, %v1845_v54  ;;  %2581 = vmatprep.subr.bf16.mxu1 %v3107_v0 }
 0xc72   : > { %v1852_v57 = vsub.f32 %v3640_v62, %v1848_v50 }
 0xc73   : > { %2566 = vmatmul.mubr.msk.bf16.vlgmr.msra.gmra.mxu0 %vm852_vm3, %v1866_v55  ;;  %v1863_v58 = vmul.f32 %v1859_v56, %v1859_v56 }
 0xc74   : > { %2576 = vmatpush3.bf16.msra.mxu0 %v2016_v21  ;;  %2577 = vmatprep.mubr.msk.bf16.mxu0 %vm3108_vm0, %v3107_v0  ;;  %v1856_v59 = vsub.f32 %v3480_v26, %v1852_v57 }
 0xc75   : > { %v1867_v60 = vpack.c.bf16 %v1863_v58, %v1863_v58 }
 0xc76   : > { %v1860_v61 = vmax.f32 %v1856_v59, 0.0 }
 0xc77   : > { %2572 = vmatmul.mubr.msk.bf16.vlgmr.msra.gmra.mxu1 %vm852_vm3, %v1867_v60 }
 0xc78   : > { %v1864_v63 = vmul.f32 %v1860_v61, %v1860_v61  ;;  %2585 = vmatprep.mubr.msk.bf16.mxu1 %vm3108_vm0, %v3107_v0  ;;  %2582 = vmatpush3.bf16.msra.mxu1 %v2740_v4  ;;  %vm2067_vm0 = vcmask 126016  }
 0xc79   : > { %2583 = vmatprep.subr.bf16.mxu1 %v3107_v0 }
 0xc7a   : > { %v1868_v62 = vpack.c.bf16 %v1864_v63, %v1864_v63 }
 0xc7c   : > { %2578 = vmatmul.mubr.msk.bf16.vlgmr.msra.gmra.mxu0 %vm852_vm3, %v1868_v62  ;;  %2584 = vmatpush3.bf16.msra.mxu1 %v2741_v6  ;;  %vm2085_vm3 = vcmask 257216  }
 0xd2f   : > { %v1914_v1 = vpop.f32.mrf.mxu1 }
 0xd30   : > { %v2058_v2 = vpack.c.bf16 %v1914_v1, %v1914_v1 }
 0xd31   : > { %v2561_v3 = vpop.f32.mrf.mxu1 }
 0xd32   : > { %2059 = vst.msk [vmem:[#allocation5] sm:$0xf] %vm714_vm2, %v2058_v2  ;;  %vm2076_vm2 = vcmask 191616  }
 0xd33   : > { %v1917_v26 = vpop.f32.mrf.mxu1  ;;  %v1960_v5 = vpop.f32.mrf.mxu0 }
 0xd34   : > { %v2478_v7 = vpack.c.bf16 %v1960_v5, %v1960_v5 }
 0xd35   : > { %v2562_v8 = vpop.f32.mrf.mxu1  ;;  %v2567_v9 = vpop.f32.mrf.mxu0 }
 0xd36   : > { %2064 = vrot.lane.b32.xlu1 %v2478_v7, %s3114_s17 }
 0xd37   : > { %v1963_v10 = vpop.f32.mrf.mxu0  ;;  %v2006_v11 = vpop.f32.mrf.mxu1 }
 0xd38   : > { %v2479_v13 = vpack.c.bf16 %v2006_v11, %v2006_v11 }
 0xd39   : > { %v2568_v14 = vpop.f32.mrf.mxu0  ;;  %v2573_v15 = vpop.f32.mrf.mxu1 }
 0xd3a   : > { %2073 = vrot.lane.b32.xlu0 %v2479_v13, %s3115_s28 }
 0xd3b   : > { %v2009_v16 = vpop.f32.mrf.mxu1 }
 0xd3c   : > { %v2052_v17 = vpop.f32.mrf.mxu0 }
 0xd3d   : > { %v2480_v19 = vpack.c.bf16 %v2052_v17, %v2052_v17  ;;  %v2574_v20 = vpop.f32.mrf.mxu1 }
 0xd3e   : > { %v2579_v22 = vpop.f32.mrf.mxu0 }
 0xd3f   : > { %2082 = vrot.lane.b32.xlu1 %v2480_v19, %s3116_s22 }
 0xd40   : > { %v2055_v0 = vpop.f32.mrf.mxu0 }
 0xd42   : > { %v2580_v23 = vpop.f32.mrf.mxu0 }
 0xda8   : > { %v2065_v24 = vpop.permute.xlu1 %2064 }
 0xda9   : > { %2068 = vst.msk [vmem:[#allocation5] sm:$0xf] %vm2067_vm0, %v2065_v24 }
 0xdac   : > { %v2074_v25 = vpop.permute.xlu0 %2073 }
 0xdad   : > { %2077 = vst.msk [vmem:[#allocation5] sm:$0xf] %vm2076_vm2, %v2074_v25 }
 0xdb1   : > { %v2083_v27 = vpop.permute.xlu1 %2082 }
 0xdb2   : > { %2086 = vst.msk [vmem:[#allocation5] sm:$0xf] %vm2085_vm3, %v2083_v27 }
 0xdb9   : > { %v2087_v28 = vld [vmem:[#allocation5] sm:$0xf] }
 0xdba   : > { %2586 = vmatmul.mubr.msk.bf16.vlgmr.msra.gmra.mxu1 %vm603_vm1, %v2087_v28 }
 0xe7a   : > { %v2148_v30 = vpop.f32.mrf.mxu1 }
 0xe7b   : > { %v2149_v31 = vadd.f32 %v2467_v29, %v2148_v30 }
 0xe7c   : > { %v2587_v32 = vpop.f32.mrf.mxu1 }
 0xe7d   : > { %2154 = vst.msk [vmem:[%s570_s5] sm:$0xff] %vm603_vm1, %v2149_v31 }
 0xe7e   : > { %v2151_v33 = vpop.f32.mrf.mxu1 }
 0xe7f   : > { %3011 = shalt.err (!%p3008_p11)
}
 0xe80   : > { %s3012_s14 = scalar_lea.hbm %s3687_s12, 128  ;;  %s3016_s17 = scalar_lea.hbm %s3799_s23, 256 }
 0xe81   : > { %p3013_p3 = scmp.ne.s32.totalorder %s3687_s12, %s3012_s14  ;;  %p3017_p4 = scmp.lt.s32.totalorder %s3687_s12, %s3799_s23 }
 0xe82   : > { %p3018_p8 = scmp.lt.s32.totalorder %s3016_s17, %s3012_s14 }
 0xe83   : > { %p3014_p5 = pnand %p3013_p3, %p3800_p12 }
 0xe84   : > { %p3019_p9 = por %p3018_p8, %p3017_p4 }
 0xe85   : > { %p3015_p0 = pneg %p3014_p5 }
 0xe87   : > { %p3020_p1 = pnand %p3019_p9, %p3015_p0 }
 0xe89   : > { %3023 = shalt.err (!%p3020_p1)
}
 0xe8a   : > { %2619 = dma.vmem_to_hbm [thread:$0]  (%p3800_p12), %s3689_s21, 128, %s3687_s12, %s2156_s29   ;;  %v2588_v35 = vpop.f32.mrf.mxu1 }
 0xe8b PF: > { %s3801_s3 = sld [smem:[#allocation28_spill]] }
 0xe8c   : > { %s3802_s30 = sld [smem:[#allocation33_spill]] }
 0xe8d   : > { %s3803_s11 = sld [smem:[#allocation30_spill]] }
 0xe91   : > { %s2182_s15 = sand.u32 1, %s3801_s3  }
 0xe92   : > { %p3804_p10 = scmp.ne.s32.totalorder %s3802_s30, 0  ;;  %s2183_s5 = scalar_lea.sflag [#allocation8], %s2182_s15 }
 0xe93   : > { %p3805_p7 = scmp.ge.s32.totalorder %s3803_s11, 2 }
 0xe95   : > { %p2651_p13 = pnand %p3805_p7, %p3804_p10 }
 0xe97   : > { %p2652_p6 = pneg %p2651_p13 }
 0xe99   : > { %3069 = dma.done.wait (%p2652_p6), %s2183_s5, 128  }
 0xe9a   : > { %3071 = vsyncadd (%p2652_p6), %s2183_s5, 4294967168  ;;  %s33_s22 = sadd.s32 1, %s3803_s11   ;;  %s3806_s16 = sld [smem:[#allocation32_spill]] }
 0xe9b   : > { %p30_p2 = scmp.ge.s32.totalorder %s33_s22, 4   ;;  %s3807_s20 = sld [smem:[#allocation29_spill]] }
 0xe9c   : > { %s3808_s21 = sld [smem:[#allocation31_spill]]  ;;  %s3809_s17 = smov %s3078_s18 }
 0xe9d   : > { %s3810_s18 = smov %s3082_s19  ;;  %32 = sbr.rel (!%p30_p2) target bundleno = 17 (0x11), region = 170 }
 0xea0   : > { %s3811_s19 = smov %s3806_s16 }
 0xea2   :  { %2188 = vsyncpa [#allocation7], 1 }
 0xea3   :  { %2190 = vsyncpa [#allocation7 + $0x1], 1 }
 0xea4   :  { %2191 = vsyncpa [#allocation10], 1 }
 0xea5   :  { %2193 = vsyncpa [#allocation10 + $0x1], 1 }
 0xea6   :  { %2194 = vsyncpa [#allocation13], 1 }
 0xea7   :  { %2195 = vsyncpa [#allocation16], 1 }
 0xea8   :  { %2196 = vsyncpa [#allocation19], 1 }
 0xea9   :  { %2197 = vsyncpa [#allocation8], 1 }
 0xeaa   :  { %2199 = vsyncpa [#allocation8 + $0x1], 1 }

</bundles_post_ra>
